<compile_context>
chip_gen: v6e
topology: v6e:2x2x1
jax: 0.10.0
libtpu: 0.0.40
codegen_flags: <defaults>
</compile_context>

<pallas_src>
import jax
import jax.numpy as jnp
from jax.experimental import pallas as pl
from jax.experimental.pallas import tpu as pltpu


def _round_up(x, m):
    return ((x + m - 1) // m) * m


def _cdiv(a, b):
    return -(-a // b)


def _largest_tile(dim128, cap):
    """Largest multiple of 128 that divides dim128 (a multiple of 128), <= cap."""
    u = dim128 // 128
    best = 1
    for d in range(1, u + 1):
        if u % d == 0 and d * 128 <= cap:
            best = d
    return best * 128


def _padded_tile_bytes(shape, itemsize):
    """VMEM footprint of one tile, accounting for (8,128) layout padding."""
    dims = list(shape)
    if len(dims) >= 1:
        dims[-1] = _round_up(dims[-1], 128)
    if len(dims) >= 2:
        dims[-2] = _round_up(dims[-2], 8)
    n = 1
    for d in dims:
        n *= d
    return n * itemsize


# --------------------------------------------------------------------------
# Fused path (stride == 1): no HBM im2col.
# --------------------------------------------------------------------------
def _make_fused_kernel(K, bh, W_out_p, C_in, bn):
    def kernel(xs_ref, w_ref, o_ref):
        # xs_ref: (K, 1, bh, W_pp, C_in)  -- K row-shifted input slabs (bf16)
        # w_ref : (K, K, C_in, bn)        -- weight, VMEM-resident (bf16)
        # o_ref : (1, bh*W_out_p, bn)
        acc = None
        for kh in range(K):
            xk = xs_ref[kh, 0]                                # (bh, W_pp, C_in)
            for kw in range(K):
                a = xk[:, kw:kw + W_out_p, :]                 # (bh, W_out_p, C_in)
                a = a.reshape(bh * W_out_p, C_in)
                c = jnp.dot(a, w_ref[kh, kw],
                            preferred_element_type=jnp.float32)
                acc = c if acc is None else acc + c
        o_ref[0, :, :] = acc.astype(o_ref.dtype)
    return kernel


def _heconv_fused_s1(x, weight, compute_dtype):
    N, C_in, H, W = x.shape
    C_out, _, K, _ = weight.shape
    p = K // 2
    H_out = H + 2 * p - K + 1
    W_out = W + 2 * p - K + 1

    Np = _round_up(C_out, 128)
    bn = _largest_tile(Np, 512)                    # lane-dense, full C_out when <=512
    W_out_p = _round_up(W_out, 8)                  # sublane-aligned flattening
    W_pp = W_out_p + K - 1

    # Target ~512 output rows (bh * W_out_p) per grid step.
    bh = max(1, min(H_out, 512 // max(W_out_p, 1)))

    # v7x: keep >= 2 parallel grid blocks so both TensorCores get work.
    def n_blocks(bh_):
        return N * _cdiv(H_out, bh_) * (Np // bn)
    while n_blocks(bh) < 2 and bh > 1:
        bh = max(1, bh // 2)

    out_itemsize = jnp.dtype(x.dtype).itemsize
    cdt_itemsize = jnp.dtype(compute_dtype).itemsize

    def vmem_est(bh_, bn_):
        xs_blk = _padded_tile_bytes((K, 1, bh_, W_pp, C_in), cdt_itemsize)
        w_blk = _padded_tile_bytes((K, K, C_in, bn_), cdt_itemsize)
        o_blk = _padded_tile_bytes((1, bh_ * W_out_p, bn_), out_itemsize)
        acc = _padded_tile_bytes((bh_ * W_out_p, bn_), 4)
        return 2 * xs_blk + 2 * w_blk + 2 * o_blk + acc

    # Shrink tiles only if they would not fit comfortably in VMEM.
    while vmem_est(bh, bn) > 36 * 1024 * 1024 and bh > 1:
        bh = max(1, bh // 2)
    while vmem_est(bh, bn) > 36 * 1024 * 1024 and bn > 128:
        nb = bn // 2
        if nb % 128 == 0 and Np % nb == 0:
            bn = nb
        else:
            break

    RB = _cdiv(H_out, bh)
    H_out_p = RB * bh
    H_pp = H_out_p + K - 1

    # Layout plumbing (cheap): NCHW -> NHWC, bf16, zero-pad to the padded grid.
    xh = jnp.transpose(x.astype(compute_dtype), (0, 2, 3, 1))        # (N,H,W,C)
    x_pad = jnp.pad(xh, ((0, 0), (p, H_pp - H - p), (p, W_pp - W - p), (0, 0)))
    # K row-shifted views: xs[kh, n, ho, :, :] = x_pad[n, ho+kh, :, :].
    # Only K x the input (not K^2 as im2col), and all BlockSpecs stay Blocked.
    xs = jnp.stack([x_pad[:, kh:kh + H_out_p] for kh in range(K)], axis=0)

    w4 = jnp.transpose(weight, (2, 3, 1, 0)).astype(compute_dtype)   # (K,K,Cin,Cout)
    w4 = jnp.pad(w4, ((0, 0), (0, 0), (0, 0), (0, Np - C_out)))

    kern = _make_fused_kernel(K, bh, W_out_p, C_in, bn)
    vmem_limit = int(min(48 * 1024 * 1024,
                         max(16 * 1024 * 1024, 2 * vmem_est(bh, bn))))

    out = pl.pallas_call(
        kern,
        out_shape=jax.ShapeDtypeStruct((N, H_out_p * W_out_p, Np), x.dtype),
        grid_spec=pltpu.PrefetchScalarGridSpec(
            num_scalar_prefetch=0,
            grid=(N, RB, Np // bn),
            in_specs=[
                # Activations: re-used across the j axis (block index is constant in j).
                pl.BlockSpec((K, 1, bh, W_pp, C_in), lambda n, r, j: (0, n, r, 0, 0)),
                # Weights: VMEM-resident; fetched only when j changes.
                pl.BlockSpec((K, K, C_in, bn), lambda n, r, j: (0, 0, 0, j)),
            ],
            out_specs=pl.BlockSpec((1, bh * W_out_p, bn), lambda n, r, j: (n, r, j)),
        ),
        compiler_params=pltpu.CompilerParams(
            dimension_semantics=("parallel", "parallel", "parallel"),
            vmem_limit_bytes=vmem_limit,
        ),
    )(xs, w4)

    out = out.reshape(N, H_out_p, W_out_p, Np)[:, :H_out, :W_out, :C_out]
    return jnp.transpose(out, (0, 3, 1, 2))                          # NCHW


# --------------------------------------------------------------------------
# Fallback path (stride != 1): im2col + tiled MXU matmul (bf16 operands).
# --------------------------------------------------------------------------
def _conv_matmul_kernel(a_ref, b_ref, o_ref, acc_ref):
    @pl.when(pl.program_id(2) == 0)
    def _():
        acc_ref[...] = jnp.zeros_like(acc_ref)

    acc_ref[...] += jnp.dot(a_ref[...], b_ref[...],
                            preferred_element_type=jnp.float32)

    @pl.when(pl.program_id(2) == pl.num_programs(2) - 1)
    def _():
        o_ref[...] = acc_ref[...].astype(o_ref.dtype)


def _heconv_im2col(x, weight, stride, compute_dtype):
    N, C_in, H, W = x.shape
    C_out, _, K, _ = weight.shape
    p = K // 2
    H_out = (H + 2 * p - K) // stride + 1
    W_out = (W + 2 * p - K) // stride + 1

    xh = jnp.transpose(x.astype(compute_dtype), (0, 2, 3, 1))
    x_pad = jnp.pad(xh, ((0, 0), (p, p), (p, p), (0, 0)))
    slices = []
    for kh in range(K):
        for kw in range(K):
            sl = jax.lax.slice(
                x_pad, (0, kh, kw, 0),
                (N, kh + (H_out - 1) * stride + 1,
                 kw + (W_out - 1) * stride + 1, C_in),
                (1, stride, stride, 1))
            slices.append(sl)
    patches = jnp.stack(slices, axis=3)                    # (N,Ho,Wo,K*K,Cin)

    M = N * H_out * W_out
    Kdim = K * K * C_in
    a = patches.reshape(M, Kdim)
    b = jnp.transpose(weight, (2, 3, 1, 0)).reshape(Kdim, C_out).astype(compute_dtype)

    Kp = _round_up(Kdim, 128)                # no extra reduction-dim zero pad
    Np = _round_up(C_out, 128)
    bk = _largest_tile(Kp, 2048)
    bn = _largest_tile(Np, 512)
    bm = min(512, _round_up(M, 16))          # 16-row alignment for bf16 packing
    Mp = _round_up(M, bm)

    a = jnp.pad(a, ((0, Mp - M), (0, Kp - Kdim)))
    b = jnp.pad(b, ((0, Kp - Kdim), (0, Np - C_out)))

    cbytes = jnp.dtype(compute_dtype).itemsize
    obytes = jnp.dtype(x.dtype).itemsize
    needed = (2 * (bm * bk + bk * bn) * cbytes + 2 * bm * bn * obytes + bm * bn * 4)
    vmem_limit = int(min(48 * 1024 * 1024, max(2 * needed, 16 * 1024 * 1024)))

    out2d = pl.pallas_call(
        _conv_matmul_kernel,
        out_shape=jax.ShapeDtypeStruct((Mp, Np), x.dtype),
        grid_spec=pltpu.PrefetchScalarGridSpec(
            num_scalar_prefetch=0,
            grid=(Mp // bm, Np // bn, Kp // bk),
            in_specs=[pl.BlockSpec((bm, bk), lambda i, j, k: (i, k)),
                      pl.BlockSpec((bk, bn), lambda i, j, k: (k, j))],
            out_specs=pl.BlockSpec((bm, bn), lambda i, j, k: (i, j)),
            scratch_shapes=[pltpu.VMEM((bm, bn), jnp.float32)]),
        compiler_params=pltpu.CompilerParams(
            dimension_semantics=("parallel", "parallel", "arbitrary"),
            vmem_limit_bytes=vmem_limit),
    )(a, b)

    out = out2d[:M, :C_out].reshape(N, H_out, W_out, C_out)
    return jnp.transpose(out, (0, 3, 1, 2))


# --------------------------------------------------------------------------
# Public entry point.
# --------------------------------------------------------------------------
def heconv(x, weight, stride=1, compute_dtype=jnp.bfloat16):
    """HEConv.forward: Conv2d(kernel=K, stride, padding=K//2, bias=False).

    x: (N, C_in, H, W); weight: (C_out, C_in, K, K) -> (N, C_out, H_out, W_out).
    The offset tensors built in custom_convolution are dead code and omitted.
    Operands run through the MXU in `compute_dtype` (bf16) with f32 accumulation.
    """
    if stride == 1:
        return _heconv_fused_s1(x, weight, compute_dtype)
    # TODO(synk): extend the fused (no-im2col) path to stride > 1 via a
    # phase-split W layout; until then stride > 1 uses the im2col matmul path.
    return _heconv_im2col(x, weight, stride, compute_dtype)


def heconv_reference(x, weight, stride=1, compute_dtype=jnp.bfloat16):
    """XLA reference with matching bf16-operand / f32-accumulate numerics."""
    K = weight.shape[2]
    p = K // 2
    out = jax.lax.conv_general_dilated(
        x.astype(compute_dtype), weight.astype(compute_dtype),
        window_strides=(stride, stride),
        padding=((p, p), (p, p)),
        dimension_numbers=("NCHW", "OIHW", "NCHW"),
        preferred_element_type=jnp.float32)
    return out.astype(x.dtype)


if __name__ == "__main__":
    key = jax.random.PRNGKey(0)
    kx, kw = jax.random.split(key)

    N, C_in, H, W = 2, 4, 16, 16
    C_out, kernel_size = 8, 3

    x = jax.random.normal(kx, (N, C_in, H, W), dtype=jnp.float32)
    # Deterministic stand-in for nn.Conv2d's weight (bias=False in the module).
    w = jax.random.normal(kw, (C_out, C_in, kernel_size, kernel_size),
                          dtype=jnp.float32)
    w = w * (1.0 / (C_in * kernel_size * kernel_size) ** 0.5)

    # stride=1 -> fused no-im2col kernel (primary path).
    out1 = jax.block_until_ready(heconv(x, w, stride=1))
    ref1 = jax.block_until_ready(heconv_reference(x, w, stride=1))
    assert out1.shape == ref1.shape and out1.dtype == x.dtype
    assert jnp.allclose(out1, ref1, atol=2e-3, rtol=2e-3), "stride-1 mismatch"

    # stride=2 -> im2col + tiled MXU matmul fallback.
    out2 = jax.block_until_ready(heconv(x, w, stride=2))
    ref2 = jax.block_until_ready(heconv_reference(x, w, stride=2))
    assert out2.shape == ref2.shape and out2.dtype == x.dtype
    assert jnp.allclose(out2, ref2, atol=2e-3, rtol=2e-3), "stride-2 mismatch"

    print("KERNEL_OK")
</pallas_src>

<mosaic_0001>
module attributes {stable_mosaic.version = 11 : i64} {
  func.func @kernel(%arg0: i32, %arg1: i32, %arg2: i32, %arg3: memref<3x1x16x18x4xbf16, #tpu.memory_space<vmem>>, %arg4: memref<3x3x4x128xbf16, #tpu.memory_space<vmem>>, %arg5: memref<1x256x128xf32, #tpu.memory_space<vmem>>) attributes {dimension_semantics = [#tpu.dimension_semantics<parallel>, #tpu.dimension_semantics<parallel>, #tpu.dimension_semantics<parallel>], iteration_bounds = array<i64: 2, 1, 1>, scalar_prefetch = 0 : i64, scratch_operands = 0 : i64, tpu.core_type = #tpu.core_type<tc>, window_params = [{transform_indices = @transform_0, window_bounds = array<i64: 3, 1, 16, 18, 4>}, {transform_indices = @transform_1, window_bounds = array<i64: 3, 3, 4, 128>}, {transform_indices = @transform_2, window_bounds = array<i64: 1, 256, 128>}]} {
    %c0 = arith.constant 0 : index
    %c0_0 = arith.constant 0 : index
    %c0_1 = arith.constant 0 : index
    %c0_2 = arith.constant 0 : index
    %c0_3 = arith.constant 0 : index
    %0 = vector.load %arg3[%c0, %c0_0, %c0_1, %c0_2, %c0_3] : memref<3x1x16x18x4xbf16, #tpu.memory_space<vmem>>, vector<1x1x16x18x4xbf16>
    %1 = vector.shape_cast %0 : vector<1x1x16x18x4xbf16> to vector<16x18x4xbf16>
    %2 = vector.extract_strided_slice %1 {offsets = [0, 0, 0], sizes = [16, 16, 4], strides = [1, 1, 1]} : vector<16x18x4xbf16> to vector<16x16x4xbf16>
    %3 = vector.shape_cast %2 : vector<16x16x4xbf16> to vector<256x4xbf16>
    %c0_4 = arith.constant 0 : index
    %c0_5 = arith.constant 0 : index
    %c0_6 = arith.constant 0 : index
    %c0_7 = arith.constant 0 : index
    %4 = vector.load %arg4[%c0_4, %c0_5, %c0_6, %c0_7] : memref<3x3x4x128xbf16, #tpu.memory_space<vmem>>, vector<1x1x4x128xbf16>
    %5 = vector.shape_cast %4 : vector<1x1x4x128xbf16> to vector<4x128xbf16>
    %cst = arith.constant dense<0.000000e+00> : vector<256x128xf32>
    %6 = tpu.matmul %3, %5, %cst {dimension_numbers = #tpu.dot_dimension_numbers<[1], [0], [0], [1], [0, 0, 1, 1], [], []>} : vector<256x4xbf16>, vector<4x128xbf16>, vector<256x128xf32> -> vector<256x128xf32>
    %7 = vector.extract_strided_slice %1 {offsets = [0, 1, 0], sizes = [16, 16, 4], strides = [1, 1, 1]} : vector<16x18x4xbf16> to vector<16x16x4xbf16>
    %8 = vector.shape_cast %7 : vector<16x16x4xbf16> to vector<256x4xbf16>
    %c0_8 = arith.constant 0 : index
    %c1 = arith.constant 1 : index
    %c0_9 = arith.constant 0 : index
    %c0_10 = arith.constant 0 : index
    %9 = vector.load %arg4[%c0_8, %c1, %c0_9, %c0_10] : memref<3x3x4x128xbf16, #tpu.memory_space<vmem>>, vector<1x1x4x128xbf16>
    %10 = vector.shape_cast %9 : vector<1x1x4x128xbf16> to vector<4x128xbf16>
    %cst_11 = arith.constant dense<0.000000e+00> : vector<256x128xf32>
    %11 = tpu.matmul %8, %10, %cst_11 {dimension_numbers = #tpu.dot_dimension_numbers<[1], [0], [0], [1], [0, 0, 1, 1], [], []>} : vector<256x4xbf16>, vector<4x128xbf16>, vector<256x128xf32> -> vector<256x128xf32>
    %12 = arith.addf %6, %11 : vector<256x128xf32>
    %13 = vector.extract_strided_slice %1 {offsets = [0, 2, 0], sizes = [16, 16, 4], strides = [1, 1, 1]} : vector<16x18x4xbf16> to vector<16x16x4xbf16>
    %14 = vector.shape_cast %13 : vector<16x16x4xbf16> to vector<256x4xbf16>
    %c0_12 = arith.constant 0 : index
    %c2 = arith.constant 2 : index
    %c0_13 = arith.constant 0 : index
    %c0_14 = arith.constant 0 : index
    %15 = vector.load %arg4[%c0_12, %c2, %c0_13, %c0_14] : memref<3x3x4x128xbf16, #tpu.memory_space<vmem>>, vector<1x1x4x128xbf16>
    %16 = vector.shape_cast %15 : vector<1x1x4x128xbf16> to vector<4x128xbf16>
    %cst_15 = arith.constant dense<0.000000e+00> : vector<256x128xf32>
    %17 = tpu.matmul %14, %16, %cst_15 {dimension_numbers = #tpu.dot_dimension_numbers<[1], [0], [0], [1], [0, 0, 1, 1], [], []>} : vector<256x4xbf16>, vector<4x128xbf16>, vector<256x128xf32> -> vector<256x128xf32>
    %18 = arith.addf %12, %17 : vector<256x128xf32>
    %c1_16 = arith.constant 1 : index
    %c0_17 = arith.constant 0 : index
    %c0_18 = arith.constant 0 : index
    %c0_19 = arith.constant 0 : index
    %c0_20 = arith.constant 0 : index
    %19 = vector.load %arg3[%c1_16, %c0_17, %c0_18, %c0_19, %c0_20] : memref<3x1x16x18x4xbf16, #tpu.memory_space<vmem>>, vector<1x1x16x18x4xbf16>
    %20 = vector.shape_cast %19 : vector<1x1x16x18x4xbf16> to vector<16x18x4xbf16>
    %21 = vector.extract_strided_slice %20 {offsets = [0, 0, 0], sizes = [16, 16, 4], strides = [1, 1, 1]} : vector<16x18x4xbf16> to vector<16x16x4xbf16>
    %22 = vector.shape_cast %21 : vector<16x16x4xbf16> to vector<256x4xbf16>
    %c1_21 = arith.constant 1 : index
    %c0_22 = arith.constant 0 : index
    %c0_23 = arith.constant 0 : index
    %c0_24 = arith.constant 0 : index
    %23 = vector.load %arg4[%c1_21, %c0_22, %c0_23, %c0_24] : memref<3x3x4x128xbf16, #tpu.memory_space<vmem>>, vector<1x1x4x128xbf16>
    %24 = vector.shape_cast %23 : vector<1x1x4x128xbf16> to vector<4x128xbf16>
    %cst_25 = arith.constant dense<0.000000e+00> : vector<256x128xf32>
    %25 = tpu.matmul %22, %24, %cst_25 {dimension_numbers = #tpu.dot_dimension_numbers<[1], [0], [0], [1], [0, 0, 1, 1], [], []>} : vector<256x4xbf16>, vector<4x128xbf16>, vector<256x128xf32> -> vector<256x128xf32>
    %26 = arith.addf %18, %25 : vector<256x128xf32>
    %27 = vector.extract_strided_slice %20 {offsets = [0, 1, 0], sizes = [16, 16, 4], strides = [1, 1, 1]} : vector<16x18x4xbf16> to vector<16x16x4xbf16>
    %28 = vector.shape_cast %27 : vector<16x16x4xbf16> to vector<256x4xbf16>
    %c1_26 = arith.constant 1 : index
    %c1_27 = arith.constant 1 : index
    %c0_28 = arith.constant 0 : index
    %c0_29 = arith.constant 0 : index
    %29 = vector.load %arg4[%c1_26, %c1_27, %c0_28, %c0_29] : memref<3x3x4x128xbf16, #tpu.memory_space<vmem>>, vector<1x1x4x128xbf16>
    %30 = vector.shape_cast %29 : vector<1x1x4x128xbf16> to vector<4x128xbf16>
    %cst_30 = arith.constant dense<0.000000e+00> : vector<256x128xf32>
    %31 = tpu.matmul %28, %30, %cst_30 {dimension_numbers = #tpu.dot_dimension_numbers<[1], [0], [0], [1], [0, 0, 1, 1], [], []>} : vector<256x4xbf16>, vector<4x128xbf16>, vector<256x128xf32> -> vector<256x128xf32>
    %32 = arith.addf %26, %31 : vector<256x128xf32>
    %33 = vector.extract_strided_slice %20 {offsets = [0, 2, 0], sizes = [16, 16, 4], strides = [1, 1, 1]} : vector<16x18x4xbf16> to vector<16x16x4xbf16>
    %34 = vector.shape_cast %33 : vector<16x16x4xbf16> to vector<256x4xbf16>
    %c1_31 = arith.constant 1 : index
    %c2_32 = arith.constant 2 : index
    %c0_33 = arith.constant 0 : index
    %c0_34 = arith.constant 0 : index
    %35 = vector.load %arg4[%c1_31, %c2_32, %c0_33, %c0_34] : memref<3x3x4x128xbf16, #tpu.memory_space<vmem>>, vector<1x1x4x128xbf16>
    %36 = vector.shape_cast %35 : vector<1x1x4x128xbf16> to vector<4x128xbf16>
    %cst_35 = arith.constant dense<0.000000e+00> : vector<256x128xf32>
    %37 = tpu.matmul %34, %36, %cst_35 {dimension_numbers = #tpu.dot_dimension_numbers<[1], [0], [0], [1], [0, 0, 1, 1], [], []>} : vector<256x4xbf16>, vector<4x128xbf16>, vector<256x128xf32> -> vector<256x128xf32>
    %38 = arith.addf %32, %37 : vector<256x128xf32>
    %c2_36 = arith.constant 2 : index
    %c0_37 = arith.constant 0 : index
    %c0_38 = arith.constant 0 : index
    %c0_39 = arith.constant 0 : index
    %c0_40 = arith.constant 0 : index
    %39 = vector.load %arg3[%c2_36, %c0_37, %c0_38, %c0_39, %c0_40] : memref<3x1x16x18x4xbf16, #tpu.memory_space<vmem>>, vector<1x1x16x18x4xbf16>
    %40 = vector.shape_cast %39 : vector<1x1x16x18x4xbf16> to vector<16x18x4xbf16>
    %41 = vector.extract_strided_slice %40 {offsets = [0, 0, 0], sizes = [16, 16, 4], strides = [1, 1, 1]} : vector<16x18x4xbf16> to vector<16x16x4xbf16>
    %42 = vector.shape_cast %41 : vector<16x16x4xbf16> to vector<256x4xbf16>
    %c2_41 = arith.constant 2 : index
    %c0_42 = arith.constant 0 : index
    %c0_43 = arith.constant 0 : index
    %c0_44 = arith.constant 0 : index
    %43 = vector.load %arg4[%c2_41, %c0_42, %c0_43, %c0_44] : memref<3x3x4x128xbf16, #tpu.memory_space<vmem>>, vector<1x1x4x128xbf16>
    %44 = vector.shape_cast %43 : vector<1x1x4x128xbf16> to vector<4x128xbf16>
    %cst_45 = arith.constant dense<0.000000e+00> : vector<256x128xf32>
    %45 = tpu.matmul %42, %44, %cst_45 {dimension_numbers = #tpu.dot_dimension_numbers<[1], [0], [0], [1], [0, 0, 1, 1], [], []>} : vector<256x4xbf16>, vector<4x128xbf16>, vector<256x128xf32> -> vector<256x128xf32>
    %46 = arith.addf %38, %45 : vector<256x128xf32>
    %47 = vector.extract_strided_slice %40 {offsets = [0, 1, 0], sizes = [16, 16, 4], strides = [1, 1, 1]} : vector<16x18x4xbf16> to vector<16x16x4xbf16>
    %48 = vector.shape_cast %47 : vector<16x16x4xbf16> to vector<256x4xbf16>
    %c2_46 = arith.constant 2 : index
    %c1_47 = arith.constant 1 : index
    %c0_48 = arith.constant 0 : index
    %c0_49 = arith.constant 0 : index
    %49 = vector.load %arg4[%c2_46, %c1_47, %c0_48, %c0_49] : memref<3x3x4x128xbf16, #tpu.memory_space<vmem>>, vector<1x1x4x128xbf16>
    %50 = vector.shape_cast %49 : vector<1x1x4x128xbf16> to vector<4x128xbf16>
    %cst_50 = arith.constant dense<0.000000e+00> : vector<256x128xf32>
    %51 = tpu.matmul %48, %50, %cst_50 {dimension_numbers = #tpu.dot_dimension_numbers<[1], [0], [0], [1], [0, 0, 1, 1], [], []>} : vector<256x4xbf16>, vector<4x128xbf16>, vector<256x128xf32> -> vector<256x128xf32>
    %52 = arith.addf %46, %51 : vector<256x128xf32>
    %53 = vector.extract_strided_slice %40 {offsets = [0, 2, 0], sizes = [16, 16, 4], strides = [1, 1, 1]} : vector<16x18x4xbf16> to vector<16x16x4xbf16>
    %54 = vector.shape_cast %53 : vector<16x16x4xbf16> to vector<256x4xbf16>
    %c2_51 = arith.constant 2 : index
    %c2_52 = arith.constant 2 : index
    %c0_53 = arith.constant 0 : index
    %c0_54 = arith.constant 0 : index
    %55 = vector.load %arg4[%c2_51, %c2_52, %c0_53, %c0_54] : memref<3x3x4x128xbf16, #tpu.memory_space<vmem>>, vector<1x1x4x128xbf16>
    %56 = vector.shape_cast %55 : vector<1x1x4x128xbf16> to vector<4x128xbf16>
    %cst_55 = arith.constant dense<0.000000e+00> : vector<256x128xf32>
    %57 = tpu.matmul %54, %56, %cst_55 {dimension_numbers = #tpu.dot_dimension_numbers<[1], [0], [0], [1], [0, 0, 1, 1], [], []>} : vector<256x4xbf16>, vector<4x128xbf16>, vector<256x128xf32> -> vector<256x128xf32>
    %58 = arith.addf %52, %57 : vector<256x128xf32>
    %c0_56 = arith.constant 0 : index
    %c0_57 = arith.constant 0 : index
    %c0_58 = arith.constant 0 : index
    %59 = vector.load %arg5[%c0_56, %c0_57, %c0_58] : memref<1x256x128xf32, #tpu.memory_space<vmem>>, vector<1x256x128xf32>
    %60 = vector.shape_cast %59 : vector<1x256x128xf32> to vector<256x128xf32>
    %61 = vector.shape_cast %58 : vector<256x128xf32> to vector<1x256x128xf32>
    tpu.vector_store %arg5[%c0_56, %c0_57, %c0_58], %61 {strides = array<i32>} : memref<1x256x128xf32, #tpu.memory_space<vmem>>, vector<1x256x128xf32>,
    return
  }
  func.func @transform_0(%arg0: i32, %arg1: i32, %arg2: i32) -> (i32, i32, i32, i32, i32) {
    %c0_i32 = arith.constant 0 : i32
    %c0_i32_0 = arith.constant 0 : i32
    %c0_i32_1 = arith.constant 0 : i32
    %c0_i32_2 = arith.constant 0 : i32
    return %c0_i32, %arg0, %arg1, %c0_i32_0, %c0_i32_1 : i32, i32, i32, i32, i32
  }
  func.func @transform_1(%arg0: i32, %arg1: i32, %arg2: i32) -> (i32, i32, i32, i32) {
    %c0_i32 = arith.constant 0 : i32
    %c0_i32_0 = arith.constant 0 : i32
    %c0_i32_1 = arith.constant 0 : i32
    %c0_i32_2 = arith.constant 0 : i32
    return %c0_i32, %c0_i32_0, %c0_i32_1, %arg2 : i32, i32, i32, i32
  }
  func.func @transform_2(%arg0: i32, %arg1: i32, %arg2: i32) -> (i32, i32, i32) {
    %c0_i32 = arith.constant 0 : i32
    return %arg0, %arg1, %arg2 : i32, i32, i32
  }
}

</mosaic_0001>

<bundles_post_ra>
// kernel: tpu_custom_call.1
= control target key start
LH: loop header
LB: loop body
LE: loop exit
PB: predicated region body
PF: predicated region fallthrough
CT: control target
= control target key end

     0   :  { %7 = vsyncpa [#allocation4], 0  ;;  %s9474_s0 = inlined_call_operand.vmem [shape: bf16[3,2,16,18,4], index: 0, kind: input, shape index: {}]   ;;  %s9475_s1 = inlined_call_operand.vmem [shape: bf16[3,3,4,128], index: 1, kind: input, shape index: {}]   ;;  %s9476_s2 = inlined_call_operand.hbm [shape: f32[2,256,128], index: 2, kind: output, shape index: {}]  }
   0x1   :  { %9 = vsyncpa [#allocation4 + $0x1], 0  ;;  %s6452_s9 = smov 0   ;;  %s6454_s10 = smov 0  }
   0x2   :  { %s6456_s11 = smov 0   ;;  %s6458_s12 = smov 0  }
   0x3   :  { %s6460_s13 = smov 0   ;;  %s6462_s14 = smov 0  }
   0x4 LB: > { %s5323_s15 = sadd.s32 4294967295, %s6432_s14   ;;  %s5324_s16 = sadd.s32 4294967294, %s6432_s14   ;;  %s6432_s14 = sphi %s6462_s14, %s15_s14   ;;  %s6428_s13 = sphi %s6460_s13, %s9957_s13   ;;  %s6424_s12 = sphi %s6458_s12, %s9956_s12   ;;  %s6420_s11 = sphi %s6456_s11, %s9955_s11   ;;  %s6416_s10 = sphi %s6454_s10, %s9954_s10   ;;  %s6412_s9 = sphi %s6452_s9, %s9953_s9  }
   0x5   : > { %s34_s17 = sadd.s32 1, %s6428_s13  ;;  %s43_s18 = sadd.s32 1, %s6420_s11 }
   0x6   : > { %p36_p0 = scmp.ge.s32.totalorder %s34_s17, 2  ;;  %p50_p1 = scmp.ne.s32.totalorder %s6420_s11, %s6416_s10 }
   0x7   : > { %p51_p2 = scmp.eq.s32.totalorder %s6432_s14, 0  ;;  %p110_p3 = scmp.eq.s32.totalorder %s5323_s15, 1 }
   0x8   : > { %s9959_s17 = smov (%p36_p0, %s34_s17), 0  ;;  %p115_p6 = scmp.ne.s32.totalorder %s6416_s10, %s6412_s9 }
   0x9   : > { %p52_p4 = por %p51_p2, %p50_p1  ;;  %p6491_p5 = por %p110_p3, %p50_p1 }
   0xa   : > { %s38_s20 = ssub.s32 %s6428_s13, %s9959_s17  ;;  %p116_p8 = scmp.eq.s32.totalorder %s5324_s16, 1 }
   0xb   : > { %p41_p7 = scmp.eq.s32.totalorder %s38_s20, 0  ;;  %p5327_p10 = scmp.ge.s32.totalorder %s6432_s14, 2 }
   0xc   : > { %p6502_p9 = por %p116_p8, %p115_p6 }
   0xd   : > { %s6500_s21 = scalar_select %p41_p7, %s6420_s11, %s43_s18  }
   0xe   : > { %139 = sbr.rel (%p5327_p10) target bundleno = 60 (0x3c), region = 20 }
  0x13   : > { %142 = sbr.rel (!%p52_p4) target bundleno = 60 (0x3c), region = 24  ;;  %s144_s23 = sand.u32 (%p52_p4), 1, %s6420_s11  }
  0x14   : > { %s6249_s24 = smul.u32 (%p52_p4), 192, %s6428_s13 }
  0x15   : > { %s6248_s25 = smul.u32 (%p52_p4), 576, %s144_s23 }
  0x16   : > { %s6514_s28 = scalar_lea.vmem (%p52_p4), %s9474_s0, %s6249_s24 }
  0x17   : > { %v169_v0 = vld [vmem:[%s6514_s28] sm:$0xff] (%p52_p4)   ;;  %v173_v1 = vld [vmem:[%s6514_s28 + $0x8] sm:$0xff] (%p52_p4)   ;;  %v177_v2 = vld [vmem:[%s6514_s28 + $0x10] sm:$0xff] (%p52_p4)   ;;  %s6519_s29 = scalar_lea.vmem (%p52_p4), [#allocation2], %s6248_s25 }
  0x18   : > { %170 = vst [vmem:[%s6519_s29] sm:$0xff] %v169_v0   ;;  %174 = vst [vmem:[%s6519_s29 + $0x8] sm:$0xff] %v173_v1   ;;  %v181_v3 = vld [vmem:[%s6514_s28 + $0x18] sm:$0xff]   ;;  %v185_v4 = vld [vmem:[%s6514_s28 + $0x20] sm:$0xff]  }
  0x19   : > { %178 = vst [vmem:[%s6519_s29 + $0x10] sm:$0xff] %v177_v2   ;;  %v189_v5 = vld [vmem:[%s6514_s28 + $0x28] sm:$0xff]   ;;  %182 = vst [vmem:[%s6519_s29 + $0x18] sm:$0xff] %v181_v3   ;;  %v193_v6 = vld [vmem:[%s6514_s28 + $0x30] sm:$0xff]  }
  0x1a   : > { %186 = vst [vmem:[%s6519_s29 + $0x20] sm:$0xff] %v185_v4   ;;  %190 = vst [vmem:[%s6519_s29 + $0x28] sm:$0xff] %v189_v5   ;;  %v197_v7 = vld [vmem:[%s6514_s28 + $0x38] sm:$0xff]   ;;  %v201_v8 = vld [vmem:[%s6514_s28 + $0x40] sm:$0xff]  }
  0x1b   : > { %194 = vst [vmem:[%s6519_s29 + $0x30] sm:$0xff] %v193_v6   ;;  %198 = vst [vmem:[%s6519_s29 + $0x38] sm:$0xff] %v197_v7   ;;  %v205_v9 = vld [vmem:[%s6514_s28 + $0x48] sm:$0xff]   ;;  %v209_v10 = vld [vmem:[%s6514_s28 + $0x50] sm:$0xff]  }
  0x1c   : > { %202 = vst [vmem:[%s6519_s29 + $0x40] sm:$0xff] %v201_v8   ;;  %v213_v11 = vld [vmem:[%s6514_s28 + $0x58] sm:$0xff]   ;;  %206 = vst [vmem:[%s6519_s29 + $0x48] sm:$0xff] %v205_v9   ;;  %v217_v12 = vld [vmem:[%s6514_s28 + $0x60] sm:$0xff]  }
  0x1d   : > { %210 = vst [vmem:[%s6519_s29 + $0x50] sm:$0xff] %v209_v10   ;;  %214 = vst [vmem:[%s6519_s29 + $0x58] sm:$0xff] %v213_v11   ;;  %v221_v13 = vld [vmem:[%s6514_s28 + $0x68] sm:$0xff]   ;;  %v225_v14 = vld [vmem:[%s6514_s28 + $0x70] sm:$0xff]  }
  0x1e   : > { %218 = vst [vmem:[%s6519_s29 + $0x60] sm:$0xff] %v217_v12   ;;  %222 = vst [vmem:[%s6519_s29 + $0x68] sm:$0xff] %v221_v13   ;;  %v229_v15 = vld [vmem:[%s6514_s28 + $0x78] sm:$0xff]   ;;  %v233_v16 = vld [vmem:[%s6514_s28 + $0x80] sm:$0xff]  }
  0x1f   : > { %226 = vst [vmem:[%s6519_s29 + $0x70] sm:$0xff] %v225_v14   ;;  %v237_v17 = vld [vmem:[%s6514_s28 + $0x88] sm:$0xff]   ;;  %230 = vst [vmem:[%s6519_s29 + $0x78] sm:$0xff] %v229_v15   ;;  %v241_v18 = vld [vmem:[%s6514_s28 + $0x90] sm:$0xff]  }
  0x20   : > { %234 = vst [vmem:[%s6519_s29 + $0x80] sm:$0xff] %v233_v16   ;;  %238 = vst [vmem:[%s6519_s29 + $0x88] sm:$0xff] %v237_v17   ;;  %v245_v19 = vld [vmem:[%s6514_s28 + $0x98] sm:$0xff]   ;;  %v249_v20 = vld [vmem:[%s6514_s28 + $0xa0] sm:$0xff]  }
  0x21   : > { %242 = vst [vmem:[%s6519_s29 + $0x90] sm:$0xff] %v241_v18   ;;  %246 = vst [vmem:[%s6519_s29 + $0x98] sm:$0xff] %v245_v19   ;;  %v253_v21 = vld [vmem:[%s6514_s28 + $0xa8] sm:$0xff]   ;;  %v257_v22 = vld [vmem:[%s6514_s28 + $0xb0] sm:$0xff]  }
  0x22   : > { %250 = vst [vmem:[%s6519_s29 + $0xa0] sm:$0xff] %v249_v20   ;;  %v261_v23 = vld [vmem:[%s6514_s28 + $0xb8] sm:$0xff]   ;;  %254 = vst [vmem:[%s6519_s29 + $0xa8] sm:$0xff] %v253_v21   ;;  %v265_v24 = vld [vmem:[%s6514_s28 + $0x180] sm:$0xff]  }
  0x23   : > { %258 = vst [vmem:[%s6519_s29 + $0xb0] sm:$0xff] %v257_v22   ;;  %262 = vst [vmem:[%s6519_s29 + $0xb8] sm:$0xff] %v261_v23   ;;  %v269_v25 = vld [vmem:[%s6514_s28 + $0x188] sm:$0xff]   ;;  %v273_v26 = vld [vmem:[%s6514_s28 + $0x190] sm:$0xff]  }
  0x24   : > { %266 = vst [vmem:[%s6519_s29 + $0xc0] sm:$0xff] %v265_v24   ;;  %270 = vst [vmem:[%s6519_s29 + $0xc8] sm:$0xff] %v269_v25   ;;  %v277_v27 = vld [vmem:[%s6514_s28 + $0x198] sm:$0xff]   ;;  %v281_v28 = vld [vmem:[%s6514_s28 + $0x1a0] sm:$0xff]  }
  0x25   : > { %274 = vst [vmem:[%s6519_s29 + $0xd0] sm:$0xff] %v273_v26   ;;  %v285_v29 = vld [vmem:[%s6514_s28 + $0x1a8] sm:$0xff]   ;;  %278 = vst [vmem:[%s6519_s29 + $0xd8] sm:$0xff] %v277_v27   ;;  %v289_v30 = vld [vmem:[%s6514_s28 + $0x1b0] sm:$0xff]  }
  0x26   : > { %282 = vst [vmem:[%s6519_s29 + $0xe0] sm:$0xff] %v281_v28   ;;  %286 = vst [vmem:[%s6519_s29 + $0xe8] sm:$0xff] %v285_v29   ;;  %v293_v31 = vld [vmem:[%s6514_s28 + $0x1b8] sm:$0xff]   ;;  %v297_v32 = vld [vmem:[%s6514_s28 + $0x1c0] sm:$0xff]  }
  0x27   : > { %290 = vst [vmem:[%s6519_s29 + $0xf0] sm:$0xff] %v289_v30   ;;  %294 = vst [vmem:[%s6519_s29 + $0xf8] sm:$0xff] %v293_v31   ;;  %v301_v33 = vld [vmem:[%s6514_s28 + $0x1c8] sm:$0xff]   ;;  %v305_v34 = vld [vmem:[%s6514_s28 + $0x1d0] sm:$0xff]  }
  0x28   : > { %298 = vst [vmem:[%s6519_s29 + $0x100] sm:$0xff] %v297_v32   ;;  %v309_v35 = vld [vmem:[%s6514_s28 + $0x1d8] sm:$0xff]   ;;  %302 = vst [vmem:[%s6519_s29 + $0x108] sm:$0xff] %v301_v33   ;;  %v313_v36 = vld [vmem:[%s6514_s28 + $0x1e0] sm:$0xff]  }
  0x29   : > { %306 = vst [vmem:[%s6519_s29 + $0x110] sm:$0xff] %v305_v34   ;;  %310 = vst [vmem:[%s6519_s29 + $0x118] sm:$0xff] %v309_v35   ;;  %v317_v37 = vld [vmem:[%s6514_s28 + $0x1e8] sm:$0xff]   ;;  %v321_v38 = vld [vmem:[%s6514_s28 + $0x1f0] sm:$0xff]  }
  0x2a   : > { %314 = vst [vmem:[%s6519_s29 + $0x120] sm:$0xff] %v313_v36   ;;  %318 = vst [vmem:[%s6519_s29 + $0x128] sm:$0xff] %v317_v37   ;;  %v325_v39 = vld [vmem:[%s6514_s28 + $0x1f8] sm:$0xff]   ;;  %v329_v40 = vld [vmem:[%s6514_s28 + $0x200] sm:$0xff]  }
  0x2b   : > { %322 = vst [vmem:[%s6519_s29 + $0x130] sm:$0xff] %v321_v38   ;;  %v333_v41 = vld [vmem:[%s6514_s28 + $0x208] sm:$0xff]   ;;  %326 = vst [vmem:[%s6519_s29 + $0x138] sm:$0xff] %v325_v39   ;;  %v337_v42 = vld [vmem:[%s6514_s28 + $0x210] sm:$0xff]  }
  0x2c   : > { %330 = vst [vmem:[%s6519_s29 + $0x140] sm:$0xff] %v329_v40   ;;  %334 = vst [vmem:[%s6519_s29 + $0x148] sm:$0xff] %v333_v41   ;;  %v341_v43 = vld [vmem:[%s6514_s28 + $0x218] sm:$0xff]   ;;  %v345_v44 = vld [vmem:[%s6514_s28 + $0x220] sm:$0xff]  }
  0x2d   : > { %338 = vst [vmem:[%s6519_s29 + $0x150] sm:$0xff] %v337_v42   ;;  %342 = vst [vmem:[%s6519_s29 + $0x158] sm:$0xff] %v341_v43   ;;  %v349_v45 = vld [vmem:[%s6514_s28 + $0x228] sm:$0xff]   ;;  %v353_v46 = vld [vmem:[%s6514_s28 + $0x230] sm:$0xff]  }
  0x2e   : > { %346 = vst [vmem:[%s6519_s29 + $0x160] sm:$0xff] %v345_v44   ;;  %v357_v47 = vld [vmem:[%s6514_s28 + $0x238] sm:$0xff]   ;;  %350 = vst [vmem:[%s6519_s29 + $0x168] sm:$0xff] %v349_v45   ;;  %v361_v48 = vld [vmem:[%s6514_s28 + $0x300] sm:$0xff]  }
  0x2f   : > { %354 = vst [vmem:[%s6519_s29 + $0x170] sm:$0xff] %v353_v46   ;;  %358 = vst [vmem:[%s6519_s29 + $0x178] sm:$0xff] %v357_v47   ;;  %v365_v49 = vld [vmem:[%s6514_s28 + $0x308] sm:$0xff]   ;;  %v369_v50 = vld [vmem:[%s6514_s28 + $0x310] sm:$0xff]  }
  0x30   : > { %362 = vst [vmem:[%s6519_s29 + $0x180] sm:$0xff] %v361_v48   ;;  %366 = vst [vmem:[%s6519_s29 + $0x188] sm:$0xff] %v365_v49   ;;  %v373_v51 = vld [vmem:[%s6514_s28 + $0x318] sm:$0xff]   ;;  %v377_v52 = vld [vmem:[%s6514_s28 + $0x320] sm:$0xff]  }
  0x31   : > { %370 = vst [vmem:[%s6519_s29 + $0x190] sm:$0xff] %v369_v50   ;;  %v381_v53 = vld [vmem:[%s6514_s28 + $0x328] sm:$0xff]   ;;  %374 = vst [vmem:[%s6519_s29 + $0x198] sm:$0xff] %v373_v51   ;;  %v385_v54 = vld [vmem:[%s6514_s28 + $0x330] sm:$0xff]  }
  0x32   : > { %378 = vst [vmem:[%s6519_s29 + $0x1a0] sm:$0xff] %v377_v52   ;;  %382 = vst [vmem:[%s6519_s29 + $0x1a8] sm:$0xff] %v381_v53   ;;  %v389_v55 = vld [vmem:[%s6514_s28 + $0x338] sm:$0xff]   ;;  %v393_v56 = vld [vmem:[%s6514_s28 + $0x340] sm:$0xff]  }
  0x33   : > { %386 = vst [vmem:[%s6519_s29 + $0x1b0] sm:$0xff] %v385_v54   ;;  %390 = vst [vmem:[%s6519_s29 + $0x1b8] sm:$0xff] %v389_v55   ;;  %v397_v57 = vld [vmem:[%s6514_s28 + $0x348] sm:$0xff]   ;;  %v401_v58 = vld [vmem:[%s6514_s28 + $0x350] sm:$0xff]  }
  0x34   : > { %394 = vst [vmem:[%s6519_s29 + $0x1c0] sm:$0xff] %v393_v56   ;;  %v405_v59 = vld [vmem:[%s6514_s28 + $0x358] sm:$0xff]   ;;  %398 = vst [vmem:[%s6519_s29 + $0x1c8] sm:$0xff] %v397_v57   ;;  %v409_v60 = vld [vmem:[%s6514_s28 + $0x360] sm:$0xff]  }
  0x35   : > { %402 = vst [vmem:[%s6519_s29 + $0x1d0] sm:$0xff] %v401_v58   ;;  %406 = vst [vmem:[%s6519_s29 + $0x1d8] sm:$0xff] %v405_v59   ;;  %v413_v61 = vld [vmem:[%s6514_s28 + $0x368] sm:$0xff]   ;;  %v417_v62 = vld [vmem:[%s6514_s28 + $0x370] sm:$0xff]  }
  0x36   : > { %410 = vst [vmem:[%s6519_s29 + $0x1e0] sm:$0xff] %v409_v60   ;;  %414 = vst [vmem:[%s6519_s29 + $0x1e8] sm:$0xff] %v413_v61   ;;  %v421_v63 = vld [vmem:[%s6514_s28 + $0x378] sm:$0xff]   ;;  %v425_v0 = vld [vmem:[%s6514_s28 + $0x380] sm:$0xff]  }
  0x37   : > { %418 = vst [vmem:[%s6519_s29 + $0x1f0] sm:$0xff] %v417_v62   ;;  %v429_v1 = vld [vmem:[%s6514_s28 + $0x388] sm:$0xff]   ;;  %422 = vst [vmem:[%s6519_s29 + $0x1f8] sm:$0xff] %v421_v63   ;;  %v433_v2 = vld [vmem:[%s6514_s28 + $0x390] sm:$0xff]  }
  0x38   : > { %426 = vst [vmem:[%s6519_s29 + $0x200] sm:$0xff] %v425_v0   ;;  %430 = vst [vmem:[%s6519_s29 + $0x208] sm:$0xff] %v429_v1   ;;  %v437_v3 = vld [vmem:[%s6514_s28 + $0x398] sm:$0xff]   ;;  %v441_v4 = vld [vmem:[%s6514_s28 + $0x3a0] sm:$0xff]  }
  0x39   : > { %434 = vst [vmem:[%s6519_s29 + $0x210] sm:$0xff] %v433_v2   ;;  %438 = vst [vmem:[%s6519_s29 + $0x218] sm:$0xff] %v437_v3   ;;  %v445_v5 = vld [vmem:[%s6514_s28 + $0x3a8] sm:$0xff]   ;;  %v449_v6 = vld [vmem:[%s6514_s28 + $0x3b0] sm:$0xff]  }
  0x3a   : > { %442 = vst [vmem:[%s6519_s29 + $0x220] sm:$0xff] %v441_v4   ;;  %v453_v7 = vld [vmem:[%s6514_s28 + $0x3b8] sm:$0xff]   ;;  %446 = vst [vmem:[%s6519_s29 + $0x228] sm:$0xff] %v445_v5  }
  0x3b   : > { %450 = vst [vmem:[%s6519_s29 + $0x230] sm:$0xff] %v449_v6   ;;  %454 = vst [vmem:[%s6519_s29 + $0x238] sm:$0xff] %v453_v7  }
  0x3c PF: > { %p5329_p11 = scmp.ge.s32.totalorder %s6432_s14, 1  ;;  %p767_p12 = scmp.lt.s32.totalorder %s6432_s14, 3 }
  0x3e   : > { %p768_p13 = pnand %p5329_p11, %p767_p12 }
  0x40   : > { %771 = sbr.rel (%p768_p13) target bundleno = 629 (0x275), region = 65 }
  0x45   : > { %v5331_v8 = vld [vmem:[%s9475_s1 + $0x2] sm:$0x3]  ;;  %vm1341_vm0 = vcmask 1041408   ;;  %s6668_s4 = sand.u32 1, %s6416_s10   ;;  %v854_v10 = vld [vmem:[%s9475_s1] sm:$0x3] }
  0x46   : > { %6239 = vmatprep.subr.msk.bf16.mxu1 %vm1341_vm0, %v5331_v8  ;;  %6238 = vmatprep.subr.msk.bf16.mxu0 %vm1341_vm0, %v5331_v8  ;;  %v1343_v9 = vsel %vm1341_vm0, %v5331_v8, 0  ;;  %s6250_s5 = smul.u32 576, %s6668_s4  ;;  %v5412_v11 = vld [vmem:[%s9475_s1 + $0x4] sm:$0x3]  ;;  %vm855_vm1 = vsmask.f32 3328 }
  0x47   : > { %6237 = vmatpush3.bf16.msra.mxu1 %v1343_v9  ;;  %5931 = vmatpush3.bf16.msra.mxu0 %v1343_v9  ;;  %vm856_vm2 = vsmask.f32 7440  ;;  %v6682_v12 = vsel %vm1341_vm0, %v854_v10, 0  ;;  %vm1292_vm3 = vcmask 31744   ;;  %v6711_v24 = vsel %vm1341_vm0, %v5412_v11, 0  ;;  %s5330_s6 = sshll.u32 %s6668_s4, 8 }
  0x48   : > { %6240 = vmatprep.subr.msk.bf16.mxu1 %vm1341_vm0, %v854_v10  ;;  %6241 = vmatprep.subr.msk.bf16.mxu0 %vm1341_vm0, %v5412_v11  ;;  %s6685_s16 = scalar_lea.vmem [#allocation2], %s6250_s5  ;;  %vm6726_vm4 = vmor %vm855_vm1, %vm856_vm2  ;;  %v9552_v39 = vmov 0  ;;  %vm1814_vm5 = vcmask 1042432   ;;  %vm1815_vm6 = vcmask 1046532   ;;  %s9305_s7 = scalar_lea.vmem [#allocation3], %s5330_s6 }
  0x49   : > { %v6688_v13 = vld [vmem:[%s6685_s16] sm:$0xf]  ;;  %v6691_v14 = vld [vmem:[%s6685_s16 + $0x4] sm:$0xf]  ;;  %v6694_v15 = vld [vmem:[%s6685_s16 + $0x8] sm:$0x1] }
  0x4a   : > { %v859_v16 = vshrl.u32 %v6688_v13, 16  ;;  %v862_v17 = vshll.u32 %v6688_v13, 16  ;;  %v868_v18 = vshll.u32 %v6691_v14, 16  ;;  %v872_v19 = vshrl.u32 %v6691_v14, 16  ;;  %v6701_v20 = vld [vmem:[%s6685_s16 + $0x60] sm:$0xf]  ;;  %vm7010_vm7 = vmor %vm1814_vm5, %vm1815_vm6 }
  0x4b   : > { %v878_v21 = vshll.u32 %v6694_v15, 16  ;;  %v6705_v22 = vld [vmem:[%s6685_s16 + $0x64] sm:$0xf]  ;;  %v6708_v23 = vld [vmem:[%s6685_s16 + $0x68] sm:$0x1]  ;;  %v1051_v30 = vshrl.u32 %v6701_v20, 16 }
  0x4c   : > { %v861_v25 = vrot.slane %v859_v16, 4  ;;  %v864_v26 = vrot.slane %v862_v17, 5  ;;  %v870_v27 = vrot.slane %v868_v18, 5  ;;  %v874_v28 = vrot.slane %v872_v19, 4  ;;  %v6719_v37 = vld [vmem:[%s6685_s16 + $0xc] sm:$0xf] }
  0x4d   : > { %v880_v29 = vrot.slane %v878_v21, 5  ;;  %v1054_v31 = vshll.u32 %v6701_v20, 16  ;;  %v1060_v32 = vshll.u32 %v6705_v22, 16  ;;  %v1064_v35 = vshrl.u32 %v6705_v22, 16  ;;  %v6722_v38 = vld [vmem:[%s6685_s16 + $0x10] sm:$0xf] }
  0x4e   : > { %v865_v33 = vor.u32 %v864_v26, %v861_v25  ;;  %v875_v34 = vor.u32 %v874_v28, %v870_v27  ;;  %v1070_v36 = vshll.u32 %v6708_v23, 16  ;;  %v9553_v39 = vsel %vm6726_vm4, 4294967295, %v9552_v39  ;;  %v6732_v49 = vld [vmem:[%s6685_s16 + $0x14] sm:$0x1]  ;;  %v6743_v61 = vld [vmem:[%s6685_s16 + $0x6c] sm:$0xf] }
  0x4f   : > { %9554 = vst [vmem:[#allocation6_spill] sm:$0xff] %v9553_v39  ;;  %v1053_v41 = vrot.slane %v1051_v30, 4  ;;  %v1056_v42 = vrot.slane %v1054_v31, 5  ;;  %v1062_v43 = vrot.slane %v1060_v32, 5  ;;  %v1066_v46 = vrot.slane %v1064_v35, 4  ;;  %s5776_s8 = sshll.u32 %s6424_s12, 12 }
  0x50   : > { %v866_v44 = vrot.slane %v865_v33, 4  ;;  %v876_v45 = vrot.slane %v875_v34, 4  ;;  %v1072_v47 = vrot.slane %v1070_v36, 5  ;;  %v883_v50 = vshrl.u32 %v6719_v37, 16  ;;  %v6747_v2 = vld [vmem:[%s6685_s16 + $0x70] sm:$0xf]  ;;  %s9422_s20 = scalar_lea.hbm %s9476_s2, %s5776_s8 }
  0x51   : > { %v1057_v48 = vor.u32 %v1056_v42, %v1053_v41  ;;  %v886_v51 = vshll.u32 %v6719_v37, 16  ;;  %v892_v52 = vshll.u32 %v6722_v38, 16  ;;  %v1067_v55 = vor.u32 %v1066_v46, %v1062_v43  ;;  %v6755_v7 = vld [vmem:[%s6685_s16 + $0x74] sm:$0x1]  ;;  %v6761_v16 = vld [vmem:[%s6685_s16 + $0x18] sm:$0xf] }
  0x52   : > { %v871_v53 = vsel %vm6726_vm4, %v866_v44, %v870_v27  ;;  %v881_v54 = vsel %vm6726_vm4, %v876_v45, %v880_v29  ;;  %v896_v56 = vshrl.u32 %v6722_v38, 16  ;;  %v885_v59 = vrot.slane %v883_v50, 4  ;;  %v6768_v29 = vld [vmem:[%s6685_s16 + $0x1c] sm:$0xf]  ;;  %v6774_v33 = vld [vmem:[%s6685_s16 + $0x20] sm:$0x1] }
  0x53   : > { %v5332_v57 = vcombine.low %v871_v53, %v881_v54  ;;  %v1058_v58 = vrot.slane %v1057_v48, 4  ;;  %v888_v60 = vrot.slane %v886_v51, 5  ;;  %v1068_v62 = vrot.slane %v1067_v55, 4  ;;  %v6787_v53 = vld [vmem:[%s6685_s16 + $0x7c] sm:$0xf]  ;;  %s5222_s15 = sshll.u32 %s9305_s7, 4  ;;  %s9424_s15 = int_to_ptr.vmem [resolvable:$true] %s5222_s15 }
  0x54   : > { %v894_v63 = vrot.slane %v892_v52, 5  ;;  %v898_v0 = vrot.slane %v896_v56, 4  ;;  %v902_v1 = vshll.u32 %v6732_v49, 16  ;;  %v1075_v11 = vshrl.u32 %v6743_v61, 16  ;;  %9556 = vst [vmem:[#allocation8_spill] sm:$0xff] %v6787_v53  ;;  %s5206_s12 = scalar_lea.sflag [#allocation4], %s6668_s4 }
  0x55   : > { %5932 = vmatprep.mubr.msk.bf16.mxu0 %vm1292_vm3, %v5332_v57  ;;  %v1063_v3 = vsel %vm6726_vm4, %v1058_v58, %v1062_v43  ;;  %v889_v4 = vor.u32 %v888_v60, %v885_v59  ;;  %v1073_v8 = vsel %vm6726_vm4, %v1068_v62, %v1072_v47  ;;  %v1078_v19 = vshll.u32 %v6743_v61, 16  ;;  %v6781_v43 = vld [vmem:[%s6685_s16 + $0x78] sm:$0xf]  ;;  %s6356_s23 = scalar_lea.vmem %s9424_s15, 4096  ;;  %s6434_s24 = smov [#allocation3]  }
  0x56   : > { %v899_v9 = vor.u32 %v898_v0, %v894_v63  ;;  %v904_v10 = vrot.slane %v902_v1, 5  ;;  %v5340_v17 = vcombine.low %v1063_v3, %v1073_v8  ;;  %v1084_v21 = vshll.u32 %v6747_v2, 16  ;;  %9555 = vst [vmem:[#allocation7_spill] sm:$0xff] %v6781_v43  ;;  %v6800_v8 = vld [vmem:[%s6685_s16 + $0x24] sm:$0xf]  ;;  %p6357_p0 = scmp.ne.s32.totalorder %s9424_s15, %s6356_s23  ;;  %s6360_s25 = sshll.u32 %s6434_s24, 4  ;;  %s6361_s25 = int_to_ptr.vmem [resolvable:$false] %s6360_s25 }
  0x57   : > { %v890_v18 = vrot.slane %v889_v4, 4  ;;  %v1077_v26 = vrot.slane %v1075_v11, 4  ;;  %v1088_v27 = vshrl.u32 %v6747_v2, 16  ;;  %v1094_v28 = vshll.u32 %v6755_v7, 16  ;;  %s6362_s26 = scalar_lea.vmem %s6361_s25, 8192  ;;  %p6363_p3 = scmp.lt.s32.totalorder %s9424_s15, %s6361_s25 }
  0x58   : > { %v900_v25 = vrot.slane %v899_v9, 4  ;;  %5948 = vmatprep.mubr.msk.bf16.mxu1 %vm1292_vm3, %v5340_v17  ;;  %v1080_v31 = vrot.slane %v1078_v19, 5  ;;  %v1086_v32 = vrot.slane %v1084_v21, 5  ;;  %v907_v34 = vshrl.u32 %v6761_v16, 16  ;;  %v6806_v17 = vld [vmem:[%s6685_s16 + $0x28] sm:$0xf]  ;;  %p6358_p1 = pnand %p6357_p0, %p6491_p5  ;;  %p6364_p4 = scmp.lt.s32.totalorder %s6362_s26, %s6356_s23 }
  0x59   : > { %v895_v30 = vsel %vm6726_vm4, %v890_v18, %v894_v63  ;;  %v1090_v36 = vrot.slane %v1088_v27, 4  ;;  %v1096_v41 = vrot.slane %v1094_v28, 5  ;;  %v910_v42 = vshll.u32 %v6761_v16, 16  ;;  %v6794_v63 = vld [vmem:[%s6685_s16 + $0x80] sm:$0x1] }
  0x5a   : > { %v905_v35 = vsel %vm6726_vm4, %v900_v25, %v904_v10  ;;  %v1081_v45 = vor.u32 %v1080_v31, %v1077_v26  ;;  %v909_v46 = vrot.slane %v907_v34, 4  ;;  %v916_v47 = vshll.u32 %v6768_v29, 16  ;;  %9557 = vst [vmem:[#allocation9_spill] sm:$0xff] %v6794_v63  ;;  %v6812_v26 = vld [vmem:[%s9475_s1 + $0x6] sm:$0x3]  ;;  %p6359_p2 = pneg %p6358_p1  ;;  %p6365_p6 = por %p6364_p4, %p6363_p3 }
  0x5b   : > { %v5333_v44 = vcombine.low %v895_v30, %v905_v35  ;;  %v1091_v48 = vor.u32 %v1090_v36, %v1086_v32  ;;  %v912_v50 = vrot.slane %v910_v42, 5  ;;  %v920_v51 = vshrl.u32 %v6768_v29, 16  ;;  %v6817_v31 = vld [vmem:[%s6685_s16 + $0x2c] sm:$0x1]  ;;  %v6824_v42 = vld [vmem:[%s6685_s16 + $0x84] sm:$0xf] }
  0x5c   : > { %v926_v52 = vshll.u32 %v6774_v33, 16  ;;  %v1082_v54 = vrot.slane %v1081_v45, 4  ;;  %v918_v55 = vrot.slane %v916_v47, 5  ;;  %v1099_v56 = vshrl.u32 %v6781_v43, 16  ;;  %p6366_p7 = pnand %p6365_p6, %p6359_p2 }
  0x5d   : > { %5933 = vmatmul.mubr.msk.bf16.vlgmr.msra.gmra.mxu0 %vm1292_vm3, %v5333_v44  ;;  %v1102_v57 = vshll.u32 %v6781_v43, 16  ;;  %v1092_v58 = vrot.slane %v1091_v48, 4  ;;  %v913_v59 = vor.u32 %v912_v50, %v909_v46  ;;  %v922_v60 = vrot.slane %v920_v51, 4  ;;  %v6831_v48 = vld [vmem:[%s6685_s16 + $0x88] sm:$0xf] }
  0x5e   : > { %5999 = vmatpush3.bf16.msra.mxu0 %v6711_v24  ;;  %v928_v62 = vrot.slane %v926_v52, 5  ;;  %v1087_v0 = vsel %vm6726_vm4, %v1082_v54, %v1086_v32  ;;  %v1101_v1 = vrot.slane %v1099_v56, 4  ;;  %v1108_v4 = vshll.u32 %v6787_v53, 16 }
  0x5f   : > { %v1104_v3 = vrot.slane %v1102_v57, 5  ;;  %v1097_v9 = vsel %vm6726_vm4, %v1092_v58, %v1096_v41  ;;  %v914_v10 = vrot.slane %v913_v59, 4  ;;  %v923_v24 = vor.u32 %v922_v60, %v918_v55  ;;  %v6839_v57 = vld [vmem:[%s6685_s16 + $0x8c] sm:$0x1] }
  0x60   : > { %v1112_v11 = vshrl.u32 %v6787_v53, 16  ;;  %v5341_v18 = vcombine.low %v1087_v0, %v1097_v9  ;;  %v1110_v21 = vrot.slane %v1108_v4, 5  ;;  %v1118_v25 = vshll.u32 %v6794_v63, 16 }
  0x61   : > { %v1105_v19 = vor.u32 %v1104_v3, %v1101_v1  ;;  %v919_v27 = vsel %vm6726_vm4, %v914_v10, %v918_v55  ;;  %v924_v28 = vrot.slane %v923_v24, 4  ;;  %v931_v32 = vshrl.u32 %v6800_v8, 16  ;;  %v6847_v1 = vld [vmem:[%s6685_s16 + $0x30] sm:$0xf]  ;;  %v6852_v24 = vld [vmem:[%s6685_s16 + $0x34] sm:$0xf] }
  0x62   : > { %v1114_v30 = vrot.slane %v1112_v11, 4  ;;  %5949 = vmatmul.mubr.msk.bf16.vlgmr.msra.gmra.mxu1 %vm1292_vm3, %v5341_v18  ;;  %v1120_v35 = vrot.slane %v1118_v25, 5  ;;  %v934_v36 = vshll.u32 %v6800_v8, 16  ;;  %v940_v41 = vshll.u32 %v6806_v17, 16 }
  0x63   : > { %v1106_v34 = vrot.slane %v1105_v19, 4  ;;  %5965 = vmatpush3.bf16.msra.mxu1 %v6682_v12  ;;  %v929_v44 = vsel %vm6726_vm4, %v924_v28, %v928_v62  ;;  %v933_v46 = vrot.slane %v931_v32, 4  ;;  %v944_v47 = vshrl.u32 %v6806_v17, 16 }
  0x64   : > { %v1115_v45 = vor.u32 %v1114_v30, %v1110_v21  ;;  %v5334_v50 = vcombine.low %v919_v27, %v929_v44  ;;  %v936_v52 = vrot.slane %v934_v36, 5  ;;  %v942_v54 = vrot.slane %v940_v41, 5  ;;  %6242 = vmatprep.subr.msk.bf16.mxu1 %vm1341_vm0, %v6812_v26  ;;  %v6856_v30 = vld [vmem:[%s6685_s16 + $0x38] sm:$0x1]  ;;  %v6865_v44 = vld [vmem:[%s6685_s16 + $0x90] sm:$0xf] }
  0x65   : > { %v1111_v51 = vsel %vm6726_vm4, %v1106_v34, %v1110_v21  ;;  %v946_v55 = vrot.slane %v944_v47, 4  ;;  %v950_v56 = vshll.u32 %v6817_v31, 16  ;;  %v1123_v58 = vshrl.u32 %v6824_v42, 16 }
  0x66   : > { %v1116_v12 = vrot.slane %v1115_v45, 4  ;;  %5936 = vmatprep.mubr.msk.bf16.mxu0 %vm1292_vm3, %v5334_v50  ;;  %v937_v59 = vor.u32 %v936_v52, %v933_v46  ;;  %v1126_v60 = vshll.u32 %v6824_v42, 16  ;;  %v1132_v62 = vshll.u32 %v6831_v48, 16  ;;  %v6870_v45 = vld [vmem:[%s9475_s1 + $0x8] sm:$0x3] }
  0x67   : > { %v1136_v0 = vshrl.u32 %v6831_v48, 16  ;;  %v947_v4 = vor.u32 %v946_v55, %v942_v54  ;;  %v952_v9 = vrot.slane %v950_v56, 5  ;;  %v1125_v10 = vrot.slane %v1123_v58, 4  ;;  %v6875_v52 = vld [vmem:[%s6685_s16 + $0x94] sm:$0xf]  ;;  %6243 = vmatprep.subr.msk.bf16.mxu0 %vm1341_vm0, %v6870_v45 }
  0x68   : > { %v1121_v3 = vsel %vm6726_vm4, %v1116_v12, %v1120_v35  ;;  %v938_v18 = vrot.slane %v937_v59, 4  ;;  %v1128_v19 = vrot.slane %v1126_v60, 5  ;;  %v1134_v21 = vrot.slane %v1132_v62, 5 }
  0x69   : > { %v5342_v11 = vcombine.low %v1111_v51, %v1121_v3  ;;  %v948_v25 = vrot.slane %v947_v4, 4  ;;  %v1138_v27 = vrot.slane %v1136_v0, 4  ;;  %v1142_v28 = vshll.u32 %v6839_v57, 16  ;;  %v6886_v4 = vld [vmem:[%s6685_s16 + $0x98] sm:$0x1] }
  0x6a   : > { %v955_v32 = vshrl.u32 %v6847_v1, 16  ;;  %v943_v34 = vsel %vm6726_vm4, %v938_v18, %v942_v54  ;;  %v1129_v35 = vor.u32 %v1128_v19, %v1125_v10  ;;  %v958_v36 = vshll.u32 %v6847_v1, 16  ;;  %9558 = vst [vmem:[#allocation10_spill] sm:$0xff] %v6886_v4 }
  0x6b   : > { %5952 = vmatprep.mubr.msk.bf16.mxu1 %vm1292_vm3, %v5342_v11  ;;  %v964_v41 = vshll.u32 %v6852_v24, 16  ;;  %v953_v46 = vsel %vm6726_vm4, %v948_v25, %v952_v9  ;;  %v1139_v47 = vor.u32 %v1138_v27, %v1134_v21  ;;  %v1144_v50 = vrot.slane %v1142_v28, 5  ;;  %v6891_v11 = vld [vmem:[%s6685_s16 + $0x3c] sm:$0xf]  ;;  %v6896_v28 = vld [vmem:[%s6685_s16 + $0x40] sm:$0xf] }
  0x6c   : > { %v957_v51 = vrot.slane %v955_v32, 4  ;;  %v5335_v54 = vcombine.low %v943_v34, %v953_v46  ;;  %v1130_v12 = vrot.slane %v1129_v35, 4  ;;  %v960_v55 = vrot.slane %v958_v36, 5 }
  0x6d   : > { %v966_v56 = vrot.slane %v964_v41, 5  ;;  %v1140_v58 = vrot.slane %v1139_v47, 4  ;;  %v968_v59 = vshrl.u32 %v6852_v24, 16  ;;  %v974_v60 = vshll.u32 %v6856_v30, 16 }
  0x6e   : > { %v1147_v62 = vshrl.u32 %v6865_v44, 16  ;;  %5937 = vmatmul.mubr.msk.bf16.gmra.mxu0 %vm1292_vm3, %v5335_v54  ;;  %v1135_v0 = vsel %vm6726_vm4, %v1130_v12, %v1134_v21  ;;  %v961_v3 = vor.u32 %v960_v55, %v957_v51  ;;  %v1150_v9 = vshll.u32 %v6865_v44, 16  ;;  %v6905_v54 = vld [vmem:[%s6685_s16 + $0x44] sm:$0x1] }
  0x6f   : > { %v1156_v10 = vshll.u32 %v6875_v52, 16  ;;  %v1145_v18 = vsel %vm6726_vm4, %v1140_v58, %v1144_v50  ;;  %v970_v19 = vrot.slane %v968_v59, 4  ;;  %v976_v25 = vrot.slane %v974_v60, 5  ;;  %v6910_v58 = vld [vmem:[%s6685_s16 + $0x9c] sm:$0xf] }
  0x70   : > { %v1149_v27 = vrot.slane %v1147_v62, 4  ;;  %v5343_v21 = vcombine.low %v1135_v0, %v1145_v18  ;;  %v962_v32 = vrot.slane %v961_v3, 4  ;;  %v1152_v34 = vrot.slane %v1150_v9, 5  ;;  %9559 = vst [vmem:[#allocation11_spill] sm:$0xff] %v6910_v58 }
  0x71   : > { %v1158_v35 = vrot.slane %v1156_v10, 5  ;;  %v971_v36 = vor.u32 %v970_v19, %v966_v56  ;;  %v1160_v41 = vshrl.u32 %v6875_v52, 16  ;;  %v1166_v46 = vshll.u32 %v6886_v4, 16 }
  0x72   : > { %v979_v47 = vshrl.u32 %v6891_v11, 16  ;;  %5953 = vmatmul.mubr.msk.bf16.gmra.mxu1 %vm1292_vm3, %v5343_v21  ;;  %v967_v50 = vsel %vm6726_vm4, %v962_v32, %v966_v56  ;;  %v1153_v51 = vor.u32 %v1152_v34, %v1149_v27  ;;  %v982_v12 = vshll.u32 %v6891_v11, 16  ;;  %v6917_v21 = vld [vmem:[%s6685_s16 + $0xa0] sm:$0xf] }
  0x73   : > { %v988_v55 = vshll.u32 %v6896_v28, 16  ;;  %v972_v59 = vrot.slane %v971_v36, 4  ;;  %v1162_v60 = vrot.slane %v1160_v41, 4  ;;  %v1168_v62 = vrot.slane %v1166_v46, 5  ;;  %9560 = vst [vmem:[#allocation12_spill] sm:$0xff] %v6917_v21 }
  0x74   : > { %v981_v0 = vrot.slane %v979_v47, 4  ;;  %v1154_v3 = vrot.slane %v1153_v51, 4  ;;  %v984_v9 = vrot.slane %v982_v12, 5  ;;  %v992_v56 = vshrl.u32 %v6896_v28, 16  ;;  %v6923_v47 = vld [vmem:[%s6685_s16 + $0xa4] sm:$0x1] }
  0x75   : > { %v990_v10 = vrot.slane %v988_v55, 5  ;;  %v977_v18 = vsel %vm6726_vm4, %v972_v59, %v976_v25  ;;  %v1163_v19 = vor.u32 %v1162_v60, %v1158_v35  ;;  %v998_v27 = vshll.u32 %v6905_v54, 16  ;;  %9561 = vst [vmem:[#allocation13_spill] sm:$0xff] %v6923_v47  ;;  %v6926_v51 = vld [vmem:[%s6685_s16 + $0x48] sm:$0xf] }
  0x76   : > { %v1171_v32 = vshrl.u32 %v6910_v58, 16  ;;  %v5336_v34 = vcombine.low %v967_v50, %v977_v18  ;;  %v1159_v36 = vsel %vm6726_vm4, %v1154_v3, %v1158_v35  ;;  %v985_v41 = vor.u32 %v984_v9, %v981_v0 }
  0x77   : > { %v994_v46 = vrot.slane %v992_v56, 4  ;;  %v1164_v12 = vrot.slane %v1163_v19, 4  ;;  %v1000_v25 = vrot.slane %v998_v27, 5  ;;  %v1174_v59 = vshll.u32 %v6910_v58, 16  ;;  %v6936_v56 = vld [vmem:[%s6685_s16 + $0x4c] sm:$0xf] }
  0x78   : > { %v1173_v55 = vrot.slane %v1171_v32, 4  ;;  %5940 = vmatprep.mubr.msk.bf16.mxu0 %vm1292_vm3, %v5336_v34  ;;  %v986_v60 = vrot.slane %v985_v41, 4  ;;  %v1180_v18 = vshll.u32 %v6917_v21, 16  ;;  %v1184_v35 = vshrl.u32 %v6917_v21, 16  ;;  %v6977_v58 = vld [vmem:[%s6685_s16 + $0x5c] sm:$0x1] }
  0x79   : > { %v995_v50 = vor.u32 %v994_v46, %v990_v10  ;;  %v1169_v0 = vsel %vm6726_vm4, %v1164_v12, %v1168_v62  ;;  %v1176_v3 = vrot.slane %v1174_v59, 5  ;;  %v1190_v9 = vshll.u32 %v6923_v47, 16  ;;  %v6942_v46 = vld [vmem:[%s6685_s16 + $0x50] sm:$0x1]  ;;  %v6945_v12 = vld [vmem:[%s6685_s16 + $0xa8] sm:$0xf] }
  0x7a   : > { %v1003_v19 = vshrl.u32 %v6926_v51, 16  ;;  %v5344_v27 = vcombine.low %v1159_v36, %v1169_v0  ;;  %v991_v32 = vsel %vm6726_vm4, %v986_v60, %v990_v10  ;;  %v1182_v41 = vrot.slane %v1180_v18, 5  ;;  %9562 = vst [vmem:[#allocation14_spill] sm:$0xff] %v6945_v12  ;;  %v6955_v0 = vld [vmem:[%s6685_s16 + $0xac] sm:$0xf] }
  0x7b   : > { %v996_v34 = vrot.slane %v995_v50, 4  ;;  %v1177_v6 = vor.u32 %v1176_v3, %v1173_v55  ;;  %v1186_v40 = vrot.slane %v1184_v35, 4  ;;  %v1192_v5 = vrot.slane %v1190_v9, 5  ;;  %9563 = vst [vmem:[#allocation15_spill] sm:$0xff] %v6955_v0 }
  0x7c   : > { %v1005_v62 = vrot.slane %v1003_v19, 4  ;;  %5956 = vmatprep.mubr.msk.bf16.mxu1 %vm1292_vm3, %v5344_v27  ;;  %v1006_v59 = vshll.u32 %v6926_v51, 16  ;;  %v1012_v10 = vshll.u32 %v6936_v56, 16  ;;  %v1016_v60 = vshrl.u32 %v6936_v56, 16  ;;  %v6958_v27 = vld [vmem:[%s6685_s16 + $0xb0] sm:$0x1] }
  0x7d   : > { %v1001_v36 = vsel %vm6726_vm4, %v996_v34, %v1000_v25  ;;  %v1178_v18 = vrot.slane %v1177_v6, 4  ;;  %v1187_v55 = vor.u32 %v1186_v40, %v1182_v41  ;;  %v1022_v35 = vshll.u32 %v6942_v46, 16  ;;  %9564 = vst [vmem:[#allocation16_spill] sm:$0xff] %v6958_v27 }
  0x7e   : > { %v5337_v50 = vcombine.low %v991_v32, %v1001_v36  ;;  %v1008_v3 = vrot.slane %v1006_v59, 5  ;;  %v1014_v9 = vrot.slane %v1012_v10, 5  ;;  %v1018_v19 = vrot.slane %v1016_v60, 4  ;;  %v6967_v10 = vld [vmem:[%s6685_s16 + $0x54] sm:$0xf] }
  0x7f   : > { %v1195_v25 = vshrl.u32 %v6945_v12, 16  ;;  %v1183_v32 = vsel %vm6726_vm4, %v1178_v18, %v1182_v41  ;;  %v1188_v6 = vrot.slane %v1187_v55, 4  ;;  %v1024_v40 = vrot.slane %v1022_v35, 5  ;;  %v6974_v55 = vld [vmem:[%s6685_s16 + $0x58] sm:$0xf] }
  0x80   : > { %5941 = vmatmul.mubr.msk.bf16.gmra.mxu0 %vm1292_vm3, %v5337_v50  ;;  %v1198_v34 = vshll.u32 %v6945_v12, 16  ;;  %v1009_v36 = vor.u32 %v1008_v3, %v1005_v62  ;;  %v1019_v63 = vor.u32 %v1018_v19, %v1014_v9  ;;  %v1204_v59 = vshll.u32 %v6955_v0, 16 }
  0x81   : > { %v1197_v43 = vrot.slane %v1195_v25, 4  ;;  %v1193_v60 = vsel %vm6726_vm4, %v1188_v6, %v1192_v5  ;;  %v1208_v41 = vshrl.u32 %v6955_v0, 16  ;;  %v1214_v18 = vshll.u32 %v6958_v27, 16  ;;  %v7001_v27 = vld [vmem:[%s6685_s16 + $0xbc] sm:$0x1] }
  0x82   : > { %v1200_v50 = vrot.slane %v1198_v34, 5  ;;  %v5345_v62 = vcombine.low %v1183_v32, %v1193_v60  ;;  %v1010_v35 = vrot.slane %v1009_v36, 4  ;;  %v1020_v3 = vrot.slane %v1019_v63, 4  ;;  %v6988_v36 = vld [vmem:[%s6685_s16 + $0xb4] sm:$0xf] }
  0x83   : > { %v1206_v19 = vrot.slane %v1204_v59, 5  ;;  %v1210_v12 = vrot.slane %v1208_v41, 4  ;;  %v1216_v47 = vrot.slane %v1214_v18, 5  ;;  %v1027_v5 = vshrl.u32 %v6967_v10, 16  ;;  %9565 = vst [vmem:[#allocation17_spill] sm:$0xff] %v6988_v36 }
  0x84   : > { %v1201_v25 = vor.u32 %v1200_v50, %v1197_v43  ;;  %5957 = vmatmul.mubr.msk.bf16.gmra.mxu1 %vm1292_vm3, %v5345_v62  ;;  %v1015_v6 = vsel %vm6726_vm4, %v1010_v35, %v1014_v9  ;;  %v1025_v34 = vsel %vm6726_vm4, %v1020_v3, %v1024_v40  ;;  %v1030_v32 = vshll.u32 %v6967_v10, 16  ;;  %v6991_v41 = vld [vmem:[%s6685_s16 + $0xb8] sm:$0xf] }
  0x85   : > { %v1036_v63 = vshll.u32 %v6974_v55, 16  ;;  %v5338_v43 = vcombine.low %v1015_v6, %v1025_v34  ;;  %v1211_v60 = vor.u32 %v1210_v12, %v1206_v19  ;;  %v1029_v50 = vrot.slane %v1027_v5, 4 }
  0x86   : > { %v1202_v59 = vrot.slane %v1201_v25, 4  ;;  %v1032_v18 = vrot.slane %v1030_v32, 5  ;;  %v1040_v9 = vshrl.u32 %v6974_v55, 16  ;;  %v1046_v35 = vshll.u32 %v6977_v58, 16 }
  0x87   : > { %v1038_v62 = vrot.slane %v1036_v63, 5  ;;  %5944 = vmatprep.mubr.msk.bf16.mxu0 %vm1292_vm3, %v5338_v43  ;;  %v1212_v3 = vrot.slane %v1211_v60, 4  ;;  %v1219_v6 = vshrl.u32 %v6988_v36, 16  ;;  %v1222_v25 = vshll.u32 %v6988_v36, 16 }
  0x88   : > { %v1207_v40 = vsel %vm6726_vm4, %v1202_v59, %v1206_v19  ;;  %v1033_v12 = vor.u32 %v1032_v18, %v1029_v50  ;;  %v1042_v5 = vrot.slane %v1040_v9, 4  ;;  %v1048_v34 = vrot.slane %v1046_v35, 5 }
  0x89   : > { %v1228_v32 = vshll.u32 %v6991_v41, 16  ;;  %v1217_v63 = vsel %vm6726_vm4, %v1212_v3, %v1216_v47  ;;  %v1221_v0 = vrot.slane %v1219_v6, 4  ;;  %v1224_v43 = vrot.slane %v1222_v25, 5 }
  0x8a   : > { %v1232_v21 = vshrl.u32 %v6991_v41, 16  ;;  %v5346_v19 = vcombine.low %v1207_v40, %v1217_v63  ;;  %v1034_v59 = vrot.slane %v1033_v12, 4  ;;  %v1043_v60 = vor.u32 %v1042_v5, %v1038_v62 }
  0x8b   : > { %v1230_v53 = vrot.slane %v1228_v32, 5  ;;  %v1225_v4 = vor.u32 %v1224_v43, %v1221_v0  ;;  %v1238_v50 = vshll.u32 %v7001_v27, 16  ;;  %v5396_v47 = vrot.slane %v6688_v13, 9 }
  0x8c   : > { %v1234_v36 = vrot.slane %v1232_v21, 4  ;;  %5960 = vmatprep.mubr.msk.bf16.mxu1 %vm1292_vm3, %v5346_v19  ;;  %v1039_v9 = vsel %vm6726_vm4, %v1034_v59, %v1038_v62  ;;  %v1044_v35 = vrot.slane %v1043_v60, 4  ;;  %v1819_v40 = vrot.slane %v6691_v14, 5 }
  0x8d   : > { %v5365_v21 = vcombine.low %v6719_v37, %v6722_v38  ;;  %v1226_v0 = vrot.slane %v1225_v4, 4  ;;  %v1240_v6 = vrot.slane %v1238_v50, 5  ;;  %v5397_v25 = vrot.slane %v6719_v37, 9 }
  0x8e   : > { %v1235_v3 = vor.u32 %v1234_v36, %v1230_v53  ;;  %v1049_v12 = vsel %vm6726_vm4, %v1044_v35, %v1048_v34  ;;  %v1820_v5 = vsel %vm7010_vm7, %v5396_v47, %v1819_v40  ;;  %v1821_v32 = vrot.slane %v1819_v40, 4 }
  0x8f   : > { %v9568_v62 = vrot.slane %v6722_v38, 5  ;;  %v5339_v43 = vcombine.low %v1039_v9, %v1049_v12  ;;  %v1231_v19 = vsel %vm6726_vm4, %v1226_v0, %v1230_v53  ;;  %v5364_v36 = vcombine.low %v6688_v13, %v6691_v14 }
  0x90   : > { %v1236_v59 = vrot.slane %v1235_v3, 4  ;;  %v9570_v34 = vrot.slane %v6694_v15, 5  ;;  %v9571_v50 = vrot.slane %v6732_v49, 5  ;;  %v5366_v13 = vcombine.low %v6761_v16, %v6768_v29 }
  0x91   : > { %v1828_v63 = vrot.slane %v9568_v62, 4  ;;  %v9569_v4 = vmov %v9568_v62  ;;  %5945 = vmatmul.mubr.msk.bf16.gmra.mxu0 %vm1292_vm3, %v5339_v43  ;;  %v5398_v15 = vrot.slane %v6761_v16, 9  ;;  %v1833_v35 = vrot.slane %v6768_v29, 5 }
  0x92   : > { %v1827_v37 = vsel %vm7010_vm7, %v5397_v25, %v9569_v4  ;;  %v1823_v60 = vsel %vm7010_vm7, %v1821_v32, %v9570_v34  ;;  %v1241_v38 = vsel %vm6726_vm4, %v1236_v59, %v1240_v6  ;;  %v1836_v49 = vrot.slane %v6774_v33, 5  ;;  %v7076_v4 = vld [vmem:[%s9475_s1 + $0xc] sm:$0x3] }
  0x93   : > { %v1830_v47 = vsel %vm7010_vm7, %v1828_v63, %v9571_v50  ;;  %v5413_v53 = vcombine.low %v1820_v5, %v1823_v60  ;;  %v5347_v14 = vcombine.low %v1231_v19, %v1241_v38  ;;  %v1840_v40 = vrot.slane %v6806_v17, 5  ;;  %v7093_v38 = vld [vmem:[%s9475_s1 + $0xa] sm:$0x3] }
  0x94   : > { %v5414_v9 = vcombine.low %v1827_v37, %v1830_v47  ;;  %v1834_v0 = vsel %vm7010_vm7, %v5398_v15, %v1833_v35  ;;  %v1835_v3 = vrot.slane %v1833_v35, 4  ;;  %v5399_v6 = vrot.slane %v6800_v8, 9 }
  0x95   : > { %6000 = vmatprep.mubr.msk.bf16.mxu0 %vm1292_vm3, %v5413_v53  ;;  %5961 = vmatmul.mubr.msk.bf16.gmra.mxu1 %vm1292_vm3, %v5347_v14  ;;  %v1842_v25 = vrot.slane %v1840_v40, 4  ;;  %v1843_v16 = vrot.slane %v6817_v31, 5  ;;  %v5400_v29 = vrot.slane %v6847_v1, 9  ;;  %v1847_v33 = vrot.slane %v6852_v24, 5 }
  0x96   : > { %5966 = vmatprep.mubr.msk.bf16.mxu1 %vm1292_vm3, %v5364_v36  ;;  %v1837_v12 = vsel %vm7010_vm7, %v1835_v3, %v1836_v49  ;;  %v1850_v5 = vrot.slane %v6856_v30, 5  ;;  %v1854_v32 = vrot.slane %v6896_v28, 5  ;;  %v3081_v62 = vsel %vm1341_vm0, %v6870_v45, 0 }
  0x97   : > { %v5415_v63 = vcombine.low %v1834_v0, %v1837_v12  ;;  %v1849_v43 = vrot.slane %v1847_v33, 4  ;;  %v2403_v19 = vsel %vm1341_vm0, %v6812_v26, 0  ;;  %v1841_v31 = vsel %vm7010_vm7, %v5399_v6, %v1840_v40 }
  0x98   : > { %v5401_v59 = vrot.slane %v6891_v11, 9  ;;  %v1844_v30 = vsel %vm7010_vm7, %v1842_v25, %v1843_v16  ;;  %v1848_v45 = vsel %vm7010_vm7, %v5400_v29, %v1847_v33  ;;  %v1856_v37 = vrot.slane %v1854_v32, 4 }
  0x99   : > { %6001 = vmatmul.mubr.msk.bf16.vlgmr.msra.gmra.mxu0 %vm1292_vm3, %v5414_v9  ;;  %v1861_v26 = vrot.slane %v6936_v56, 5  ;;  %v1851_v36 = vsel %vm7010_vm7, %v1849_v43, %v1850_v5  ;;  %v1857_v34 = vrot.slane %v6905_v54, 5  ;;  %v5402_v60 = vrot.slane %v6926_v51, 9 }
  0x9a   : > { %6067 = vmatpush3.bf16.msra.mxu0 %v3081_v62  ;;  %6004 = vmatprep.mubr.msk.bf16.mxu0 %vm1292_vm3, %v5415_v63  ;;  %v1864_v50 = vrot.slane %v6942_v46, 5  ;;  %v1868_v53 = vrot.slane %v6974_v55, 5  ;;  %v5416_v54 = vcombine.low %v1841_v31, %v1844_v30  ;;  %v5417_v9 = vcombine.low %v1848_v45, %v1851_v36  ;;  %v9572_v31 = vld [vmem:[#allocation10_spill] sm:$0xff]  ;;  %v9575_v36 = vld [vmem:[#allocation11_spill] sm:$0xff] }
  0x9b   : > { %v1863_v47 = vrot.slane %v1861_v26, 4  ;;  %6245 = vmatprep.subr.msk.bf16.mxu0 %vm1341_vm0, %v7076_v4  ;;  %v1855_v46 = vsel %vm7010_vm7, %v5401_v59, %v1854_v32  ;;  %v1875_v14 = vrot.slane %v6705_v22, 5  ;;  %v1858_v15 = vsel %vm7010_vm7, %v1856_v37, %v1857_v34 }
  0x9c   : > { %v1862_v35 = vsel %vm7010_vm7, %v5402_v60, %v1861_v26  ;;  %v5403_v49 = vrot.slane %v6967_v10, 9  ;;  %v1870_v40 = vrot.slane %v1868_v53, 4  ;;  %v1871_v0 = vrot.slane %v6977_v58, 5  ;;  %v9574_v26 = vld [vmem:[#allocation12_spill] sm:$0xff] }
  0x9d   : > { %5967 = vmatmul.mubr.msk.bf16.vlgmr.msra.gmra.mxu1 %vm1292_vm3, %v5365_v21  ;;  %v1865_v21 = vsel %vm7010_vm7, %v1863_v47, %v1864_v50  ;;  %v5404_v3 = vrot.slane %v6701_v20, 9  ;;  %v5367_v6 = vcombine.low %v6800_v8, %v6806_v17  ;;  %v5368_v25 = vcombine.low %v6847_v1, %v6852_v24 }
  0x9e   : > { %6033 = vmatpush3.bf16.msra.mxu1 %v2403_v19  ;;  %5970 = vmatprep.mubr.msk.bf16.mxu1 %vm1292_vm3, %v5366_v13  ;;  %v1878_v13 = vrot.slane %v6708_v23, 5  ;;  %v5369_v16 = vcombine.low %v6891_v11, %v6896_v28  ;;  %v5370_v29 = vcombine.low %v6926_v51, %v6936_v56  ;;  %v5418_v23 = vcombine.low %v1855_v46, %v1858_v15  ;;  %v9578_v15 = vld [vmem:[#allocation14_spill] sm:$0xff] }
  0x9f   : > { %6244 = vmatprep.subr.msk.bf16.mxu1 %vm1341_vm0, %v7093_v38  ;;  %v5419_v33 = vcombine.low %v1862_v35, %v1865_v21  ;;  %v1877_v12 = vrot.slane %v1875_v14, 4  ;;  %v5405_v58 = vrot.slane %v6743_v61, 9  ;;  %v1869_v8 = vsel %vm7010_vm7, %v5403_v49, %v1868_v53  ;;  %v9576_v53 = vld [vmem:[#allocation13_spill] sm:$0xff] }
  0xa0   : > { %v1882_v17 = vrot.slane %v6747_v2, 5  ;;  %v5407_v24 = vrot.slane %v6824_v42, 9  ;;  %v1872_v11 = vsel %vm7010_vm7, %v1870_v40, %v1871_v0  ;;  %v1876_v28 = vsel %vm7010_vm7, %v5404_v3, %v1875_v14  ;;  %v9577_v14 = vld [vmem:[#allocation15_spill] sm:$0xff]  ;;  %v9579_v3 = vld [vmem:[#allocation16_spill] sm:$0xff] }
  0xa1   : > { %6005 = vmatmul.mubr.msk.bf16.gmra.mxu0 %vm1292_vm3, %v5416_v54  ;;  %v1885_v51 = vrot.slane %v6755_v7, 5  ;;  %v1896_v56 = vrot.slane %v6831_v48, 5  ;;  %v1899_v5 = vrot.slane %v6839_v57, 5  ;;  %v5408_v62 = vrot.slane %v6865_v44, 9  ;;  %v9573_v57 = vld [vmem:[#allocation8_spill] sm:$0xff] }
  0xa2   : > { %6008 = vmatprep.mubr.msk.bf16.mxu0 %vm1292_vm3, %v5417_v9  ;;  %v1903_v63 = vrot.slane %v6875_v52, 5  ;;  %v1879_v43 = vsel %vm7010_vm7, %v1877_v12, %v1878_v13  ;;  %v1906_v59 = vrot.slane %v9572_v31, 5  ;;  %v1889_v30 = vrot.slane %v9573_v57, 5 }
  0xa3   : > { %v7149_v7 = vsel %vm7010_vm7, %v5407_v24, %v1896_v56  ;;  %v1898_v19 = vrot.slane %v1896_v56, 4  ;;  %v5409_v50 = vrot.slane %v9575_v36, 9  ;;  %v1910_v47 = vrot.slane %v9574_v26, 5 }
  0xa4   : > { %v7155_v45 = vsel %vm7010_vm7, %v5408_v62, %v1903_v63  ;;  %v1905_v37 = vrot.slane %v1903_v63, 4  ;;  %v1913_v54 = vrot.slane %v9576_v53, 5  ;;  %v5410_v21 = vrot.slane %v9578_v15, 9 }
  0xa5   : > { %5971 = vmatmul.mubr.msk.bf16.gmra.mxu1 %vm1292_vm3, %v5367_v6  ;;  %v7161_v60 = vsel %vm7010_vm7, %v1898_v19, %v1899_v5  ;;  %v7180_v13 = vsel %vm7010_vm7, %v5409_v50, %v1910_v47  ;;  %v1912_v40 = vrot.slane %v1910_v47, 4  ;;  %v1917_v0 = vrot.slane %v9577_v14, 5  ;;  %v9581_v50 = vld [vmem:[#allocation7_spill] sm:$0xff]  ;;  %v9582_v47 = vld [vmem:[#allocation9_spill] sm:$0xff] }
  0xa6   : > { %5974 = vmatprep.mubr.msk.bf16.mxu1 %vm1292_vm3, %v5368_v25  ;;  %v5424_v9 = vcombine.low %v7149_v7, %v7161_v60  ;;  %v7170_v46 = vsel %vm7010_vm7, %v1905_v37, %v1906_v59  ;;  %v1920_v6 = vrot.slane %v9579_v3, 5  ;;  %v9580_v25 = vld [vmem:[#allocation17_spill] sm:$0xff]  ;;  %v1884_v63 = vrot.slane %v1882_v17, 4  ;;  %v7483_v19 = vld [vmem:[%s6685_s16 + $0x128] sm:$0x1] }
  0xa7   : > { %v5425_v49 = vcombine.low %v7155_v45, %v7170_v46  ;;  %v5411_v24 = vrot.slane %v9580_v25, 9  ;;  %v7191_v56 = vsel %vm7010_vm7, %v1912_v40, %v1913_v54  ;;  %v7195_v5 = vsel %vm7010_vm7, %v5410_v21, %v1917_v0  ;;  %9605 = vst [vmem:[#allocation21_spill] sm:$0xff] %v7483_v19 }
  0xa8   : > { %v1919_v62 = vrot.slane %v1917_v0, 4  ;;  %v5420_v37 = vcombine.low %v1869_v8, %v1872_v11  ;;  %v5421_v54 = vcombine.low %v1876_v28, %v1879_v43  ;;  %v1891_v21 = vrot.slane %v1889_v30, 4  ;;  %v7228_v28 = vld [vmem:[%s6685_s16 + $0xc0] sm:$0xf]  ;;  %v7231_v43 = vld [vmem:[%s6685_s16 + $0xc4] sm:$0xf] }
  0xa9   : > { %6009 = vmatmul.mubr.msk.bf16.gmra.mxu0 %vm1292_vm3, %v5418_v23  ;;  %v1924_v23 = vrot.slane %v6991_v41, 5  ;;  %v5371_v8 = vcombine.low %v6967_v10, %v6974_v55  ;;  %v5372_v11 = vcombine.low %v6701_v20, %v6705_v22  ;;  %v1883_v3 = vsel %vm7010_vm7, %v5405_v58, %v1882_v17  ;;  %v7247_v55 = vld [vmem:[%s6685_s16 + $0xcc] sm:$0xf] }
  0xaa   : > { %6012 = vmatprep.mubr.msk.bf16.mxu0 %vm1292_vm3, %v5419_v33  ;;  %v1927_v33 = vrot.slane %v7001_v27, 5  ;;  %v5406_v27 = vrot.slane %v9581_v50, 9  ;;  %v7212_v53 = vsel %vm7010_vm7, %v1919_v62, %v1920_v6  ;;  %v1886_v10 = vsel %vm7010_vm7, %v1884_v63, %v1885_v51  ;;  %v7250_v6 = vld [vmem:[%s6685_s16 + $0xd0] sm:$0xf]  ;;  %v7259_v62 = vld [vmem:[%s6685_s16 + $0xd8] sm:$0xf] }
  0xab   : > { %v7205_v31 = vsel %vm7010_vm7, %v5411_v24, %v1924_v23  ;;  %v1926_v59 = vrot.slane %v1924_v23, 4  ;;  %v2599_v24 = vshrl.u32 %v7228_v28, 16  ;;  %v2602_v58 = vshll.u32 %v7228_v28, 16 }
  0xac   : > { %v1890_v20 = vsel %vm7010_vm7, %v5406_v27, %v1889_v30  ;;  %v2612_v17 = vshrl.u32 %v7231_v43, 16  ;;  %v2608_v51 = vshll.u32 %v7231_v43, 16  ;;  %v5422_v30 = vcombine.low %v1883_v3, %v1886_v10  ;;  %v7266_v27 = vld [vmem:[%s6685_s16 + $0xdc] sm:$0xf]  ;;  %v7278_v10 = vld [vmem:[%s6685_s16 + $0xe8] sm:$0xf] }
  0xad   : > { %5975 = vmatmul.mubr.msk.bf16.gmra.mxu1 %vm1292_vm3, %v5369_v16  ;;  %v1892_v16 = vrot.slane %v9582_v47, 5  ;;  %v7218_v0 = vsel %vm7010_vm7, %v1926_v59, %v1927_v33  ;;  %v2623_v33 = vshrl.u32 %v7247_v55, 16  ;;  %v2626_v63 = vshll.u32 %v7247_v55, 16 }
  0xae   : > { %5978 = vmatprep.mubr.msk.bf16.mxu1 %vm1292_vm3, %v5370_v29  ;;  %v2636_v59 = vshrl.u32 %v7250_v6, 16  ;;  %v5373_v47 = vcombine.low %v6743_v61, %v6747_v2  ;;  %v2614_v3 = vrot.slane %v2612_v17, 4  ;;  %v2650_v61 = vshll.u32 %v7259_v62, 16 }
  0xaf   : > { %v1893_v22 = vsel %vm7010_vm7, %v1891_v21, %v1892_v16  ;;  %v5374_v16 = vcombine.low %v9581_v50, %v9573_v57  ;;  %v2601_v21 = vrot.slane %v2599_v24, 4  ;;  %v2660_v2 = vshrl.u32 %v7266_v27, 16 }
  0xb0   : > { %v5423_v23 = vcombine.low %v1890_v20, %v1893_v22  ;;  %v7282_v20 = vld [vmem:[%s6685_s16 + $0xc8] sm:$0x1]  ;;  %v2647_v22 = vshrl.u32 %v7259_v62, 16  ;;  %v2656_v57 = vshll.u32 %v7266_v27, 16  ;;  %v2625_v50 = vrot.slane %v2623_v33, 4 }
  0xb1   : > { %6013 = vmatmul.mubr.msk.bf16.gmra.mxu0 %vm1292_vm3, %v5420_v37  ;;  %v2632_v37 = vshll.u32 %v7250_v6, 16  ;;  %v2628_v24 = vrot.slane %v2626_v63, 5  ;;  %v2638_v17 = vrot.slane %v2636_v59, 4  ;;  %v2684_v29 = vshrl.u32 %v7278_v10, 16 }
  0xb2   : > { %6016 = vmatprep.mubr.msk.bf16.mxu0 %vm1292_vm3, %v5421_v54  ;;  %v7273_v54 = vld [vmem:[%s6685_s16 + $0xe4] sm:$0xf]  ;;  %v2680_v35 = vshll.u32 %v7278_v10, 16  ;;  %v2618_v33 = vshll.u32 %v7282_v20, 16  ;;  %v2649_v63 = vrot.slane %v2647_v22, 4  ;;  %v2652_v59 = vrot.slane %v2650_v61, 5 }
  0xb3   : > { %9583 = vst [vmem:[#allocation10_spill] sm:$0xff] %v7273_v54  ;;  %v2674_v12 = vshll.u32 %v7273_v54, 16  ;;  %v2662_v40 = vrot.slane %v2660_v2, 4  ;;  %v2629_v32 = vor.u32 %v2628_v24, %v2625_v50  ;;  %v2686_v22 = vrot.slane %v2684_v29, 4  ;;  %v7314_v61 = vld [vmem:[%s6685_s16 + $0xf0] sm:$0xf] }
  0xb4   : > { %9584 = vst [vmem:[#allocation8_spill] sm:$0xff] %v7314_v61  ;;  %v2620_v2 = vrot.slane %v2618_v33, 5  ;;  %v7320_v50 = vsel %vm1341_vm0, %v7093_v38, 0  ;;  %v7323_v24 = vld [vmem:[%s6685_s16 + $0xec] sm:$0x1]  ;;  %v2695_v33 = vshrl.u32 %v7314_v61, 16 }
  0xb5   : > { %5979 = vmatmul.mubr.msk.bf16.gmra.mxu1 %vm1292_vm3, %v5371_v8  ;;  %v2604_v8 = vrot.slane %v2602_v58, 5  ;;  %v7289_v58 = vrot.slane %v2632_v37, 5  ;;  %v7302_v37 = vrot.slane %v2656_v57, 5  ;;  %v2676_v1 = vrot.slane %v2674_v12, 5  ;;  %9585 = vst [vmem:[#allocation12_spill] sm:$0xff] %v7323_v24 }
  0xb6   : > { %5982 = vmatprep.mubr.msk.bf16.mxu1 %vm1292_vm3, %v5372_v11  ;;  %v7275_v11 = vrot.slane %v2608_v51, 5  ;;  %v7292_v51 = vld [vmem:[%s6685_s16 + $0xd4] sm:$0x1]  ;;  %v2653_v12 = vor.u32 %v2652_v59, %v2649_v63  ;;  %v2630_v38 = vrot.slane %v2629_v32, 4  ;;  %v2698_v7 = vshll.u32 %v7314_v61, 16 }
  0xb7   : > { %v2605_v34 = vor.u32 %v2604_v8, %v2601_v21  ;;  %v2642_v21 = vshll.u32 %v7292_v51, 16  ;;  %v7309_v8 = vld [vmem:[%s6685_s16 + $0xe0] sm:$0x1]  ;;  %v2663_v29 = vor.u32 %v2662_v40, %v7302_v37  ;;  %v9587_v63 = vcombine.low %v6824_v42, %v6831_v48 }
  0xb8   : > { %v7348_v32 = vsel %vm1341_vm0, %v7076_v4, 0  ;;  %v2654_v48 = vrot.slane %v2653_v12, 4 }
  0xb9   : > { %6017 = vmatmul.mubr.msk.bf16.gmra.mxu0 %vm1292_vm3, %v5422_v30  ;;  %v2671_v30 = vshrl.u32 %v7273_v54, 16  ;;  %v2606_v57 = vrot.slane %v2605_v34, 4  ;;  %v2666_v34 = vshll.u32 %v7309_v8, 16  ;;  %v2664_v4 = vrot.slane %v2663_v29, 4  ;;  %v7375_v29 = vld [vmem:[%s6685_s16 + $0xf8] sm:$0x1] }
  0xba   : > { %6020 = vmatprep.mubr.msk.bf16.mxu0 %vm1292_vm3, %v5423_v23  ;;  %v2615_v23 = vor.u32 %v2614_v3, %v7275_v11  ;;  %9591 = vst [vmem:[#allocation14_spill] sm:$0xff] %v7375_v29 }
  0xbb   : > { %v2673_v3 = vrot.slane %v2671_v30, 4  ;;  %v2644_v30 = vrot.slane %v2642_v21, 5  ;;  %v2611_v42 = vsel %vm6726_vm4, %v2606_v57, %v7275_v11  ;;  %v2668_v59 = vrot.slane %v2666_v34, 5 }
  0xbd   : > { %5983 = vmatmul.mubr.msk.bf16.gmra.mxu1 %vm1292_vm3, %v5373_v47  ;;  %v2639_v47 = vor.u32 %v2638_v17, %v7289_v58  ;;  %v7332_v17 = vld [vmem:[%s6685_s16 + $0xf4] sm:$0xf] }
  0xbe   : > { %5986 = vmatprep.mubr.msk.bf16.mxu1 %vm1292_vm3, %v5374_v16  ;;  %v7311_v16 = vrot.slane %v2680_v35, 5  ;;  %v2616_v35 = vrot.slane %v2615_v23, 4  ;;  %9586 = vst [vmem:[#allocation11_spill] sm:$0xff] %v7332_v17  ;;  %v2690_v23 = vshll.u32 %v7323_v24, 16  ;;  %v2708_v46 = vshrl.u32 %v7332_v17, 16 }
  0xbf   : > { %v2640_v60 = vrot.slane %v2639_v47, 4  ;;  %v7362_v47 = vld [vmem:[%s6685_s16 + $0xfc] sm:$0xf] }
  0xc0   : > { %v2687_v40 = vor.u32 %v2686_v22, %v7311_v16  ;;  %9589 = vst [vmem:[#allocation13_spill] sm:$0xff] %v7362_v47  ;;  %v2621_v21 = vsel %vm6726_vm4, %v2616_v35, %v2620_v2  ;;  %v7370_v22 = vld [vmem:[%s6685_s16 + $0x100] sm:$0xf]  ;;  %v2692_v12 = vrot.slane %v2690_v23, 5  ;;  %v2710_v2 = vrot.slane %v2708_v46, 4 }
  0xc1   : > { %6021 = vmatmul.mubr.msk.bf16.gmra.mxu0 %vm1292_vm3, %v5424_v9  ;;  %v2677_v9 = vor.u32 %v2676_v1, %v2673_v3  ;;  %v2704_v1 = vshll.u32 %v7332_v17, 16  ;;  %v2635_v3 = vsel %vm6726_vm4, %v2630_v38, %v7289_v58  ;;  %9590 = vst [vmem:[#allocation15_spill] sm:$0xff] %v7370_v22  ;;  %v2719_v35 = vshrl.u32 %v7362_v47, 16  ;;  %v7400_v23 = vld [vmem:[%s6685_s16 + $0x108] sm:$0xf] }
  0xc2   : > { %6024 = vmatprep.mubr.msk.bf16.mxu0 %vm1292_vm3, %v5425_v49  ;;  %v9588_v49 = vcombine.low %v6865_v44, %v6875_v52  ;;  %v2697_v44 = vrot.slane %v2695_v33, 4  ;;  %v2700_v52 = vrot.slane %v2698_v7, 5  ;;  %v2688_v57 = vrot.slane %v2687_v40, 4  ;;  %9594 = vst [vmem:[#allocation16_spill] sm:$0xff] %v7400_v23 }
  0xc3   : > { %v2678_v11 = vrot.slane %v2677_v9, 4  ;;  %v7377_v34 = vrot.slane %v2704_v1, 5  ;;  %v2722_v58 = vshll.u32 %v7362_v47, 16  ;;  %v9592_v38 = vcombine.low %v7180_v13, %v7191_v56 }
  0xc4   : > { %v2669_v33 = vsel %vm6726_vm4, %v2664_v4, %v2668_v59  ;;  %v2732_v7 = vshrl.u32 %v7370_v22, 16  ;;  %v9593_v9 = vcombine.low %v7195_v5, %v7212_v53  ;;  %v5527_v13 = vcombine.low %v2611_v42, %v2621_v21  ;;  %v7422_v21 = vld [vmem:[%s6685_s16 + $0x10c] sm:$0xf] }
  0xc5   : > { %5987 = vmatmul.mubr.msk.bf16.gmra.mxu1 %vm1292_vm3, %v9587_v63  ;;  %v2645_v63 = vsel %vm6726_vm4, %v2640_v60, %v2644_v30  ;;  %v2659_v30 = vsel %vm6726_vm4, %v2654_v48, %v7302_v37  ;;  %v2728_v60 = vshll.u32 %v7370_v22, 16  ;;  %v2701_v40 = vor.u32 %v2700_v52, %v2697_v44  ;;  %9597 = vst [vmem:[#allocation7_spill] sm:$0xff] %v7422_v21 }
  0xc6   : > { %5990 = vmatprep.mubr.msk.bf16.mxu1 %vm1292_vm3, %v9588_v49  ;;  %v2714_v37 = vshll.u32 %v7375_v29, 16  ;;  %v7402_v46 = vcombine.low %v2635_v3, %v2645_v63  ;;  %v2683_v1 = vsel %vm6726_vm4, %v2678_v11, %v7311_v16  ;;  %v2693_v5 = vsel %vm6726_vm4, %v2688_v57, %v2692_v12  ;;  %v7412_v49 = vld [vmem:[%s6685_s16 + $0x104] sm:$0x1]  ;;  %v7425_v3 = vld [vmem:[%s6685_s16 + $0x114] sm:$0xf] }
  0xc7   : > { %9595 = vst [vmem:[#allocation17_spill] sm:$0xff] %v7412_v49  ;;  %v9596_v42 = vcombine.low %v9575_v36, %v9574_v26  ;;  %v7418_v48 = vcombine.low %v2659_v30, %v2669_v33  ;;  %v2711_v4 = vor.u32 %v2710_v2, %v7377_v34  ;;  %v2721_v16 = vrot.slane %v2719_v35, 4  ;;  %9598 = vst [vmem:[#allocation9_spill] sm:$0xff] %v7425_v3  ;;  %v7436_v11 = vld [vmem:[%s6685_s16 + $0x118] sm:$0xf] }
  0xc8   : > { %v2724_v59 = vrot.slane %v2722_v58, 5  ;;  %v9599_v44 = vcombine.low %v9578_v15, %v9577_v14  ;;  %v7431_v26 = vrot.slane %v2728_v60, 5  ;;  %v2734_v36 = vrot.slane %v2732_v7, 4  ;;  %9600 = vst [vmem:[#allocation18_spill] sm:$0xff] %v7436_v11  ;;  %v7443_v14 = vld [vmem:[%s6685_s16 + $0x120] sm:$0xf] }
  0xc9   : > { %6025 = vmatmul.mubr.msk.bf16.gmra.mxu0 %vm1292_vm3, %v9592_v38  ;;  %v2743_v52 = vshrl.u32 %v7400_v23, 16  ;;  %v2746_v63 = vshll.u32 %v7400_v23, 16  ;;  %v7438_v57 = vcombine.low %v2683_v1, %v2693_v5  ;;  %v2702_v12 = vrot.slane %v2701_v40, 4  ;;  %v7450_v33 = vld [vmem:[%s6685_s16 + $0x124] sm:$0xf] }
  0xca   : > { %6028 = vmatprep.mubr.msk.bf16.mxu0 %vm1292_vm3, %v9593_v9  ;;  %v2716_v2 = vrot.slane %v2714_v37, 5  ;;  %v2756_v15 = vshrl.u32 %v7422_v21, 16  ;;  %v2752_v58 = vshll.u32 %v7422_v21, 16  ;;  %v2767_v38 = vshrl.u32 %v7425_v3, 16 }
  0xcb   : > { %v2770_v30 = vshll.u32 %v7425_v3, 16  ;;  %v2712_v7 = vrot.slane %v2711_v4, 4  ;;  %v2738_v60 = vshll.u32 %v7412_v49, 16  ;;  %v2780_v9 = vshrl.u32 %v7436_v11, 16  ;;  %v7462_v4 = vld [vmem:[%s6685_s16 + $0x110] sm:$0x1] }
  0xcc   : > { %v2776_v40 = vshll.u32 %v7436_v11, 16  ;;  %v9601_v37 = vcombine.low %v7205_v31, %v7218_v0  ;;  %v2725_v1 = vor.u32 %v2724_v59, %v2721_v16  ;;  %v2735_v5 = vor.u32 %v2734_v36, %v7431_v26  ;;  %9602 = vst [vmem:[#allocation19_spill] sm:$0xff] %v7462_v4  ;;  %v7471_v59 = vld [vmem:[%s6685_s16 + $0x11c] sm:$0x1] }
  0xcd   : > { %5991 = vmatmul.mubr.msk.bf16.gmra.mxu1 %vm1292_vm3, %v9596_v42  ;;  %v2745_v42 = vrot.slane %v2743_v52, 4  ;;  %v2791_v35 = vshrl.u32 %v7443_v14, 16  ;;  %v2794_v53 = vshll.u32 %v7443_v14, 16  ;;  %v2804_v56 = vshrl.u32 %v7450_v33, 16  ;;  %9603 = vst [vmem:[#allocation20_spill] sm:$0xff] %v7471_v59 }
  0xce   : > { %5994 = vmatprep.mubr.msk.bf16.mxu1 %vm1292_vm3, %v9599_v44  ;;  %v2748_v44 = vrot.slane %v2746_v63, 5  ;;  %v2800_v31 = vshll.u32 %v7450_v33, 16  ;;  %v7468_v0 = vrot.slane %v2752_v58, 5  ;;  %v2758_v16 = vrot.slane %v2756_v15, 4 }
  0xcf   : > { %v2769_v36 = vrot.slane %v2767_v38, 4  ;;  %v2772_v52 = vrot.slane %v2770_v30, 5  ;;  %v2707_v63 = vsel %vm6726_vm4, %v2702_v12, %v7377_v34  ;;  %v7480_v45 = vrot.slane %v2776_v40, 5  ;;  %v7498_v40 = vld [vmem:[%s6685_s16 + $0x130] sm:$0xf] }
  0xd0   : > { %v2782_v58 = vrot.slane %v2780_v9, 4  ;;  %v9606_v15 = vcombine.low %v7228_v28, %v7231_v43  ;;  %v2736_v38 = vrot.slane %v2735_v5, 4  ;;  %v2762_v30 = vshll.u32 %v7462_v4, 16 }
  0xd1   : > { %6029 = vmatmul.mubr.msk.bf16.gmra.mxu0 %vm1292_vm3, %v9601_v37  ;;  %v2740_v37 = vrot.slane %v2738_v60, 5  ;;  %v2793_v34 = vrot.slane %v2791_v35, 4  ;;  %v2796_v12 = vrot.slane %v2794_v53, 5  ;;  %v7495_v60 = vrot.slane %v2800_v31, 5 }
  0xd2   : > { %6068 = vmatprep.mubr.msk.bf16.mxu0 %vm1292_vm3, %v5527_v13  ;;  %v9604_v13 = vcombine.low %v9580_v25, %v6991_v41  ;;  %v2717_v41 = vsel %vm6726_vm4, %v2712_v7, %v2716_v2  ;;  %v2726_v25 = vrot.slane %v2725_v1, 4  ;;  %v2806_v9 = vrot.slane %v2804_v56, 4  ;;  %v7509_v56 = vld [vmem:[%s9475_s1 + $0x10] sm:$0x3] }
  0xd3   : > { %v2749_v49 = vor.u32 %v2748_v44, %v2745_v42  ;;  %v2759_v29 = vor.u32 %v2758_v16, %v7468_v0  ;;  %v2786_v24 = vshll.u32 %v7471_v59, 16  ;;  %v2783_v2 = vor.u32 %v2782_v58, %v7480_v45  ;;  %9607 = vst [vmem:[#allocation22_spill] sm:$0xff] %v7509_v56 }
  0xd4   : > { %v2810_v7 = vshll.u32 %v7483_v19, 16  ;;  %v5531_v1 = vcombine.low %v2707_v63, %v2717_v41  ;;  %v2731_v5 = vsel %vm6726_vm4, %v2726_v25, %v7431_v26  ;;  %v2828_v42 = vshrl.u32 %v7498_v40, 16  ;;  %v7528_v63 = vld [vmem:[%s6685_s16 + $0x13c] sm:$0xf] }
  0xd5   : > { %5995 = vmatmul.mubr.msk.bf16.gmra.mxu1 %vm1292_vm3, %v9604_v13  ;;  %v7493_v13 = vld [vmem:[%s6685_s16 + $0x12c] sm:$0xf]  ;;  %v2824_v44 = vshll.u32 %v7498_v40, 16  ;;  %v2741_v31 = vsel %vm6726_vm4, %v2736_v38, %v2740_v37  ;;  %v2764_v16 = vrot.slane %v2762_v30, 5  ;;  %v2750_v26 = vrot.slane %v2749_v49, 4 }
  0xd6   : > { %6034 = vmatprep.mubr.msk.bf16.mxu1 %vm1292_vm3, %v9606_v15  ;;  %v2773_v15 = vor.u32 %v2772_v52, %v2769_v36  ;;  %v2815_v35 = vshrl.u32 %v7493_v13, 16  ;;  %v2818_v53 = vshll.u32 %v7493_v13, 16  ;;  %v2797_v36 = vor.u32 %v2796_v12, %v2793_v34  ;;  %v7525_v52 = vld [vmem:[%s6685_s16 + $0x138] sm:$0xf] }
  0xd7   : > { %v2760_v58 = vrot.slane %v2759_v29, 4  ;;  %v2788_v25 = vrot.slane %v2786_v24, 5  ;;  %v2784_v37 = vrot.slane %v2783_v2, 4  ;;  %v2812_v38 = vrot.slane %v2810_v7, 5  ;;  %v7551_v7 = vld [vmem:[%s6685_s16 + $0x134] sm:$0x1] }
  0xd8   : > { %v2774_v41 = vrot.slane %v2773_v15, 4  ;;  %v2817_v49 = vrot.slane %v2815_v35, 4  ;;  %v2820_v29 = vrot.slane %v2818_v53, 5  ;;  %v9609_v24 = vcombine.low %v7259_v62, %v7266_v27  ;;  %9610 = vst [vmem:[#allocation23_spill] sm:$0xff] %v7551_v7 }
  0xd9   : > { %6069 = vmatmul.mubr.msk.bf16.vlgmr.msra.gmra.mxu0 %vm1292_vm3, %v7402_v46  ;;  %v2807_v46 = vor.u32 %v2806_v9, %v7495_v60  ;;  %v7546_v30 = vrot.slane %v2824_v44, 5  ;;  %v2830_v34 = vrot.slane %v2828_v42, 4  ;;  %v2839_v12 = vshrl.u32 %v7525_v52, 16  ;;  %v7575_v42 = vld [vmem:[%s6685_s16 + $0x148] sm:$0xf] }
  0xda   : > { %6135 = vmatpush3.bf16.msra.mxu0 %v7348_v32  ;;  %6072 = vmatprep.mubr.msk.bf16.mxu0 %vm1292_vm3, %v7418_v48  ;;  %v7533_v32 = vld [vmem:[%s9475_s1 + $0xe] sm:$0x3]  ;;  %v9608_v48 = vcombine.low %v7247_v55, %v7250_v6  ;;  %v2842_v9 = vshll.u32 %v7525_v52, 16  ;;  %v2798_v15 = vrot.slane %v2797_v36, 4  ;;  %v2848_v35 = vshll.u32 %v7528_v63, 16 }
  0xdb   : > { %6247 = vmatprep.subr.msk.bf16.mxu0 %vm1341_vm0, %v7509_v56  ;;  %v2808_v2 = vrot.slane %v2807_v46, 4  ;;  %v5532_v53 = vcombine.low %v2731_v5, %v2741_v31  ;;  %v2755_v44 = vsel %vm6726_vm4, %v2750_v26, %v7468_v0  ;;  %v2765_v46 = vsel %vm6726_vm4, %v2760_v58, %v2764_v16  ;;  %v7582_v16 = vld [vmem:[%s6685_s16 + $0x140] sm:$0x1] }
  0xdc   : > { %v2789_v5 = vsel %vm6726_vm4, %v2784_v37, %v2788_v25  ;;  %v2821_v31 = vor.u32 %v2820_v29, %v2817_v49  ;;  %v2831_v0 = vor.u32 %v2830_v34, %v7546_v30  ;;  %v2834_v26 = vshll.u32 %v7551_v7, 16  ;;  %9611 = vst [vmem:[#allocation24_spill] sm:$0xff] %v7582_v16  ;;  %v7616_v7 = vld [vmem:[%s6685_s16 + $0x154] sm:$0xf] }
  0xdd   : > { %6035 = vmatmul.mubr.msk.bf16.vlgmr.msra.gmra.mxu1 %vm1292_vm3, %v9608_v48  ;;  %v2779_v48 = vsel %vm6726_vm4, %v2774_v41, %v7480_v45  ;;  %v2841_v58 = vrot.slane %v2839_v12, 4  ;;  %v2844_v36 = vrot.slane %v2842_v9, 5  ;;  %v2803_v45 = vsel %vm6726_vm4, %v2798_v15, %v7495_v60 }
  0xde   : > { %6101 = vmatpush3.bf16.msra.mxu1 %v7320_v50  ;;  %6038 = vmatprep.mubr.msk.bf16.mxu1 %vm1292_vm3, %v9609_v24  ;;  %v2852_v50 = vshrl.u32 %v7528_v63, 16  ;;  %v7572_v24 = vld [vmem:[%s6685_s16 + $0x144] sm:$0xf]  ;;  %v2813_v41 = vsel %vm6726_vm4, %v2808_v2, %v2812_v38  ;;  %v7590_v25 = vrot.slane %v2848_v35, 5  ;;  %v2876_v29 = vshrl.u32 %v7575_v42, 16 }
  0xdf   : > { %6246 = vmatprep.subr.msk.bf16.mxu1 %vm1341_vm0, %v7533_v32  ;;  %v2863_v37 = vshrl.u32 %v7572_v24, 16  ;;  %v2866_v49 = vshll.u32 %v7572_v24, 16  ;;  %v2872_v34 = vshll.u32 %v7575_v42, 16  ;;  %v5533_v60 = vcombine.low %v2755_v44, %v2765_v46  ;;  %v7610_v44 = vld [vmem:[%s6685_s16 + $0x150] sm:$0xf] }
  0xe0   : > { %v2822_v12 = vrot.slane %v2821_v31, 4  ;;  %v2858_v9 = vshll.u32 %v7582_v16, 16  ;;  %v9613_v15 = vcombine.low %v7314_v61, %v7332_v17  ;;  %v2836_v35 = vrot.slane %v2834_v26, 5  ;;  %v7650_v31 = vld [vmem:[%s6685_s16 + $0x16c] sm:$0xf] }
  0xe1   : > { %6073 = vmatmul.mubr.msk.bf16.gmra.mxu0 %vm1292_vm3, %v7438_v57  ;;  %v2854_v57 = vrot.slane %v2852_v50, 4  ;;  %v2832_v50 = vrot.slane %v2831_v0, 4  ;;  %v5534_v46 = vcombine.low %v2779_v48, %v2789_v5  ;;  %v5535_v38 = vcombine.low %v2803_v45, %v2813_v41 }
  0xe2   : > { %6076 = vmatprep.mubr.msk.bf16.mxu0 %vm1292_vm3, %v5531_v1  ;;  %v9612_v1 = vcombine.low %v7273_v54, %v7278_v10  ;;  %v2865_v19 = vrot.slane %v2863_v37, 4  ;;  %v2868_v2 = vrot.slane %v2866_v49, 5  ;;  %v7621_v0 = vrot.slane %v2872_v34, 5 }
  0xe3   : > { %v2855_v16 = vor.u32 %v2854_v57, %v7590_v25  ;;  %v2878_v26 = vrot.slane %v2876_v29, 4  ;;  %v2827_v48 = vsel %vm6726_vm4, %v2822_v12, %v7546_v30  ;;  %v7629_v5 = vrot.slane %v2858_v9, 5  ;;  %v7642_v30 = vld [vmem:[%s6685_s16 + $0x168] sm:$0xf] }
  0xe4   : > { %v2887_v45 = vshrl.u32 %v7610_v44, 16  ;;  %v2890_v41 = vshll.u32 %v7610_v44, 16  ;;  %v2837_v57 = vsel %vm6726_vm4, %v2832_v50, %v2836_v35  ;;  %v2900_v49 = vshrl.u32 %v7616_v7, 16 }
  0xe5   : > { %6039 = vmatmul.mubr.msk.bf16.gmra.mxu1 %vm1292_vm3, %v9612_v1  ;;  %v2845_v1 = vor.u32 %v2844_v36, %v2841_v58  ;;  %v7624_v36 = vld [vmem:[%s6685_s16 + $0x160] sm:$0xf]  ;;  %v7632_v58 = vld [vmem:[%s6685_s16 + $0x14c] sm:$0x1]  ;;  %v2896_v29 = vshll.u32 %v7616_v7, 16  ;;  %v2856_v50 = vrot.slane %v2855_v16, 4  ;;  %v2869_v35 = vor.u32 %v2868_v2, %v2865_v19 }
  0xe6   : > { %6042 = vmatprep.mubr.msk.bf16.mxu1 %vm1292_vm3, %v9613_v15  ;;  %v7619_v15 = vld [vmem:[%s6685_s16 + $0x15c] sm:$0xf]  ;;  %9614 = vst [vmem:[#allocation25_spill] sm:$0xff] %v7632_v58  ;;  %v2924_v9 = vshrl.u32 %v7624_v36, 16  ;;  %v2882_v59 = vshll.u32 %v7632_v58, 16  ;;  %v2889_v4 = vrot.slane %v2887_v45, 4  ;;  %v9616_v16 = vcombine.low %v7400_v23, %v7422_v21 }
  0xe7   : > { %v2846_v37 = vrot.slane %v2845_v1, 4  ;;  %v2911_v34 = vshrl.u32 %v7619_v15, 16  ;;  %v2914_v12 = vshll.u32 %v7619_v15, 16  ;;  %v2879_v1 = vor.u32 %v2878_v26, %v7621_v0  ;;  %v7665_v19 = vld [vmem:[%s6685_s16 + $0x158] sm:$0x1] }
  0xe8   : > { %v2892_v61 = vrot.slane %v2890_v41, 5  ;;  %v2935_v17 = vshrl.u32 %v7642_v30, 16  ;;  %v2938_v54 = vshll.u32 %v7642_v30, 16  ;;  %9617 = vst [vmem:[#allocation26_spill] sm:$0xff] %v7665_v19  ;;  %v7667_v2 = vrot.slane %v2896_v29, 5 }
  0xe9   : > { %6077 = vmatmul.mubr.msk.bf16.gmra.mxu0 %vm1292_vm3, %v5532_v53  ;;  %v2920_v53 = vshll.u32 %v7624_v36, 16  ;;  %v2902_v26 = vrot.slane %v2900_v49, 4  ;;  %v2944_v45 = vshll.u32 %v7650_v31, 16  ;;  %v2913_v41 = vrot.slane %v2911_v34, 4  ;;  %v7680_v23 = vld [vmem:[%s6685_s16 + $0x164] sm:$0x1] }
  0xea   : > { %6080 = vmatprep.mubr.msk.bf16.mxu0 %vm1292_vm3, %v5533_v60  ;;  %v9615_v60 = vcombine.low %v7362_v47, %v7370_v22  ;;  %v2916_v58 = vrot.slane %v2914_v12, 5  ;;  %v2926_v22 = vrot.slane %v2924_v9, 4  ;;  %v5536_v56 = vcombine.low %v2827_v48, %v2837_v57  ;;  %9618 = vst [vmem:[#allocation27_spill] sm:$0xff] %v7680_v23  ;;  %v7683_v21 = vld [vmem:[%s6685_s16 + $0x174] sm:$0xf] }
  0xeb   : > { %v7671_v47 = vrot.slane %v2920_v53, 5  ;;  %v2861_v29 = vsel %vm6726_vm4, %v2856_v50, %v7629_v5  ;;  %v2884_v49 = vrot.slane %v2882_v59, 5  ;;  %v2870_v34 = vrot.slane %v2869_v35, 4  ;;  %v7687_v48 = vld [vmem:[%s6685_s16 + $0x178] sm:$0xf] }
  0xec   : > { %v2906_v12 = vshll.u32 %v7665_v19, 16  ;;  %v2937_v53 = vrot.slane %v2935_v17, 4  ;;  %v2940_v9 = vrot.slane %v2938_v54, 5  ;;  %v2903_v57 = vor.u32 %v2902_v26, %v7667_v2  ;;  %v7697_v17 = vld [vmem:[%s6685_s16 + $0x170] sm:$0x1] }
  0xed   : > { %6043 = vmatmul.mubr.msk.bf16.gmra.mxu1 %vm1292_vm3, %v9615_v60  ;;  %v2948_v60 = vshrl.u32 %v7650_v31, 16  ;;  %v2880_v5 = vrot.slane %v2879_v1, 4  ;;  %v2917_v50 = vor.u32 %v2916_v58, %v2913_v41  ;;  %v2927_v35 = vor.u32 %v2926_v22, %v7671_v47 }
  0xee   : > { %6046 = vmatprep.mubr.msk.bf16.mxu1 %vm1292_vm3, %v9616_v16  ;;  %v2851_v16 = vsel %vm6726_vm4, %v2846_v37, %v7590_v25  ;;  %v2893_v25 = vor.u32 %v2892_v61, %v2889_v4  ;;  %v7691_v37 = vrot.slane %v2944_v45, 5  ;;  %v2930_v19 = vshll.u32 %v7680_v23, 16 }
  0xef   : > { %v2950_v59 = vrot.slane %v2948_v60, 4  ;;  %v2959_v54 = vshrl.u32 %v7683_v21, 16  ;;  %v2972_v61 = vshrl.u32 %v7687_v48, 16  ;;  %v2968_v4 = vshll.u32 %v7687_v48, 16 }
  0xf0   : > { %v5537_v58 = vcombine.low %v2851_v16, %v2861_v29  ;;  %v2875_v22 = vsel %vm6726_vm4, %v2870_v34, %v7621_v0  ;;  %v2908_v1 = vrot.slane %v2906_v12, 5  ;;  %v2941_v26 = vor.u32 %v2940_v9, %v2937_v53  ;;  %v7719_v0 = vld [vmem:[%s6685_s16 + $0x17c] sm:$0x1] }
  0xf1   : > { %6081 = vmatmul.mubr.msk.bf16.gmra.mxu0 %vm1292_vm3, %v5534_v46  ;;  %v2962_v46 = vshll.u32 %v7683_v21, 16  ;;  %v9620_v60 = vcombine.low %v7443_v14, %v7450_v33  ;;  %v2894_v45 = vrot.slane %v2893_v25, 4  ;;  %v2904_v41 = vrot.slane %v2903_v57, 4 }
  0xf2   : > { %6084 = vmatprep.mubr.msk.bf16.mxu0 %vm1292_vm3, %v5535_v38  ;;  %v9619_v38 = vcombine.low %v7425_v3, %v7436_v11  ;;  %v2951_v23 = vor.u32 %v2950_v59, %v7691_v37  ;;  %v2954_v3 = vshll.u32 %v7697_v17, 16  ;;  %v2885_v16 = vsel %vm6726_vm4, %v2880_v5, %v2884_v49 }
  0xf3   : > { %v2918_v29 = vrot.slane %v2917_v50, 4  ;;  %v2932_v11 = vrot.slane %v2930_v19, 5  ;;  %v2961_v34 = vrot.slane %v2959_v54, 4  ;;  %v2964_v12 = vrot.slane %v2962_v46, 5 }
  0xf4   : > { %v7721_v53 = vrot.slane %v2968_v4, 5  ;;  %v2974_v9 = vrot.slane %v2972_v61, 4  ;;  %v5505_v25 = vcombine.low %v7572_v24, %v7575_v42  ;;  %v5506_v57 = vcombine.low %v7610_v44, %v7616_v7 }
  0xf5   : > { %6047 = vmatmul.mubr.msk.bf16.gmra.mxu1 %vm1292_vm3, %v9619_v38  ;;  %v2928_v38 = vrot.slane %v2927_v35, 4  ;;  %v5507_v59 = vcombine.low %v7619_v15, %v7624_v36  ;;  %v2942_v49 = vrot.slane %v2941_v26, 4  ;;  %v2899_v19 = vsel %vm6726_vm4, %v2894_v45, %v7667_v2  ;;  %v7760_v26 = vld [vmem:[%s6685_s16 + $0x18c] sm:$0xf] }
  0xf6   : > { %6050 = vmatprep.mubr.msk.bf16.mxu1 %vm1292_vm3, %v9620_v60  ;;  %v2909_v5 = vsel %vm6726_vm4, %v2904_v41, %v2908_v1  ;;  %v2952_v50 = vrot.slane %v2951_v23, 4  ;;  %v2956_v35 = vrot.slane %v2954_v3, 5  ;;  %v5538_v54 = vcombine.low %v2875_v22, %v2885_v16  ;;  %v7756_v1 = vld [vmem:[%s6685_s16 + $0x180] sm:$0xf]  ;;  %9622 = vst [vmem:[#allocation28_spill] sm:$0xff] %v7760_v26 }
  0xf7   : > { %v5508_v46 = vcombine.low %v7642_v30, %v7650_v31  ;;  %v2978_v61 = vshll.u32 %v7719_v0, 16  ;;  %v2923_v2 = vsel %vm6726_vm4, %v2918_v29, %v7671_v47  ;;  %v2933_v23 = vsel %vm6726_vm4, %v2928_v38, %v2932_v11 }
  0xf8   : > { %v2965_v3 = vor.u32 %v2964_v12, %v2961_v34  ;;  %v2975_v4 = vor.u32 %v2974_v9, %v7721_v53  ;;  %v5539_v22 = vcombine.low %v2899_v19, %v2909_v5  ;;  %v3301_v11 = vrot.slane %v7250_v6, 5  ;;  %v7776_v9 = vld [vmem:[%s6685_s16 + $0x190] sm:$0xf] }
  0xf9   : > { %6085 = vmatmul.mubr.msk.bf16.gmra.mxu0 %vm1292_vm3, %v5536_v56  ;;  %v3294_v56 = vrot.slane %v7231_v43, 5  ;;  %v2947_v43 = vsel %vm6726_vm4, %v2942_v49, %v7691_v37  ;;  %v9623_v60 = vcombine.low %v7525_v52, %v7528_v63  ;;  %v2957_v45 = vsel %vm6726_vm4, %v2952_v50, %v2956_v35  ;;  %v7770_v37 = vld [vmem:[%s6685_s16 + $0x184] sm:$0xf] }
  0xfa   : > { %6088 = vmatprep.mubr.msk.bf16.mxu0 %vm1292_vm3, %v5537_v58  ;;  %v9621_v58 = vcombine.low %v7493_v13, %v7498_v40  ;;  %v5559_v41 = vrot.slane %v7228_v28, 9  ;;  %v4098_v16 = vshrl.u32 %v7760_v26, 16  ;;  %v4101_v29 = vshll.u32 %v7760_v26, 16 }
  0xfb   : > { %v5540_v38 = vcombine.low %v2923_v2, %v2933_v23  ;;  %v2980_v6 = vrot.slane %v2978_v61, 5  ;;  %v3296_v34 = vrot.slane %v3294_v56, 4  ;;  %v3297_v12 = vrot.slane %v7282_v20, 5  ;;  %v9639_v20 = vld [vmem:[#allocation17_spill] sm:$0xff] }
  0xfc   : > { %v2966_v49 = vrot.slane %v2965_v3, 4  ;;  %v2976_v19 = vrot.slane %v2975_v4, 4  ;;  %v4107_v5 = vshll.u32 %v7776_v9, 16  ;;  %v4111_v50 = vshrl.u32 %v7776_v9, 16 }
  0xfd   : > { %6051 = vmatmul.mubr.msk.bf16.gmra.mxu1 %vm1292_vm3, %v9621_v58  ;;  %v5541_v28 = vcombine.low %v2947_v43, %v2957_v45  ;;  %v5560_v35 = vrot.slane %v7247_v55, 9  ;;  %v3303_v58 = vrot.slane %v3301_v11, 4  ;;  %v7785_v61 = vsel %vm7010_vm7, %v5559_v41, %v3294_v56 }
  0xfe   : > { %6054 = vmatprep.mubr.msk.bf16.mxu1 %vm1292_vm3, %v9623_v60  ;;  %v3304_v60 = vrot.slane %v7292_v51, 5  ;;  %v4100_v2 = vrot.slane %v4098_v16, 4  ;;  %v4103_v23 = vrot.slane %v4101_v29, 5  ;;  %v7792_v3 = vsel %vm7010_vm7, %v3296_v34, %v3297_v12  ;;  %v7822_v34 = vld [vmem:[%s6685_s16 + $0x198] sm:$0xf] }
  0xff   : > { %v2971_v56 = vsel %vm6726_vm4, %v2966_v49, %v7721_v53  ;;  %v2981_v4 = vsel %vm6726_vm4, %v2976_v19, %v2980_v6  ;;  %v7802_v43 = vrot.slane %v4107_v5, 5  ;;  %v7808_v41 = vsel %vm7010_vm7, %v5560_v35, %v3301_v11  ;;  %v7827_v19 = vld [vmem:[%s6685_s16 + $0x19c] sm:$0xf] }
 0x100   : > { %v3315_v53 = vrot.slane %v7278_v10, 5  ;;  %v4104_v29 = vor.u32 %v4103_v23, %v4100_v2  ;;  %v9516_v6 = vrot.slane %v7776_v9, 5  ;;  %v5542_v11 = vcombine.low %v2971_v56, %v2981_v4  ;;  %v9627_v23 = vld [vmem:[#allocation12_spill] sm:$0xff] }
 0x101   : > { %6089 = vmatmul.mubr.msk.bf16.gmra.mxu0 %vm1292_vm3, %v5538_v54  ;;  %v3308_v54 = vrot.slane %v7266_v27, 5  ;;  %9624 = vst [vmem:[#allocation29_spill] sm:$0xff] %v7802_v43  ;;  %v7812_v27 = vsel %vm7010_vm7, %v3303_v58, %v3304_v60  ;;  %v5561_v12 = vrot.slane %v7259_v62, 9  ;;  %v3311_v10 = vrot.slane %v7309_v8, 5  ;;  %v9625_v58 = vld [vmem:[#allocation22_spill] sm:$0xff] }
 0x102   : > { %6092 = vmatprep.mubr.msk.bf16.mxu0 %vm1292_vm3, %v5539_v22  ;;  %v4113_v22 = vrot.slane %v4111_v50, 4  ;;  %v7835_v35 = vsel %vm1341_vm0, %v7533_v32, 0  ;;  %v7839_v62 = vsel %vm1341_vm0, %v9625_v58, 0  ;;  %v9626_v60 = vld [vmem:[#allocation10_spill] sm:$0xff]  ;;  %v3317_v2 = vrot.slane %v3315_v53, 4 }
 0x103   : > { %v3310_v49 = vrot.slane %v3308_v54, 4  ;;  %v5562_v8 = vrot.slane %v9626_v60, 9  ;;  %v3318_v56 = vrot.slane %v9627_v23, 5  ;;  %v7844_v4 = vrot.slane %v4104_v29, 4  ;;  %v7854_v58 = vld [vmem:[%s6685_s16 + $0x1a4] sm:$0xf] }
 0x104   : > { %v4114_v5 = vor.u32 %v4113_v22, %v7802_v43  ;;  %v7848_v22 = vrot.slane %v9516_v6, 4  ;;  %v7859_v60 = vsel %vm7010_vm7, %v5561_v12, %v3308_v54  ;;  %v7866_v29 = vld [vmem:[%s6685_s16 + $0x1a8] sm:$0xf]  ;;  %v4146_v23 = vshrl.u32 %v7854_v58, 16  ;;  %v7907_v32 = vld [vmem:[%s6685_s16 + $0x1b4] sm:$0xf] }
 0x105   : > { %6055 = vmatmul.mubr.msk.bf16.gmra.mxu1 %vm1292_vm3, %v5505_v25  ;;  %9628 = vst [vmem:[#allocation22_spill] sm:$0xff] %v7844_v4  ;;  %v9630_v6 = vld [vmem:[#allocation11_spill] sm:$0xff]  ;;  %v4149_v54 = vshll.u32 %v7854_v58, 16  ;;  %v7881_v12 = vsel %vm7010_vm7, %v5562_v8, %v3315_v53  ;;  %v4159_v8 = vshrl.u32 %v7866_v29, 16  ;;  %v9642_v25 = vcombine.low %v7756_v1, %v7770_v37 }
 0x106   : > { %6058 = vmatprep.mubr.msk.bf16.mxu1 %vm1292_vm3, %v5506_v57  ;;  %9629 = vst [vmem:[#allocation10_spill] sm:$0xff] %v7848_v22  ;;  %v3322_v45 = vrot.slane %v9630_v6, 5  ;;  %v7870_v50 = vrot.slane %v4114_v5, 4  ;;  %v7885_v6 = vsel %vm7010_vm7, %v3317_v2, %v3318_v56  ;;  %v9633_v2 = vld [vmem:[#allocation8_spill] sm:$0xff]  ;;  %v7902_v51 = vrot.slane %v4146_v23, 4  ;;  %v9635_v57 = vld [vmem:[#allocation14_spill] sm:$0xff] }
 0x107   : > { %v5563_v56 = vrot.slane %v9633_v2, 9  ;;  %v9637_v2 = vld [vmem:[#allocation13_spill] sm:$0xff]  ;;  %v9640_v22 = vld [vmem:[#allocation7_spill] sm:$0xff] }
 0x108   : > { %9631 = vst [vmem:[#allocation12_spill] sm:$0xff] %v7870_v50  ;;  %9634 = vst [vmem:[#allocation11_spill] sm:$0xff] %v7902_v51  ;;  %v3324_v55 = vrot.slane %v3322_v45, 4  ;;  %v5564_v16 = vrot.slane %v9637_v2, 9  ;;  %v7919_v51 = vld [vmem:[%s6685_s16 + $0x1bc] sm:$0xf] }
 0x109   : > { %6093 = vmatmul.mubr.msk.bf16.gmra.mxu0 %vm1292_vm3, %v5540_v38  ;;  %v7863_v38 = vsel %vm7010_vm7, %v3310_v49, %v3311_v10  ;;  %v4155_v49 = vshll.u32 %v7866_v29, 16  ;;  %v9632_v10 = vld [vmem:[#allocation15_spill] sm:$0xff]  ;;  %v7923_v50 = vrot.slane %v4159_v8, 4  ;;  %v7932_v2 = vld [vmem:[%s6685_s16 + $0x1c0] sm:$0xf] }
 0x10a   : > { %6096 = vmatprep.mubr.msk.bf16.mxu0 %vm1292_vm3, %v5541_v28  ;;  %v3329_v5 = vrot.slane %v9632_v10, 5  ;;  %v7900_v28 = vld [vmem:[%s6685_s16 + $0x1b0] sm:$0xf]  ;;  %v3332_v10 = vrot.slane %v9639_v20, 5  ;;  %v4194_v20 = vshrl.u32 %v7919_v51, 16  ;;  %v4207_v8 = vshrl.u32 %v7932_v2, 16 }
 0x10b   : > { %v7915_v47 = vrot.slane %v4155_v49, 5  ;;  %9641 = vst [vmem:[#allocation14_spill] sm:$0xff] %v7923_v50  ;;  %v7967_v4 = vld [vmem:[%s6685_s16 + $0x1cc] sm:$0xf] }
 0x10c   : > { %v3331_v23 = vrot.slane %v3329_v5, 4  ;;  %v7951_v50 = vsel %vm7010_vm7, %v5564_v16, %v3329_v5  ;;  %v9646_v16 = vcombine.low %v7785_v61, %v7792_v3  ;;  %v7984_v39 = vrot.slane %v4207_v8, 4  ;;  %v8005_v8 = vld [vmem:[%s6685_s16 + $0x1d8] sm:$0xf]  ;;  %v9656_v3 = vld [vmem:[#allocation20_spill] sm:$0xff] }
 0x10d   : > { %6059 = vmatmul.mubr.msk.bf16.gmra.mxu1 %vm1292_vm3, %v5507_v59  ;;  %v7911_v59 = vrot.slane %v4149_v54, 5  ;;  %9638 = vst [vmem:[#allocation8_spill] sm:$0xff] %v7915_v47  ;;  %v7927_v54 = vsel %vm7010_vm7, %v5563_v56, %v3322_v45  ;;  %v4197_v45 = vshll.u32 %v7919_v51, 16  ;;  %v9644_v56 = vld [vmem:[#allocation16_spill] sm:$0xff]  ;;  %v3350_v61 = vrot.slane %v7450_v33, 5 }
 0x10e   : > { %6062 = vmatprep.mubr.msk.bf16.mxu1 %vm1292_vm3, %v5508_v46  ;;  %v3325_v46 = vrot.slane %v9635_v57, 5  ;;  %v3336_v57 = vrot.slane %v9640_v22, 5  ;;  %v4203_v22 = vshll.u32 %v7932_v2, 16  ;;  %v5565_v47 = vrot.slane %v9644_v56, 9  ;;  %v9648_v56 = vld [vmem:[#allocation18_spill] sm:$0xff]  ;;  %9651 = vst [vmem:[#allocation16_spill] sm:$0xff] %v7984_v39 }
 0x10f   : > { %9636 = vst [vmem:[#allocation15_spill] sm:$0xff] %v7911_v59  ;;  %v9645_v59 = vld [vmem:[#allocation19_spill] sm:$0xff]  ;;  %v7980_v43 = vrot.slane %v4197_v45, 5  ;;  %9654 = vst [vmem:[#allocation18_spill] sm:$0xff] %v8005_v8  ;;  %v3352_v39 = vrot.slane %v3350_v61, 4 }
 0x110   : > { %v3338_v53 = vrot.slane %v3336_v57, 4  ;;  %v3339_v49 = vrot.slane %v9645_v59, 5  ;;  %v7982_v59 = vrot.slane %v4203_v22, 5  ;;  %v7998_v45 = vsel %vm7010_vm7, %v5565_v47, %v3336_v57 }
 0x111   : > { %6097 = vmatmul.mubr.msk.bf16.gmra.mxu0 %vm1292_vm3, %v5542_v11  ;;  %v7941_v11 = vsel %vm7010_vm7, %v3324_v55, %v3325_v46  ;;  %v9643_v55 = vcombine.low %v7683_v21, %v7687_v48  ;;  %v7962_v46 = vsel %vm7010_vm7, %v3331_v23, %v3332_v10  ;;  %v7977_v23 = vrot.slane %v4194_v20, 4  ;;  %9649 = vst [vmem:[#allocation17_spill] sm:$0xff] %v7980_v43  ;;  %v9652_v20 = vld [vmem:[#allocation9_spill] sm:$0xff] }
 0x112   : > { %6136 = vmatprep.mubr.msk.bf16.mxu0 %vm1292_vm3, %v9642_v25  ;;  %v7954_v25 = vld [vmem:[%s6685_s16 + $0x1c8] sm:$0xf]  ;;  %9650 = vst [vmem:[#allocation7_spill] sm:$0xff] %v7982_v59  ;;  %v5566_v5 = vrot.slane %v9652_v20, 9  ;;  %v8002_v22 = vsel %vm7010_vm7, %v3338_v53, %v3339_v49  ;;  %v3346_v10 = vrot.slane %v9656_v3, 5  ;;  %v4251_v57 = vshll.u32 %v8005_v8, 16 }
 0x113   : > { %9647 = vst [vmem:[#allocation13_spill] sm:$0xff] %v7977_v23  ;;  %v7994_v23 = vld [vmem:[%s6685_s16 + $0x1d4] sm:$0xf]  ;;  %v9657_v53 = vcombine.low %v7822_v34, %v7827_v19  ;;  %v3357_v3 = vrot.slane %v7498_v40, 5  ;;  %v9658_v49 = vcombine.low %v7808_v41, %v7812_v27  ;;  %v5567_v40 = vrot.slane %v7443_v14, 9  ;;  %v9659_v59 = vld [vmem:[#allocation21_spill] sm:$0xff] }
 0x114   : > { %9653 = vst [vmem:[#allocation19_spill] sm:$0xff] %v7994_v23  ;;  %v4245_v47 = vshll.u32 %v7994_v23, 16  ;;  %v3353_v43 = vrot.slane %v9659_v59, 5  ;;  %v8059_v27 = vrot.slane %v4251_v57, 5 }
 0x115   : > { %6063 = vmatmul.mubr.msk.bf16.gmra.mxu1 %vm1292_vm3, %v9643_v55  ;;  %v3343_v55 = vrot.slane %v9648_v56, 5  ;;  %v4242_v56 = vshrl.u32 %v7994_v23, 16 }
 0x116   : > { %6102 = vmatprep.mubr.msk.bf16.mxu1 %vm1292_vm3, %v9646_v16  ;;  %v9655_v16 = vcombine.low %v7760_v26, %v7776_v9  ;;  %v8043_v26 = vld [vmem:[%s6685_s16 + $0x1e0] sm:$0xf]  ;;  %v8057_v14 = vrot.slane %v4245_v47, 5  ;;  %9663 = vst [vmem:[#allocation21_spill] sm:$0xff] %v8059_v27 }
 0x117   : > { %v3345_v20 = vrot.slane %v3343_v55, 4  ;;  %v8038_v33 = vrot.slane %v4242_v56, 4  ;;  %9660 = vst [vmem:[#allocation9_spill] sm:$0xff] %v8043_v26  ;;  %v8063_v56 = vld [vmem:[%s6685_s16 + $0x1ec] sm:$0xf] }
 0x118   : > { %9664 = vst [vmem:[#allocation30_spill] sm:$0xff] %v8063_v56  ;;  %v4293_v47 = vshll.u32 %v8063_v56, 16 }
 0x119   : > { %6137 = vmatmul.mubr.msk.bf16.vlgmr.msra.gmra.mxu0 %vm1292_vm3, %v9655_v16  ;;  %v4255_v16 = vshrl.u32 %v8005_v8, 16  ;;  %v8055_v41 = vsel %vm7010_vm7, %v3345_v20, %v3346_v10  ;;  %v4290_v20 = vshrl.u32 %v8063_v56, 16  ;;  %v9668_v10 = vcombine.low %v7854_v58, %v7866_v29 }
 0x11a   : > { %6203 = vmatpush3.bf16.msra.mxu0 %v7839_v62  ;;  %6140 = vmatprep.mubr.msk.bf16.mxu0 %vm1292_vm3, %v9657_v53  ;;  %v8030_v62 = vsel %vm7010_vm7, %v5566_v5, %v3343_v55  ;;  %v8046_v5 = vld [vmem:[%s6685_s16 + $0x1e4] sm:$0xf]  ;;  %v9662_v55 = vcombine.low %v7859_v60, %v7863_v38  ;;  %v3359_v53 = vrot.slane %v3357_v3, 4  ;;  %v9666_v60 = vld [vmem:[#allocation23_spill] sm:$0xff]  ;;  %v8120_v27 = vrot.slane %v4293_v47, 5 }
 0x11b   : > { %9661 = vst [vmem:[#allocation20_spill] sm:$0xff] %v8046_v5  ;;  %v3360_v38 = vrot.slane %v9666_v60, 5  ;;  %v8084_v60 = vsel %vm7010_vm7, %v3352_v39, %v3353_v43  ;;  %v3364_v39 = vrot.slane %v7528_v63, 5  ;;  %v9670_v43 = vcombine.low %v7900_v28, %v7907_v32  ;;  %v9681_v63 = vld [vmem:[#allocation24_spill] sm:$0xff] }
 0x11c   : > { %9673 = vst [vmem:[#allocation35_spill] sm:$0xff] %v8120_v27  ;;  %v5569_v47 = vrot.slane %v7525_v52, 9 }
 0x11d   : > { %6103 = vmatmul.mubr.msk.bf16.vlgmr.msra.gmra.mxu1 %vm1292_vm3, %v9658_v49  ;;  %v8065_v49 = vrot.slane %v4255_v16, 4  ;;  %v8109_v16 = vsel %vm7010_vm7, %v3359_v53, %v3360_v38  ;;  %v9676_v53 = vcombine.low %v7881_v12, %v7885_v6 }
 0x11e   : > { %6169 = vmatpush3.bf16.msra.mxu1 %v7835_v35  ;;  %6106 = vmatprep.mubr.msk.bf16.mxu1 %vm1292_vm3, %v9662_v55  ;;  %v5568_v35 = vrot.slane %v7493_v13, 9  ;;  %v8070_v55 = vld [vmem:[%s6685_s16 + $0x1f0] sm:$0xf]  ;;  %v8080_v13 = vsel %vm7010_vm7, %v5567_v40, %v3350_v61  ;;  %v8095_v40 = vpop.f32.mrf.mxu0  ;;  %v5572_v61 = vrot.slane %v7619_v15, 9  ;;  %v8167_v52 = vsel %vm7010_vm7, %v5569_v47, %v3364_v39 }
 0x11f   : > { %9665 = vst [vmem:[#allocation31_spill] sm:$0xff] %v8065_v49  ;;  %9667 = vst [vmem:[#allocation23_spill] sm:$0xff] %v8070_v55  ;;  %v4299_v57 = vshll.u32 %v8070_v55, 16  ;;  %v4303_v59 = vshrl.u32 %v8070_v55, 16  ;;  %v8114_v49 = vld [vmem:[%s6685_s16 + $0x1f8] sm:$0xf]  ;;  %v9689_v47 = vcombine.low %v7954_v25, %v7967_v4 }
 0x120   : > { %9669 = vst [vmem:[#allocation32_spill] sm:$0xff] %v8095_v40  ;;  %9671 = vst [vmem:[#allocation33_spill] sm:$0xff] %v8114_v49  ;;  %v8144_v6 = vpop.f32.mrf.mxu0 }
 0x121   : > { %6141 = vmatmul.mubr.msk.bf16.gmra.mxu0 %vm1292_vm3, %v9668_v10  ;;  %v8105_v10 = vsel %vm7010_vm7, %v5568_v35, %v3357_v3  ;;  %v8122_v40 = vrot.slane %v4299_v57, 5  ;;  %v8125_v3 = vld [vmem:[%s6685_s16 + $0x1fc] sm:$0xf]  ;;  %v8133_v38 = vrot.slane %v4303_v59, 4  ;;  %v9679_v57 = vcombine.low %v7927_v54, %v7941_v11  ;;  %9680 = vst [vmem:[#allocation40_spill] sm:$0xff] %v8144_v6 }
 0x122   : > { %6144 = vmatprep.mubr.msk.bf16.mxu0 %vm1292_vm3, %v9670_v43  ;;  %v8118_v43 = vrot.slane %v4290_v20, 4  ;;  %9675 = vst [vmem:[#allocation37_spill] sm:$0xff] %v8125_v3  ;;  %v8131_v35 = vpop.f32.mrf.mxu1  ;;  %v3367_v59 = vrot.slane %v9681_v63, 5  ;;  %v8155_v54 = vld [vmem:[%s6685_s16 + $0x208] sm:$0xf]  ;;  %v3385_v11 = vrot.slane %v7624_v36, 5 }
 0x123   : > { %9674 = vst [vmem:[#allocation36_spill] sm:$0xff] %v8122_v40  ;;  %9677 = vst [vmem:[#allocation38_spill] sm:$0xff] %v8131_v35  ;;  %v8148_v35 = vld [vmem:[%s6685_s16 + $0x204] sm:$0xf]  ;;  %v5570_v63 = vrot.slane %v7572_v24, 9  ;;  %v3371_v40 = vrot.slane %v7575_v42, 5  ;;  %v8178_v24 = vpop.f32.mrf.mxu0 }
 0x124   : > { %9672 = vst [vmem:[#allocation34_spill] sm:$0xff] %v8118_v43  ;;  %9678 = vst [vmem:[#allocation39_spill] sm:$0xff] %v8133_v38  ;;  %v8163_v15 = vpop.f32.mrf.mxu1  ;;  %v9686_v20 = vld [vmem:[#allocation25_spill] sm:$0xff]  ;;  %v8172_v36 = vsel %vm7010_vm7, %v5572_v61, %v3385_v11  ;;  %v9687_v38 = vcombine.low %v7919_v51, %v7932_v2  ;;  %v4341_v61 = vshll.u32 %v8148_v35, 16  ;;  %v9722_v43 = vcombine.low %v8105_v10, %v8109_v16 }
 0x125   : > { %6107 = vmatmul.mubr.msk.bf16.gmra.mxu1 %vm1292_vm3, %v9676_v53  ;;  %v3366_v53 = vrot.slane %v3364_v39, 4  ;;  %9682 = vst [vmem:[#allocation24_spill] sm:$0xff] %v8148_v35  ;;  %9683 = vst [vmem:[#allocation41_spill] sm:$0xff] %v8155_v54  ;;  %v3374_v27 = vrot.slane %v9686_v20, 5  ;;  %v4338_v20 = vshrl.u32 %v8148_v35, 16  ;;  %v8201_v6 = vsel %vm7010_vm7, %v5570_v63, %v3371_v40 }
 0x126   : > { %6110 = vmatprep.mubr.msk.bf16.mxu1 %vm1292_vm3, %v9679_v57  ;;  %v9684_v57 = vld [vmem:[#allocation27_spill] sm:$0xff]  ;;  %9688 = vst [vmem:[#allocation25_spill] sm:$0xff] %v8178_v24  ;;  %v3373_v39 = vrot.slane %v3371_v40, 4 }
 0x127   : > { %v3388_v12 = vrot.slane %v9684_v57, 5  ;;  %9685 = vst [vmem:[#allocation27_spill] sm:$0xff] %v8163_v15  ;;  %v3387_v57 = vrot.slane %v3385_v11, 4  ;;  %v8182_v42 = vsel %vm7010_vm7, %v3366_v53, %v3367_v59  ;;  %v5573_v53 = vrot.slane %v7642_v30, 9 }
 0x128   : > { %v3392_v59 = vrot.slane %v7650_v31, 5  ;;  %v4347_v30 = vshll.u32 %v8155_v54, 16  ;;  %v3402_v15 = vrot.slane %v7719_v0, 5  ;;  %v8229_v31 = vrot.slane %v4338_v20, 4 }
 0x129   : > { %6145 = vmatmul.mubr.msk.bf16.gmra.mxu0 %vm1292_vm3, %v9687_v38  ;;  %v3378_v38 = vrot.slane %v7616_v7, 5  ;;  %v8195_v11 = vsel %vm7010_vm7, %v3387_v57, %v3388_v12  ;;  %v9690_v7 = vcombine.low %v7951_v50, %v7962_v46  ;;  %v8210_v12 = vpop.f32.mrf.mxu1  ;;  %v8223_v50 = vpop.f32.mrf.mxu0  ;;  %v5571_v46 = vrot.slane %v7610_v44, 9 }
 0x12a   : > { %6148 = vmatprep.mubr.msk.bf16.mxu0 %vm1292_vm3, %v9689_v47  ;;  %v3395_v47 = vrot.slane %v7697_v17, 5  ;;  %9691 = vst [vmem:[#allocation42_spill] sm:$0xff] %v8210_v12  ;;  %v8217_v40 = vsel %vm7010_vm7, %v5573_v53, %v3392_v59  ;;  %v3394_v63 = vrot.slane %v3392_v59, 4  ;;  %v9692_v17 = vcombine.low %v7998_v45, %v8002_v22  ;;  %9693 = vst [vmem:[#allocation43_spill] sm:$0xff] %v8223_v50  ;;  %v9695_v59 = vld [vmem:[#allocation26_spill] sm:$0xff] }
 0x12b   : > { %v5574_v57 = vrot.slane %v7683_v21, 9  ;;  %9694 = vst [vmem:[#allocation44_spill] sm:$0xff] %v8229_v31  ;;  %v3380_v53 = vrot.slane %v3378_v38, 4  ;;  %v3381_v12 = vrot.slane %v9695_v59, 5  ;;  %v4351_v44 = vshrl.u32 %v8155_v54, 16  ;;  %v8246_v20 = vpop.f32.mrf.mxu1 }
 0x12c   : > { %v8234_v45 = vsel %vm7010_vm7, %v3394_v63, %v3395_v47  ;;  %v8238_v22 = vld [vmem:[%s6685_s16 + $0x210] sm:$0xf]  ;;  %9696 = vst [vmem:[#allocation26_spill] sm:$0xff] %v8246_v20  ;;  %v8252_v47 = vrot.slane %v4341_v61, 5  ;;  %v8254_v63 = vrot.slane %v4347_v30, 5  ;;  %v9700_v21 = vcombine.low %v7994_v23, %v8005_v8 }
 0x12d   : > { %6111 = vmatmul.mubr.msk.bf16.gmra.mxu1 %vm1292_vm3, %v9690_v7  ;;  %v3399_v7 = vrot.slane %v7687_v48, 5  ;;  %v8258_v31 = vld [vmem:[%s6685_s16 + $0x21c] sm:$0xf] }
 0x12e   : > { %6114 = vmatprep.mubr.msk.bf16.mxu1 %vm1292_vm3, %v9692_v17  ;;  %v8250_v17 = vsel %vm7010_vm7, %v3373_v39, %v3374_v27  ;;  %9697 = vst [vmem:[#allocation45_spill] sm:$0xff] %v8252_v47  ;;  %9698 = vst [vmem:[#allocation46_spill] sm:$0xff] %v8254_v63  ;;  %v8271_v27 = vld [vmem:[%s6685_s16 + $0x214] sm:$0xf]  ;;  %v8274_v39 = vld [vmem:[%s6685_s16 + $0x220] sm:$0xf] }
 0x12f   : > { %v8244_v48 = vsel %vm7010_vm7, %v5574_v57, %v3399_v7  ;;  %v3401_v0 = vrot.slane %v3399_v7, 4  ;;  %9699 = vst [vmem:[#allocation47_spill] sm:$0xff] %v8258_v31  ;;  %v8264_v57 = vpop.f32.mrf.mxu0  ;;  %v8268_v7 = vsel %vm7010_vm7, %v5571_v46, %v3378_v38  ;;  %9702 = vst [vmem:[#allocation49_spill] sm:$0xff] %v8274_v39  ;;  %v4386_v61 = vshrl.u32 %v8258_v31, 16  ;;  %v8329_v47 = vld [vmem:[%s6685_s16 + $0x22c] sm:$0xf] }
 0x130   : > { %9701 = vst [vmem:[#allocation48_spill] sm:$0xff] %v8264_v57  ;;  %v4389_v30 = vshll.u32 %v8258_v31, 16  ;;  %v8288_v38 = vsel %vm7010_vm7, %v3380_v53, %v3381_v12  ;;  %v4395_v46 = vshll.u32 %v8274_v39, 16  ;;  %v4399_v20 = vshrl.u32 %v8274_v39, 16 }
 0x131   : > { %6149 = vmatmul.mubr.msk.bf16.gmra.mxu0 %vm1292_vm3, %v9700_v21  ;;  %v8280_v59 = vsel %vm7010_vm7, %v3401_v0, %v3402_v15  ;;  %v9703_v21 = vcombine.low %v8043_v26, %v8046_v5  ;;  %v8296_v0 = vrot.slane %v4351_v44, 4  ;;  %v9705_v12 = vcombine.low %v8030_v62, %v8055_v41  ;;  %v8318_v41 = vpop.f32.mrf.mxu0 }
 0x132   : > { %v8304_v53 = vpop.f32.mrf.mxu1  ;;  %v9707_v62 = vcombine.low %v8080_v13, %v8084_v60  ;;  %9708 = vst [vmem:[#allocation52_spill] sm:$0xff] %v8318_v41  ;;  %v8324_v63 = vrot.slane %v4386_v61, 4  ;;  %v8326_v15 = vrot.slane %v4389_v30, 5  ;;  %v8334_v13 = vrot.slane %v4395_v46, 5  ;;  %v5613_v30 = vld [vmem:[%s6685_s16 + $0x194] sm:$0x1] }
 0x133   : > { %6152 = vmatprep.mubr.msk.bf16.mxu0 %vm1292_vm3, %v9703_v21  ;;  %9704 = vst [vmem:[#allocation50_spill] sm:$0xff] %v8296_v0  ;;  %v4083_v21 = vshll.u32 %v7770_v37, 16  ;;  %9706 = vst [vmem:[#allocation51_spill] sm:$0xff] %v8304_v53  ;;  %v8312_v0 = vld [vmem:[%s6685_s16 + $0x228] sm:$0xf]  ;;  %v8336_v60 = vrot.slane %v4399_v20, 4 }
 0x134   : > { %9709 = vst [vmem:[#allocation53_spill] sm:$0xff] %v8324_v63  ;;  %9710 = vst [vmem:[#allocation54_spill] sm:$0xff] %v8326_v15  ;;  %v8332_v53 = vld [vmem:[%s6685_s16 + $0x234] sm:$0xf]  ;;  %v9716_v44 = vshll.u32 %v7756_v1, 16  ;;  %v9717_v57 = vshrl.u32 %v7770_v37, 16  ;;  %v8352_v20 = vpop.f32.mrf.mxu1 }
 0x135   : > { %6115 = vmatmul.mubr.msk.bf16.gmra.mxu1 %vm1292_vm3, %v9705_v12  ;;  %9711 = vst [vmem:[#allocation55_spill] sm:$0xff] %v8332_v53  ;;  %9712 = vst [vmem:[#allocation56_spill] sm:$0xff] %v8334_v13  ;;  %v9715_v12 = vshrl.u32 %v7756_v1, 16  ;;  %v5610_v15 = vld [vmem:[%s6685_s16 + $0x188] sm:$0x1]  ;;  %v8347_v63 = vrot.slane %v4083_v21, 5  ;;  %v9719_v21 = vcombine.low %v8063_v56, %v8070_v55 }
 0x136   : > { %6118 = vmatprep.mubr.msk.bf16.mxu1 %vm1292_vm3, %v9707_v62  ;;  %9713 = vst [vmem:[#allocation57_spill] sm:$0xff] %v8336_v60  ;;  %v8339_v62 = vld [vmem:[%s6685_s16 + $0x238] sm:$0xf]  ;;  %v4079_v61 = vrot.slane %v9716_v44, 5  ;;  %v4089_v50 = vrot.slane %v9717_v57, 4  ;;  %v4769_v46 = vrot.slane %v7770_v37, 5  ;;  %v8364_v57 = vpop.f32.mrf.mxu0  ;;  %v9721_v44 = vcombine.low %v8114_v49, %v8125_v3  ;;  %v8382_v49 = vpop.f32.mrf.mxu1 }
 0x137   : > { %9714 = vst [vmem:[#allocation58_spill] sm:$0xff] %v8339_v62  ;;  %v4076_v41 = vrot.slane %v9715_v12, 4  ;;  %9718 = vst [vmem:[#allocation59_spill] sm:$0xff] %v8352_v20  ;;  %v4434_v20 = vshrl.u32 %v8332_v53, 16  ;;  %v4131_v12 = vshll.u32 %v7827_v19, 16  ;;  %v4437_v13 = vshll.u32 %v8332_v53, 16 }
 0x138   : > { %9720 = vst [vmem:[#allocation60_spill] sm:$0xff] %v8364_v57  ;;  %v5722_v57 = vrot.slane %v7756_v1, 9  ;;  %v4090_v37 = vor.u32 %v4089_v50, %v8347_v63  ;;  %v4771_v55 = vrot.slane %v4769_v46, 4  ;;  %v4772_v60 = vrot.slane %v5610_v15, 5  ;;  %9723 = vst [vmem:[#allocation61_spill] sm:$0xff] %v8382_v49  ;;  %v8394_v16 = vpop.f32.mrf.mxu0 }
 0x139   : > { %6153 = vmatmul.mubr.msk.bf16.gmra.mxu0 %vm1292_vm3, %v9719_v21  ;;  %v4080_v56 = vor.u32 %v4079_v61, %v4076_v41  ;;  %v4093_v21 = vshll.u32 %v5610_v15, 16  ;;  %v4117_v24 = vshll.u32 %v5613_v30, 16  ;;  %v4447_v41 = vshrl.u32 %v8339_v62, 16 }
 0x13a   : > { %6156 = vmatprep.mubr.msk.bf16.mxu0 %vm1292_vm3, %v9721_v44  ;;  %v4443_v44 = vshll.u32 %v8339_v62, 16  ;;  %v9724_v61 = vshrl.u32 %v7822_v34, 16  ;;  %v9725_v1 = vshll.u32 %v7822_v34, 16  ;;  %v9726_v15 = vcombine.low %v8167_v52, %v8182_v42 }
 0x13b   : > { %v8396_v10 = vrot.slane %v4434_v20, 4  ;;  %v8399_v49 = vrot.slane %v4131_v12, 5  ;;  %v9728_v26 = vshrl.u32 %v7827_v19, 16  ;;  %v8404_v8 = vrot.slane %v4437_v13, 5 }
 0x13c   : > { %v4124_v3 = vrot.slane %v9724_v61, 4  ;;  %v4127_v50 = vrot.slane %v9725_v1, 5  ;;  %v4783_v61 = vrot.slane %v7827_v19, 5  ;;  %v4081_v1 = vrot.slane %v4080_v56, 4 }
 0x13d   : > { %6119 = vmatmul.mubr.msk.bf16.gmra.mxu1 %vm1292_vm3, %v9722_v43  ;;  %9727 = vst [vmem:[#allocation62_spill] sm:$0xff] %v8396_v10  ;;  %v5616_v43 = vld [vmem:[%s6685_s16 + $0x1a0] sm:$0x1]  ;;  %v4137_v23 = vrot.slane %v9728_v26, 4  ;;  %9729 = vst [vmem:[#allocation63_spill] sm:$0xff] %v8404_v8  ;;  %v4095_v5 = vrot.slane %v4093_v21, 5  ;;  %v8408_v52 = vsel %vm7010_vm7, %v5722_v57, %v4769_v46  ;;  %v8412_v20 = vsel %vm7010_vm7, %v4771_v55, %v4772_v60  ;;  %v8414_v10 = vpop.f32.mrf.mxu1 }
 0x13e   : > { %6122 = vmatprep.mubr.msk.bf16.mxu1 %vm1292_vm3, %v9726_v15  ;;  %v4091_v42 = vrot.slane %v4090_v37, 4  ;;  %v4119_v12 = vrot.slane %v4117_v24, 5  ;;  %v4779_v15 = vrot.slane %v5613_v30, 5  ;;  %9730 = vst [vmem:[#allocation64_spill] sm:$0xff] %v8414_v10  ;;  %v8416_v26 = vrot.slane %v4443_v44, 5 }
 0x13f   : > { %v8418_v19 = vrot.slane %v4447_v41, 4  ;;  %v4128_v56 = vor.u32 %v4127_v50, %v4124_v3  ;;  %v4141_v13 = vshll.u32 %v5616_v43, 16  ;;  %v9733_v46 = vcombine.low %v8148_v35, %v8155_v54  ;;  %v5619_v37 = vld [vmem:[%s6685_s16 + $0x1ac] sm:$0x1]  ;;  %v9736_v50 = vld [vmem:[#allocation29_spill] sm:$0xff]  ;;  %v9742_v41 = vld [vmem:[#allocation10_spill] sm:$0xff] }
 0x140   : > { %9731 = vst [vmem:[#allocation65_spill] sm:$0xff] %v8416_v26  ;;  %v8424_v57 = vpop.f32.mrf.mxu0  ;;  %v4138_v55 = vor.u32 %v4137_v23, %v8399_v49  ;;  %v5724_v24 = vrot.slane %v7822_v34, 9  ;;  %v4785_v60 = vrot.slane %v4783_v61, 4  ;;  %v4786_v30 = vrot.slane %v5616_v43, 5  ;;  %v9739_v43 = vld [vmem:[#allocation28_spill] sm:$0xff] }
 0x141   : > { %9732 = vst [vmem:[#allocation66_spill] sm:$0xff] %v8418_v19  ;;  %6157 = vmatmul.mubr.msk.bf16.gmra.mxu0 %vm1292_vm3, %v9733_v46  ;;  %v9734_v21 = vcombine.low %v8238_v22, %v8271_v27  ;;  %v4086_v44 = vsel %vm6726_vm4, %v4081_v1, %v8347_v63  ;;  %v9737_v46 = vld [vmem:[#allocation22_spill] sm:$0xff]  ;;  %v9738_v23 = vrot.slane %v7776_v9, 5  ;;  %v9740_v10 = vrot.slane %v9739_v43, 9  ;;  %v9741_v63 = vld [vmem:[#allocation12_spill] sm:$0xff]  ;;  %v9744_v9 = vld [vmem:[#allocation15_spill] sm:$0xff] }
 0x142   : > { %v4110_v34 = vsel %vm6726_vm4, %v9737_v46, %v9736_v50  ;;  %v4120_v1 = vsel %vm6726_vm4, %v9741_v63, %v4119_v12  ;;  %v8458_v26 = vsel %vm7010_vm7, %v9742_v41, %v4779_v15  ;;  %v9743_v50 = vld [vmem:[#allocation11_spill] sm:$0xff]  ;;  %v9745_v43 = vcombine.low %v8201_v6, %v8250_v17  ;;  %v8475_v41 = vpop.f32.mrf.mxu0  ;;  %v8504_v54 = vld [vmem:[%s6685_s16 + $0x1c4] sm:$0x1] }
 0x143   : > { %6160 = vmatprep.mubr.msk.bf16.mxu0 %vm1292_vm3, %v9734_v21  ;;  %v8448_v19 = vsel %vm7010_vm7, %v9740_v10, %v9738_v23  ;;  %v4096_v21 = vsel %vm6726_vm4, %v4091_v42, %v4095_v5  ;;  %v4152_v46 = vor.u32 %v9744_v9, %v9743_v50  ;;  %v4129_v5 = vrot.slane %v4128_v56, 4  ;;  %v9747_v42 = vld [vmem:[#allocation8_spill] sm:$0xff]  ;;  %v9748_v23 = vld [vmem:[#allocation14_spill] sm:$0xff] }
 0x144   : > { %v8466_v10 = vpop.f32.mrf.mxu1  ;;  %v4162_v8 = vor.u32 %v9748_v23, %v9747_v42  ;;  %v4165_v12 = vshll.u32 %v5619_v37, 16  ;;  %v4179_v63 = vshll.u32 %v7907_v32, 16  ;;  %v9749_v15 = vcombine.low %v8268_v7, %v8288_v38 }
 0x145   : > { %6123 = vmatmul.mubr.msk.bf16.gmra.mxu1 %vm1292_vm3, %v9745_v43  ;;  %9746 = vst [vmem:[#allocation6_spill] sm:$0xff] %v8466_v10  ;;  %v4139_v50 = vrot.slane %v4138_v55, 4  ;;  %v4143_v6 = vrot.slane %v4141_v13, 5  ;;  %v8479_v17 = vsel %vm7010_vm7, %v5724_v24, %v4783_v61  ;;  %v8483_v56 = vsel %vm7010_vm7, %v4785_v60, %v4786_v30 }
 0x146   : > { %6126 = vmatprep.mubr.msk.bf16.mxu1 %vm1292_vm3, %v9749_v15  ;;  %v9750_v9 = vrot.slane %v7866_v29, 5  ;;  %v4793_v23 = vrot.slane %v5619_v37, 5  ;;  %v9751_v7 = vshrl.u32 %v7900_v28, 16  ;;  %v9752_v15 = vshll.u32 %v7900_v28, 16  ;;  %v8497_v60 = vpop.f32.mrf.mxu1 }
 0x147   : > { %v8491_v13 = vcombine.low %v4086_v44, %v4096_v21  ;;  %v8493_v10 = vcombine.low %v4110_v34, %v4120_v1  ;;  %v4153_v24 = vrot.slane %v4152_v46, 4  ;;  %9753 = vst [vmem:[#allocation29_spill] sm:$0xff] %v8497_v60  ;;  %v4163_v30 = vrot.slane %v4162_v8, 4  ;;  %v8510_v34 = vpop.f32.mrf.mxu0 }
 0x148   : > { %v4792_v43 = vrot.slane %v9750_v9, 4  ;;  %v4172_v38 = vrot.slane %v9751_v7, 4  ;;  %v4175_v55 = vrot.slane %v9752_v15, 5  ;;  %v4167_v9 = vrot.slane %v4165_v12, 5  ;;  %v5622_v15 = vld [vmem:[%s6685_s16 + $0x1b8] sm:$0x1] }
 0x149   : > { %v8499_v37 = vrot.slane %v4179_v63, 5  ;;  %v9754_v7 = vshrl.u32 %v7907_v32, 16  ;;  %v9755_v44 = vcombine.low %v8258_v31, %v8274_v39  ;;  %v4134_v21 = vsel %vm6726_vm4, %v4129_v5, %v8399_v49 }
 0x14a   : > { %v4144_v8 = vsel %vm6726_vm4, %v4139_v50, %v4143_v6  ;;  %v9756_v46 = vrot.slane %v7866_v29, 5  ;;  %v9757_v12 = vrot.slane %v7854_v58, 9  ;;  %v8534_v49 = vsel %vm7010_vm7, %v4792_v43, %v4793_v23  ;;  %v9759_v29 = vld [vmem:[#allocation13_spill] sm:$0xff] }
 0x14b   : > { %v4185_v35 = vrot.slane %v9754_v7, 4  ;;  %6161 = vmatmul.mubr.msk.bf16.gmra.mxu0 %vm1292_vm3, %v9755_v44  ;;  %v9758_v7 = vcombine.low %v8312_v0, %v8329_v47  ;;  %v4176_v5 = vor.u32 %v4175_v55, %v4172_v38  ;;  %v4797_v50 = vrot.slane %v7907_v32, 5  ;;  %v9760_v6 = vld [vmem:[#allocation17_spill] sm:$0xff]  ;;  %v8550_v32 = vpop.f32.mrf.mxu1 }
 0x14c   : > { %v8525_v63 = vsel %vm7010_vm7, %v9757_v12, %v9756_v46  ;;  %v4200_v58 = vor.u32 %v9760_v6, %v9759_v29  ;;  %v4158_v44 = vsel %vm6726_vm4, %v4153_v24, %v9747_v42  ;;  %v9761_v46 = vld [vmem:[#allocation7_spill] sm:$0xff]  ;;  %v9762_v12 = vld [vmem:[#allocation16_spill] sm:$0xff]  ;;  %v4213_v61 = vshll.u32 %v8504_v54, 16  ;;  %9764 = vst [vmem:[#allocation22_spill] sm:$0xff] %v8550_v32  ;;  %v8557_v24 = vpop.f32.mrf.mxu0 }
 0x14d   : > { %6164 = vmatprep.mubr.msk.bf16.mxu0 %vm1292_vm3, %v9758_v7  ;;  %v4210_v1 = vor.u32 %v9762_v12, %v9761_v46  ;;  %v4227_v7 = vshll.u32 %v7967_v4, 16  ;;  %v9763_v43 = vcombine.low %v8172_v36, %v8195_v11  ;;  %v8552_v23 = vcombine.low %v4134_v21, %v4144_v8  ;;  %v8574_v60 = vpop.f32.mrf.mxu1 }
 0x14e   : > { %v4168_v38 = vsel %vm6726_vm4, %v4163_v30, %v4167_v9  ;;  %v4186_v42 = vor.u32 %v4185_v35, %v8499_v37  ;;  %v4189_v55 = vshll.u32 %v5622_v15, 16  ;;  %v9765_v29 = vcombine.low %v8217_v40, %v8234_v45  ;;  %9769 = vst [vmem:[#allocation28_spill] sm:$0xff] %v8574_v60 }
 0x14f   : > { %6127 = vmatmul.mubr.msk.bf16.gmra.mxu1 %vm1292_vm3, %v9763_v43  ;;  %v5726_v11 = vrot.slane %v7900_v28, 9  ;;  %v9766_v21 = vshrl.u32 %v7954_v25, 16  ;;  %v9767_v30 = vshll.u32 %v7954_v25, 16  ;;  %v4177_v9 = vrot.slane %v4176_v5, 4 }
 0x150   : > { %6130 = vmatprep.mubr.msk.bf16.mxu1 %vm1292_vm3, %v9765_v29  ;;  %v4799_v6 = vrot.slane %v4797_v50, 4  ;;  %v4800_v12 = vrot.slane %v5622_v15, 5  ;;  %v4201_v43 = vrot.slane %v4200_v58, 4  ;;  %v4211_v32 = vrot.slane %v4210_v1, 4 }
 0x151   : > { %v4220_v8 = vrot.slane %v9766_v21, 4  ;;  %v4223_v35 = vrot.slane %v9767_v30, 5  ;;  %v4215_v40 = vrot.slane %v4213_v61, 5  ;;  %v8570_v45 = vrot.slane %v4227_v7, 5  ;;  %v5628_v30 = vld [vmem:[%s6685_s16 + $0x1d0] sm:$0x1]  ;;  %v8580_v15 = vpop.f32.mrf.mxu0 }
 0x152   : > { %v9768_v29 = vshrl.u32 %v7967_v4, 16  ;;  %v4187_v28 = vrot.slane %v4186_v42, 4  ;;  %v4191_v31 = vrot.slane %v4189_v55, 5  ;;  %v9770_v21 = vrot.slane %v7932_v2, 5 }
 0x153   : > { %v4807_v5 = vrot.slane %v8504_v54, 5  ;;  %v9771_v61 = vcombine.low %v8332_v53, %v8339_v62  ;;  %v8586_v1 = vcombine.low %v4158_v44, %v4168_v38  ;;  %v8590_v58 = vsel %vm7010_vm7, %v5726_v11, %v4797_v50  ;;  %v8613_v11 = vld [vmem:[%s6685_s16 + $0x1dc] sm:$0x1] }
 0x154   : > { %v4233_v36 = vrot.slane %v9768_v29, 4  ;;  %v4806_v39 = vrot.slane %v9770_v21, 4  ;;  %v4224_v7 = vor.u32 %v4223_v35, %v4220_v8  ;;  %v4811_v42 = vrot.slane %v7967_v4, 5 }
 0x155   : > { %6165 = vmatmul.mubr.msk.bf16.gmra.mxu0 %vm1292_vm3, %v9771_v61  ;;  %v9772_v54 = vcombine.low %v8408_v52, %v8412_v20  ;;  %v4182_v55 = vsel %vm6726_vm4, %v4177_v9, %v8499_v37  ;;  %v8602_v44 = vsel %vm7010_vm7, %v4799_v6, %v4800_v12  ;;  %v9773_v38 = vmov %v9770_v21  ;;  %v8617_v20 = vpop.f32.mrf.mxu0  ;;  %v8625_v35 = vpop.f32.mrf.mxu1  ;;  %v9862_v3 = vld [vmem:[#allocation28_spill] sm:$0xff] }
 0x156   : > { %v9774_v50 = vrot.slane %v7919_v51, 9  ;;  %v4248_v52 = vor.u32 %v8057_v14, %v8038_v33  ;;  %v4206_v37 = vsel %vm6726_vm4, %v4201_v43, %v9761_v46  ;;  %v4216_v2 = vsel %vm6726_vm4, %v4211_v32, %v4215_v40  ;;  %9775 = vst [vmem:[#allocation12_spill] sm:$0xff] %v8625_v35 }
 0x157   : > { %6204 = vmatprep.mubr.msk.bf16.mxu0 %vm1292_vm3, %v9772_v54  ;;  %v4234_v51 = vor.u32 %v4233_v36, %v8570_v45  ;;  %v4237_v8 = vshll.u32 %v5628_v30, 16  ;;  %v9776_v9 = vcombine.low %v8244_v48, %v8280_v59  ;;  %v4192_v33 = vsel %vm6726_vm4, %v4187_v28, %v4191_v31  ;;  %v8638_v6 = vpop.f32.mrf.mxu0  ;;  %v9777_v48 = vld [vmem:[#allocation21_spill] sm:$0xff]  ;;  %v9778_v59 = vld [vmem:[#allocation31_spill] sm:$0xff]  ;;  %v8645_v40 = vpop.f32.mrf.mxu1  ;;  %v9780_v28 = vld [vmem:[#allocation20_spill] sm:$0xff] }
 0x158   : > { %v8610_v4 = vsel %vm7010_vm7, %v9774_v50, %v9773_v38  ;;  %v8635_v14 = vsel %vm7010_vm7, %v4806_v39, %v4807_v5  ;;  %v5728_v46 = vrot.slane %v7954_v25, 9  ;;  %v4814_v32 = vrot.slane %v5628_v30, 5  ;;  %9779 = vst [vmem:[#allocation10_spill] sm:$0xff] %v8645_v40  ;;  %v9783_v50 = vld [vmem:[#allocation18_spill] sm:$0xff] }
 0x159   : > { %6131 = vmatmul.mubr.msk.bf16.gmra.mxu1 %vm1292_vm3, %v9776_v9  ;;  %v4225_v36 = vrot.slane %v4224_v7, 4  ;;  %v4813_v12 = vrot.slane %v4811_v42, 4  ;;  %v4258_v43 = vor.u32 %v9778_v59, %v9777_v48  ;;  %v4261_v31 = vshll.u32 %v8613_v11, 16  ;;  %v8660_v54 = vpop.f32.mrf.mxu1  ;;  %v5634_v9 = vld [vmem:[%s6685_s16 + $0x1e8] sm:$0x1] }
 0x15a   : > { %6170 = vmatprep.mubr.msk.bf16.mxu1 %vm1292_vm3, %v8491_v13  ;;  %v8649_v25 = vcombine.low %v4206_v37, %v4216_v2  ;;  %v8651_v29 = vrot.slane %v4248_v52, 4  ;;  %v4275_v21 = vshll.u32 %v9780_v28, 16  ;;  %v8654_v13 = vpop.f32.mrf.mxu0  ;;  %v8656_v5 = vcombine.low %v4182_v55, %v4192_v33  ;;  %9782 = vst [vmem:[#allocation15_spill] sm:$0xff] %v8660_v54  ;;  %v9785_v37 = vld [vmem:[#allocation19_spill] sm:$0xff]  ;;  %v9787_v33 = vld [vmem:[#allocation9_spill] sm:$0xff] }
 0x15b   : > { %9781 = vst [vmem:[#allocation11_spill] sm:$0xff] %v8654_v13  ;;  %v4235_v61 = vrot.slane %v4234_v51, 4  ;;  %v4239_v7 = vrot.slane %v4237_v8, 5  ;;  %v8664_v38 = vsel %vm7010_vm7, %v5728_v46, %v4811_v42  ;;  %v9784_v52 = vrot.slane %v9783_v50, 5  ;;  %v8693_v54 = vpop.f32.mrf.mxu1 }
 0x15c   : > { %v9786_v2 = vrot.slane %v9785_v37, 9  ;;  %v9788_v59 = vshrl.u32 %v9787_v33, 16  ;;  %v9789_v51 = vshll.u32 %v9787_v33, 16  ;;  %v6002_v39 = vpop.f32.mrf.mxu0  ;;  %v9790_v42 = vcombine.low %v8448_v19, %v8458_v26  ;;  %9791 = vst [vmem:[#allocation8_spill] sm:$0xff] %v8693_v54  ;;  %v9797_v54 = vld [vmem:[#allocation36_spill] sm:$0xff] }
 0x15d   : > { %v4230_v46 = vsel %vm6726_vm4, %v4225_v36, %v8570_v45  ;;  %v4259_v37 = vrot.slane %v4258_v43, 4  ;;  %v4254_v26 = vsel %vm6726_vm4, %v8651_v29, %v9777_v48  ;;  %v8703_v19 = vrot.slane %v4275_v21, 5  ;;  %v9795_v29 = vld [vmem:[#allocation34_spill] sm:$0xff]  ;;  %v9796_v21 = vld [vmem:[#allocation35_spill] sm:$0xff] }
 0x15e   : > { %v8672_v55 = vsel %vm7010_vm7, %v9786_v2, %v9784_v52  ;;  %v4268_v30 = vrot.slane %v9788_v59, 4  ;;  %v4271_v8 = vrot.slane %v9789_v51, 5  ;;  %6205 = vmatmul.mubr.msk.bf16.vlgmr.msra.gmra.mxu0 %vm1292_vm3, %v9790_v42  ;;  %v8688_v52 = vsel %vm7010_vm7, %v4813_v12, %v4814_v32  ;;  %v8691_v59 = vld [vmem:[%s6685_s16 + $0x1f4] sm:$0x1]  ;;  %v2064_v12 = vpop.f32.mrf.mxu0 }
 0x15f   : > { %v4263_v2 = vrot.slane %v4261_v31, 5  ;;  %v9792_v51 = vcombine.low %v8479_v17, %v8483_v56  ;;  %v9793_v45 = vshrl.u32 %v9780_v28, 16  ;;  %v4825_v36 = vrot.slane %v9780_v28, 5  ;;  %v9798_v28 = vld [vmem:[#allocation39_spill] sm:$0xff] }
 0x160   : > { %v4240_v43 = vsel %vm6726_vm4, %v4235_v61, %v4239_v7  ;;  %v9794_v17 = vrot.slane %v9783_v50, 5  ;;  %v4821_v31 = vrot.slane %v8613_v11, 5  ;;  %v4285_v42 = vshll.u32 %v5634_v9, 16  ;;  %v9799_v61 = vld [vmem:[#allocation32_spill] sm:$0xff]  ;;  %v6003_v50 = vpop.f32.mrf.mxu0 }
 0x161   : > { %6208 = vmatprep.mubr.msk.bf16.mxu0 %vm1292_vm3, %v9792_v51  ;;  %v4281_v32 = vrot.slane %v9793_v45, 4  ;;  %v5968_v51 = vpop.f32.mrf.mxu1  ;;  %6171 = vmatmul.mubr.msk.bf16.vlgmr.msra.gmra.mxu1 %vm1292_vm3, %v8493_v10  ;;  %v4272_v48 = vor.u32 %v4271_v8, %v4268_v30  ;;  %v4296_v45 = vor.u32 %v9796_v21, %v9795_v29  ;;  %v4306_v40 = vor.u32 %v9798_v28, %v9797_v54 }
 0x162   : > { %v4820_v56 = vrot.slane %v9794_v17, 4  ;;  %v4309_v35 = vshll.u32 %v8691_v59, 16  ;;  %v1680_v7 = vadd.f32 %v5968_v51, %v9799_v61  ;;  %6174 = vmatprep.mubr.msk.bf16.mxu1 %vm1292_vm3, %v8552_v23  ;;  %v4264_v10 = vsel %vm6726_vm4, %v4259_v37, %v4263_v2  ;;  %v9800_v61 = vld [vmem:[#allocation40_spill] sm:$0xff]  ;;  %v2067_v23 = vpop.f32.mrf.mxu0 }
 0x163   : > { %v5730_v30 = vrot.slane %v9787_v33, 9  ;;  %v1671_v8 = vpop.f32.mrf.mxu1  ;;  %v8728_v17 = vcombine.low %v4230_v46, %v4240_v43  ;;  %v4282_v29 = vor.u32 %v4281_v32, %v8703_v19  ;;  %v4827_v21 = vrot.slane %v4825_v36, 4  ;;  %v9801_v32 = vld [vmem:[#allocation25_spill] sm:$0xff] }
 0x164   : > { %v4828_v28 = vrot.slane %v5634_v9, 5  ;;  %v8731_v51 = vadd.f32 %v6002_v39, %v1680_v7  ;;  %v1672_v60 = vadd.f32 %v1671_v8, %v9800_v61  ;;  %v8736_v11 = vsel %vm7010_vm7, %v4820_v56, %v4821_v31  ;;  %v6006_v9 = vpop.f32.mrf.mxu0  ;;  %v9803_v31 = vld [vmem:[#allocation37_spill] sm:$0xff]  ;;  %v9807_v7 = vld [vmem:[#allocation43_spill] sm:$0xff] }
 0x165   : > { %v4287_v53 = vrot.slane %v4285_v42, 5  ;;  %v5969_v37 = vpop.f32.mrf.mxu1  ;;  %v4273_v2 = vrot.slane %v4272_v48, 4  ;;  %v4297_v33 = vrot.slane %v4296_v45, 4  ;;  %v4307_v62 = vrot.slane %v4306_v40, 4  ;;  %v9808_v61 = vld [vmem:[#allocation33_spill] sm:$0xff] }
 0x166   : > { %v4311_v46 = vrot.slane %v4309_v35, 5  ;;  %v8738_v43 = vadd.f32 %v2064_v12, %v1672_v60  ;;  %v1683_v13 = vadd.f32 %v5969_v37, %v9801_v32  ;;  %v9802_v39 = vcombine.low %v8525_v63, %v8534_v49  ;;  %v9805_v63 = vld [vmem:[#allocation23_spill] sm:$0xff]  ;;  %v2080_v8 = vpop.f32.mrf.mxu0 }
 0x167   : > { %v8747_v56 = vsel %vm7010_vm7, %v5730_v30, %v4825_v36  ;;  %v4323_v42 = vshll.u32 %v9803_v31, 16  ;;  %v1674_v48 = vpop.f32.mrf.mxu1  ;;  %v9804_v35 = vcombine.low %v8590_v58, %v8602_v44  ;;  %v4283_v60 = vrot.slane %v4282_v29, 4 }
 0x168   : > { %6209 = vmatmul.mubr.msk.bf16.gmra.mxu0 %vm1292_vm3, %v9802_v39  ;;  %v8756_v40 = vsel %vm7010_vm7, %v4827_v21, %v4828_v28  ;;  %v9806_v49 = vrot.slane %v9805_v63, 5  ;;  %v4835_v45 = vrot.slane %v8691_v59, 5  ;;  %v8761_v36 = vadd.f32 %v6003_v50, %v1683_v13  ;;  %v9811_v39 = vld [vmem:[#allocation48_spill] sm:$0xff] }
 0x169   : > { %6212 = vmatprep.mubr.msk.bf16.mxu0 %vm1292_vm3, %v9804_v35  ;;  %v1675_v30 = vadd.f32 %v1674_v48, %v9807_v7  ;;  %v9809_v58 = vshrl.u32 %v9808_v61, 16  ;;  %v9810_v29 = vshll.u32 %v9808_v61, 16  ;;  %v5972_v32 = vpop.f32.mrf.mxu1  ;;  %6175 = vmatmul.mubr.msk.bf16.gmra.mxu1 %vm1292_vm3, %v8586_v1  ;;  %v8770_v21 = vcombine.low %v4254_v26, %v4264_v10  ;;  %v6007_v35 = vpop.f32.mrf.mxu0  ;;  %v5640_v1 = vld [vmem:[%s6685_s16 + $0x200] sm:$0x1] }
 0x16a   : > { %v4834_v12 = vrot.slane %v9806_v49, 4  ;;  %v5746_v59 = vcombine.low %v8672_v55, %v8736_v11  ;;  %v4302_v13 = vsel %vm6726_vm4, %v4297_v33, %v9797_v54  ;;  %v4312_v50 = vsel %vm6726_vm4, %v4307_v62, %v4311_v46  ;;  %6178 = vmatprep.mubr.msk.bf16.mxu1 %vm1292_vm3, %v8656_v5  ;;  %v9814_v5 = vld [vmem:[#allocation30_spill] sm:$0xff] }
 0x16b   : > { %v4316_v44 = vrot.slane %v9809_v58, 4  ;;  %v4319_v37 = vrot.slane %v9810_v29, 5  ;;  %v8779_v28 = vadd.f32 %v2067_v23, %v1675_v30  ;;  %v1696_v48 = vadd.f32 %v5972_v32, %v9811_v39  ;;  %v1687_v7 = vpop.f32.mrf.mxu1  ;;  %v9816_v58 = vld [vmem:[#allocation52_spill] sm:$0xff]  ;;  %v2083_v32 = vpop.f32.mrf.mxu0 }
 0x16c   : > { %v8785_v26 = vrot.slane %v4323_v42, 5  ;;  %v9812_v10 = vshrl.u32 %v9803_v31, 16  ;;  %v4278_v62 = vsel %vm6726_vm4, %v4273_v2, %v8703_v19  ;;  %v4288_v54 = vsel %vm6726_vm4, %v4283_v60, %v4287_v53  ;;  %v8812_v2 = vld [vmem:[%s6685_s16 + $0x20c] sm:$0x1] }
 0x16d   : > { %v5747_v23 = vcombine.low %v8747_v56, %v8756_v40  ;;  %v9813_v33 = vrot.slane %v9805_v63, 5  ;;  %v9815_v46 = vrot.slane %v9814_v5, 9  ;;  %v8804_v30 = vadd.f32 %v6006_v9, %v1696_v48  ;;  %v5973_v60 = vpop.f32.mrf.mxu1  ;;  %v9817_v48 = vld [vmem:[#allocation60_spill] sm:$0xff]  ;;  %v6010_v5 = vpop.f32.mrf.mxu0 }
 0x16e   : > { %v4329_v49 = vrot.slane %v9812_v10, 4  ;;  %v1688_v29 = vadd.f32 %v1687_v7, %v9816_v58  ;;  %v8809_v19 = vsel %vm7010_vm7, %v4834_v12, %v4835_v45  ;;  %v4320_v53 = vor.u32 %v4319_v37, %v4316_v44  ;;  %v9819_v44 = vld [vmem:[#allocation44_spill] sm:$0xff]  ;;  %v9820_v37 = vld [vmem:[#allocation45_spill] sm:$0xff] }
 0x16f   : > { %v8802_v42 = vsel %vm7010_vm7, %v9815_v46, %v9813_v33  ;;  %v8814_v63 = vcombine.low %v4302_v13, %v4312_v50  ;;  %v4333_v39 = vshll.u32 %v5640_v1, 16  ;;  %v5732_v10 = vrot.slane %v9808_v61, 9  ;;  %v1690_v50 = vpop.f32.mrf.mxu1  ;;  %v9822_v46 = vld [vmem:[#allocation46_spill] sm:$0xff] }
 0x170   : > { %v4839_v33 = vrot.slane %v9803_v31, 5  ;;  %v8818_v9 = vadd.f32 %v2080_v8, %v1688_v29  ;;  %v1699_v7 = vadd.f32 %v5973_v60, %v9817_v48  ;;  %v9818_v12 = vcombine.low %v8610_v4, %v8635_v14  ;;  %v9823_v4 = vld [vmem:[#allocation50_spill] sm:$0xff]  ;;  %v2096_v60 = vpop.f32.mrf.mxu0 }
 0x171   : > { %v4330_v45 = vor.u32 %v4329_v49, %v8785_v26  ;;  %v4344_v13 = vor.u32 %v9820_v37, %v9819_v44  ;;  %v9821_v61 = vcombine.low %v8664_v38, %v8688_v52  ;;  %v8832_v31 = vcombine.low %v4278_v62, %v4288_v54  ;;  %v5976_v38 = vpop.f32.mrf.mxu1  ;;  %6179 = vmatmul.mubr.msk.bf16.gmra.mxu1 %vm1292_vm3, %v8649_v25 }
 0x172   : > { %6213 = vmatmul.mubr.msk.bf16.gmra.mxu0 %vm1292_vm3, %v9818_v12  ;;  %v5748_v8 = vcombine.low %v8802_v42, %v8809_v19  ;;  %v4354_v14 = vor.u32 %v9823_v4, %v9822_v46  ;;  %v4357_v58 = vshll.u32 %v8812_v2, 16  ;;  %v8839_v49 = vadd.f32 %v6007_v35, %v1699_v7  ;;  %6182 = vmatprep.mubr.msk.bf16.mxu1 %vm1292_vm3, %v8728_v17 }
 0x173   : > { %6216 = vmatprep.mubr.msk.bf16.mxu0 %vm1292_vm3, %v9821_v61  ;;  %v1691_v29 = vadd.f32 %v1690_v50, %v8394_v16  ;;  %v4321_v48 = vrot.slane %v4320_v53, 4  ;;  %v4842_v12 = vrot.slane %v5640_v1, 5  ;;  %v4335_v52 = vrot.slane %v4333_v39, 5  ;;  %v6011_v16 = vpop.f32.mrf.mxu0  ;;  %v1703_v25 = vpop.f32.mrf.mxu1 }
 0x174   : > { %v8846_v62 = vsel %vm7010_vm7, %v5732_v10, %v4839_v33  ;;  %v4841_v54 = vrot.slane %v4839_v33, 4  ;;  %v4371_v44 = vshll.u32 %v8271_v27, 16  ;;  %v1712_v35 = vadd.f32 %v5976_v38, %v8424_v57 }
 0x175   : > { %v8849_v37 = vadd.f32 %v2083_v32, %v1691_v29  ;;  %v4331_v1 = vrot.slane %v4330_v45, 4  ;;  %v4345_v53 = vrot.slane %v4344_v13, 4  ;;  %v4355_v39 = vrot.slane %v4354_v14, 4  ;;  %v2099_v4 = vpop.f32.mrf.mxu0  ;;  %v9826_v29 = vld [vmem:[#allocation41_spill] sm:$0xff]  ;;  %v5977_v13 = vpop.f32.mrf.mxu1 }
 0x176   : > { %v4359_v7 = vrot.slane %v4357_v58, 5  ;;  %v9824_v10 = vshrl.u32 %v8238_v22, 16  ;;  %v9825_v33 = vshll.u32 %v8238_v22, 16  ;;  %v8858_v32 = vadd.f32 %v6010_v5, %v1712_v35 }
 0x177   : > { %v1704_v57 = vadd.f32 %v1703_v25, %v8475_v41  ;;  %v9827_v38 = vrot.slane %v9826_v29, 5  ;;  %v4849_v45 = vrot.slane %v8812_v2, 5  ;;  %v4326_v14 = vsel %vm6726_vm4, %v4321_v48, %v8785_v26  ;;  %v9830_v48 = vld [vmem:[#allocation24_spill] sm:$0xff] }
 0x178   : > { %v4364_v50 = vrot.slane %v9824_v10, 4  ;;  %v4367_v61 = vrot.slane %v9825_v33, 5  ;;  %v4843_v58 = vsel %vm7010_vm7, %v4841_v54, %v4842_v12  ;;  %v5646_v10 = vld [vmem:[%s6685_s16 + $0x218] sm:$0x1]  ;;  %v8870_v33 = vrot.slane %v4371_v44, 5 }
 0x179   : > { %v4848_v17 = vrot.slane %v9827_v38, 4  ;;  %v9828_v5 = vshrl.u32 %v8271_v27, 16  ;;  %v8874_v35 = vadd.f32 %v2096_v60, %v1704_v57  ;;  %v1715_v25 = vadd.f32 %v5977_v13, %v8510_v34  ;;  %v6014_v38 = vpop.f32.mrf.mxu0  ;;  %v1706_v60 = vpop.f32.mrf.mxu1  ;;  %6183 = vmatmul.mubr.msk.bf16.gmra.mxu1 %vm1292_vm3, %v8770_v21  ;;  %v5649_v13 = vld [vmem:[%s6685_s16 + $0x224] sm:$0x1] }
 0x17a   : > { %6217 = vmatmul.mubr.msk.bf16.gmra.mxu0 %vm1292_vm3, %v5746_v59  ;;  %v4336_v26 = vsel %vm6726_vm4, %v4331_v1, %v4335_v52  ;;  %v9829_v2 = vrot.slane %v9826_v29, 5  ;;  %v9831_v12 = vrot.slane %v9830_v48, 9  ;;  %v4350_v34 = vsel %vm6726_vm4, %v4345_v53, %v9822_v46  ;;  %6186 = vmatprep.mubr.msk.bf16.mxu1 %vm1292_vm3, %v8832_v31  ;;  %v9833_v31 = vld [vmem:[#allocation54_spill] sm:$0xff] }
 0x17b   : > { %v4377_v41 = vrot.slane %v9828_v5, 4  ;;  %6220 = vmatprep.mubr.msk.bf16.mxu0 %vm1292_vm3, %v5747_v23  ;;  %v4360_v55 = vsel %vm6726_vm4, %v4355_v39, %v4359_v7  ;;  %v4368_v11 = vor.u32 %v4367_v61, %v4364_v50  ;;  %v4853_v59 = vrot.slane %v8271_v27, 5  ;;  %v2112_v1 = vpop.f32.mrf.mxu0  ;;  %v5980_v23 = vpop.f32.mrf.mxu1 }
 0x17c   : > { %v8889_v54 = vsel %vm7010_vm7, %v9831_v12, %v9829_v2  ;;  %v8901_v52 = vadd.f32 %v6011_v16, %v1715_v25  ;;  %v1707_v44 = vadd.f32 %v1706_v60, %v8557_v24  ;;  %v8906_v56 = vsel %vm7010_vm7, %v4848_v17, %v4849_v45 }
 0x17d   : > { %v4381_v40 = vshll.u32 %v5646_v10, 16  ;;  %v5700_v46 = vcombine.low %v4326_v14, %v4336_v26  ;;  %v5749_v53 = vcombine.low %v8846_v62, %v4843_v58  ;;  %v4378_v39 = vor.u32 %v4377_v41, %v8870_v33  ;;  %v6015_v7 = vpop.f32.mrf.mxu0  ;;  %v1719_v61 = vpop.f32.mrf.mxu1  ;;  %v9832_v14 = vld [vmem:[#allocation53_spill] sm:$0xff] }
 0x17e   : > { %v5734_v27 = vrot.slane %v8238_v22, 9  ;;  %v8913_v16 = vadd.f32 %v2099_v4, %v1707_v44  ;;  %v1728_v24 = vadd.f32 %v5980_v23, %v8580_v15  ;;  %v8918_v50 = vcombine.low %v4350_v34, %v4360_v55  ;;  %v9837_v44 = vld [vmem:[#allocation56_spill] sm:$0xff]  ;;  %v9839_v23 = vld [vmem:[#allocation11_spill] sm:$0xff] }
 0x17f   : > { %v4419_v21 = vshll.u32 %v8329_v47, 16  ;;  %v5750_v62 = vcombine.low %v8889_v54, %v8906_v56  ;;  %v4369_v57 = vrot.slane %v4368_v11, 4  ;;  %v4855_v29 = vrot.slane %v4853_v59, 4  ;;  %v2115_v15 = vpop.f32.mrf.mxu0  ;;  %v5981_v5 = vpop.f32.mrf.mxu1  ;;  %v9849_v54 = vld [vmem:[#allocation26_spill] sm:$0xff] }
 0x180   : > { %v4856_v22 = vrot.slane %v5646_v10, 5  ;;  %v8923_v17 = vadd.f32 %v6014_v38, %v1728_v24  ;;  %v1720_v4 = vadd.f32 %v1719_v61, %v8617_v20  ;;  %v4383_v45 = vrot.slane %v4381_v40, 5  ;;  %v9840_v61 = vld [vmem:[#allocation49_spill] sm:$0xff] }
 0x181   : > { %v4392_v58 = vor.u32 %v9833_v31, %v9832_v14  ;;  %v4379_v41 = vrot.slane %v4378_v39, 4  ;;  %v4854_v25 = vsel %vm7010_vm7, %v5734_v27, %v4853_v59  ;;  %v9834_v26 = vshrl.u32 %v8312_v0, 16  ;;  %v6018_v12 = vpop.f32.mrf.mxu0  ;;  %v1722_v11 = vpop.f32.mrf.mxu1  ;;  %6187 = vmatmul.mubr.msk.bf16.gmra.mxu1 %vm1292_vm3, %v8814_v63  ;;  %v9842_v14 = vld [vmem:[#allocation38_spill] sm:$0xff] }
 0x182   : > { %v9835_v10 = vshll.u32 %v8312_v0, 16  ;;  %v8935_v48 = vadd.f32 %v2112_v1, %v1720_v4  ;;  %v1731_v20 = vadd.f32 %v5981_v5, %v8638_v6  ;;  %6221 = vmatmul.mubr.msk.bf16.gmra.mxu0 %vm1292_vm3, %v5748_v8  ;;  %v8942_v60 = vrot.slane %v4419_v21, 5  ;;  %v9838_v1 = vld [vmem:[#allocation57_spill] sm:$0xff]  ;;  %v5652_v8 = vld [vmem:[%s6685_s16 + $0x230] sm:$0x1]  ;;  %6190 = vmatprep.mubr.msk.bf16.mxu1 %vm1292_vm3, %v5700_v46 }
 0x183   : > { %v4412_v2 = vrot.slane %v9834_v26, 4  ;;  %v9836_v34 = vshrl.u32 %v8329_v47, 16  ;;  %6224 = vmatprep.mubr.msk.bf16.mxu0 %vm1292_vm3, %v5749_v53  ;;  %v4374_v59 = vsel %vm6726_vm4, %v4369_v57, %v8870_v33  ;;  %v4857_v6 = vsel %vm7010_vm7, %v4855_v29, %v4856_v22  ;;  %v2128_v27 = vpop.f32.mrf.mxu0  ;;  %v5984_v21 = vpop.f32.mrf.mxu1 }
 0x184   : > { %v4415_v38 = vrot.slane %v9835_v10, 5  ;;  %v4402_v42 = vor.u32 %v9838_v1, %v9837_v44  ;;  %v4405_v19 = vshll.u32 %v5649_v13, 16  ;;  %v8955_v40 = vadd.f32 %v6015_v7, %v1731_v20 }
 0x185   : > { %v4425_v55 = vrot.slane %v9836_v34, 4  ;;  %v1723_v39 = vadd.f32 %v1722_v11, %v9839_v23  ;;  %v8958_v24 = vrot.slane %v4392_v58, 4  ;;  %v4867_v53 = vrot.slane %v8329_v47, 5  ;;  %v6019_v58 = vpop.f32.mrf.mxu0  ;;  %v1735_v26 = vpop.f32.mrf.mxu1 }
 0x186   : > { %v4384_v33 = vsel %vm6726_vm4, %v4379_v41, %v4383_v45  ;;  %v9841_v57 = vrot.slane %v9840_v61, 5  ;;  %v4863_v22 = vrot.slane %v5649_v13, 5  ;;  %v4416_v7 = vor.u32 %v4415_v38, %v4412_v2  ;;  %v9843_v13 = vld [vmem:[#allocation27_spill] sm:$0xff] }
 0x187   : > { %v8967_v4 = vadd.f32 %v2115_v15, %v1723_v39  ;;  %v1744_v31 = vadd.f32 %v5984_v21, %v9842_v14  ;;  %v4426_v47 = vor.u32 %v4425_v55, %v8942_v60  ;;  %v4429_v5 = vshll.u32 %v5652_v8, 16  ;;  %v2131_v15 = vpop.f32.mrf.mxu0  ;;  %v5985_v11 = vpop.f32.mrf.mxu1  ;;  %v9845_v55 = vld [vmem:[#allocation47_spill] sm:$0xff]  ;;  %v9848_v21 = vld [vmem:[#allocation58_spill] sm:$0xff] }
 0x188   : > { %v4862_v29 = vrot.slane %v9841_v57, 4  ;;  %v5751_v63 = vcombine.low %v4854_v25, %v4857_v6  ;;  %v4403_v10 = vrot.slane %v4402_v42, 4  ;;  %v4407_v20 = vrot.slane %v4405_v19, 5  ;;  %v9847_v42 = vld [vmem:[#allocation42_spill] sm:$0xff] }
 0x189   : > { %v5736_v45 = vrot.slane %v8312_v0, 9  ;;  %v8973_v41 = vadd.f32 %v6018_v12, %v1744_v31  ;;  %v1736_v2 = vadd.f32 %v1735_v26, %v9843_v13  ;;  %v4869_v38 = vrot.slane %v4867_v53, 4  ;;  %v6022_v39 = vpop.f32.mrf.mxu0  ;;  %v1738_v61 = vpop.f32.mrf.mxu1  ;;  %6191 = vmatmul.mubr.msk.bf16.gmra.mxu1 %vm1292_vm3, %v8918_v50  ;;  %v9852_v26 = vld [vmem:[#allocation65_spill] sm:$0xff] }
 0x18a   : > { %v4870_v34 = vrot.slane %v5652_v8, 5  ;;  %v5702_v1 = vcombine.low %v4374_v59, %v4384_v33  ;;  %v9844_v46 = vmov %v9841_v57  ;;  %v9846_v23 = vrot.slane %v9845_v55, 9  ;;  %6225 = vmatmul.mubr.msk.bf16.gmra.mxu0 %vm1292_vm3, %v5750_v62 }
 0x18b   : > { %v4864_v0 = vsel %vm7010_vm7, %v4862_v29, %v4863_v22  ;;  %v4417_v12 = vrot.slane %v4416_v7, 4  ;;  %v8984_v6 = vadd.f32 %v2128_v27, %v1736_v2  ;;  %v1747_v19 = vadd.f32 %v5985_v11, %v9847_v42  ;;  %6228 = vmatprep.mubr.msk.bf16.mxu0 %vm1292_vm3, %v5751_v63  ;;  %v5655_v29 = vld [vmem:[%s6685_s16 + $0x23c] sm:$0x1]  ;;  %v2144_v62 = vpop.f32.mrf.mxu0  ;;  %v5988_v31 = vpop.f32.mrf.mxu1  ;;  %v9853_v63 = vld [vmem:[#allocation66_spill] sm:$0xff] }
 0x18c   : > { %v4861_v25 = vsel %vm7010_vm7, %v9846_v23, %v9844_v46  ;;  %v4427_v59 = vrot.slane %v4426_v47, 4  ;;  %v4431_v8 = vrot.slane %v4429_v5, 5  ;;  %v4874_v33 = vrot.slane %v9848_v21, 5  ;;  %v9851_v47 = vld [vmem:[#allocation63_spill] sm:$0xff]  ;;  %6194 = vmatprep.mubr.msk.bf16.mxu1 %vm1292_vm3, %v5702_v1 }
 0x18d   : > { %v4398_v27 = vsel %vm6726_vm4, %v8958_v24, %v9837_v44  ;;  %v4408_v57 = vsel %vm6726_vm4, %v4403_v10, %v4407_v20  ;;  %v9000_v22 = vadd.f32 %v6019_v58, %v1747_v19  ;;  %v1739_v56 = vadd.f32 %v1738_v61, %v9849_v54  ;;  %v9850_v58 = vld [vmem:[#allocation62_spill] sm:$0xff]  ;;  %v6023_v13 = vpop.f32.mrf.mxu0  ;;  %v9857_v61 = vld [vmem:[#allocation61_spill] sm:$0xff] }
 0x18e   : > { %v4868_v7 = vsel %vm7010_vm7, %v5736_v45, %v4867_v53  ;;  %v4871_v14 = vsel %vm7010_vm7, %v4869_v38, %v4870_v34  ;;  %v5752_v44 = vcombine.low %v4861_v25, %v4864_v0  ;;  %v4422_v24 = vsel %vm6726_vm4, %v4417_v12, %v8942_v60  ;;  %v9854_v53 = vld [vmem:[#allocation51_spill] sm:$0xff]  ;;  %v1751_v60 = vpop.f32.mrf.mxu1 }
 0x18f   : > { %v4440_v5 = vor.u32 %v9851_v47, %v9850_v58  ;;  %v4450_v10 = vor.u32 %v9853_v63, %v9852_v26  ;;  %v9016_v20 = vadd.f32 %v2131_v15, %v1739_v56  ;;  %v1760_v45 = vadd.f32 %v5988_v31, %v9854_v53  ;;  %v9855_v38 = vld [vmem:[#allocation55_spill] sm:$0xff]  ;;  %v2147_v0 = vpop.f32.mrf.mxu0  ;;  %v9859_v58 = vld [vmem:[#allocation6_spill] sm:$0xff]  ;;  %v9860_v53 = vld [vmem:[#allocation29_spill] sm:$0xff] }
 0x190   : > { %v4432_v50 = vsel %vm6726_vm4, %v4427_v59, %v4431_v8  ;;  %v4453_v2 = vshll.u32 %v5655_v29, 16  ;;  %v5737_v34 = vrot.slane %v9855_v38, 9  ;;  %v5753_v11 = vcombine.low %v4868_v7, %v4871_v14  ;;  %v9856_v25 = vld [vmem:[#allocation59_spill] sm:$0xff]  ;;  %v5989_v12 = vpop.f32.mrf.mxu1  ;;  %v9861_v38 = vld [vmem:[#allocation22_spill] sm:$0xff] }
 0x191   : > { %v4876_v46 = vrot.slane %v4874_v33, 4  ;;  %v4877_v55 = vrot.slane %v5655_v29, 5  ;;  %v9023_v23 = vadd.f32 %v6022_v39, %v1760_v45  ;;  %v1752_v15 = vadd.f32 %v1751_v60, %v9856_v25  ;;  %v6026_v8 = vpop.f32.mrf.mxu0  ;;  %v9858_v29 = vld [vmem:[#allocation64_spill] sm:$0xff] }
 0x192   : > { %v5703_v42 = vcombine.low %v4398_v27, %v4408_v57  ;;  %v5704_v19 = vcombine.low %v4422_v24, %v4432_v50  ;;  %v4441_v21 = vrot.slane %v4440_v5, 4  ;;  %v1763_v59 = vadd.f32 %v5989_v12, %v9857_v61  ;;  %6229 = vmatmul.mubr.msk.bf16.gmra.mxu0 %vm1292_vm3, %v5752_v44  ;;  %v1754_v7 = vpop.f32.mrf.mxu1  ;;  %v9863_v12 = vld [vmem:[#allocation12_spill] sm:$0xff] }
 0x193   : > { %v9026_v1 = vadd.f32 %v2144_v62, %v1752_v15  ;;  %v4451_v54 = vrot.slane %v4450_v10, 4  ;;  %v4455_v56 = vrot.slane %v4453_v2, 5  ;;  %6232 = vmatprep.mubr.msk.bf16.mxu0 %vm1292_vm3, %v5753_v11  ;;  %v4875_v39 = vsel %vm7010_vm7, %v5737_v34, %v4874_v33  ;;  %v2160_v14 = vpop.f32.mrf.mxu0 }
 0x194   : > { %v4878_v27 = vsel %vm7010_vm7, %v4876_v46, %v4877_v55  ;;  %v9035_v57 = vadd.f32 %v6023_v13, %v1763_v59  ;;  %v1755_v62 = vadd.f32 %v1754_v7, %v9858_v29  ;;  %v5992_v31 = vpop.f32.mrf.mxu1  ;;  %6195 = vmatmul.mubr.msk.bf16.gmra.mxu1 %vm1292_vm3, %v5703_v42  ;;  %v4446_v44 = vsel %vm6726_vm4, %v4441_v21, %v9852_v26  ;;  %v9864_v59 = vld [vmem:[#allocation10_spill] sm:$0xff] }
 0x195   : > { %v1776_v47 = vadd.f32 %v5992_v31, %v9859_v58  ;;  %v6027_v33 = vpop.f32.mrf.mxu0  ;;  %6198 = vmatprep.mubr.msk.bf16.mxu1 %vm1292_vm3, %v5704_v19  ;;  %v4456_v18 = vsel %vm6726_vm4, %v4451_v54, %v4455_v56  ;;  %v5754_v5 = vcombine.low %v4875_v39, %v4878_v27  ;;  %v9865_v39 = vld [vmem:[#allocation15_spill] sm:$0xff]  ;;  %v9866_v31 = vld [vmem:[#allocation8_spill] sm:$0xff] }
 0x196   : > { %v9042_v24 = vadd.f32 %v2147_v0, %v1755_v62  ;;  %v1767_v63 = vpop.f32.mrf.mxu1  ;;  %v5705_v2 = vcombine.low %v4446_v44, %v4456_v18 }
 0x197   : > { %v9048_v10 = vadd.f32 %v6026_v8, %v1776_v47  ;;  %v1768_v45 = vadd.f32 %v1767_v63, %v9860_v53  ;;  %v2163_v13 = vpop.f32.mrf.mxu0 }
 0x198   : > { %v5993_v50 = vpop.f32.mrf.mxu1 }
 0x199   : > { %v9051_v26 = vadd.f32 %v2160_v14, %v1768_v45  ;;  %v1779_v34 = vadd.f32 %v5993_v50, %v9861_v38  ;;  %v6030_v60 = vpop.f32.mrf.mxu0 }
 0x19a   : > { %6233 = vmatmul.mubr.msk.bf16.gmra.mxu0 %vm1292_vm3, %v5754_v5  ;;  %v1770_v11 = vpop.f32.mrf.mxu1 }
 0x19b   : > { %v9055_v46 = vadd.f32 %v6027_v33, %v1779_v34  ;;  %v1771_v55 = vadd.f32 %v1770_v11, %v9862_v3  ;;  %v2176_v25 = vpop.f32.mrf.mxu0 }
 0x19c   : > { %v5996_v15 = vpop.f32.mrf.mxu1  ;;  %6199 = vmatmul.mubr.msk.bf16.gmra.mxu1 %vm1292_vm3, %v5705_v2 }
 0x19d   : > { %v9059_v0 = vadd.f32 %v2163_v13, %v1771_v55  ;;  %v1792_v42 = vadd.f32 %v5996_v15, %v9863_v12  ;;  %v6031_v19 = vpop.f32.mrf.mxu0 }
 0x19e   : > { %v1783_v21 = vpop.f32.mrf.mxu1 }
 0x19f   : > { %v9062_v61 = vadd.f32 %v6030_v60, %v1792_v42  ;;  %v1784_v8 = vadd.f32 %v1783_v21, %v9864_v59  ;;  %v2179_v54 = vpop.f32.mrf.mxu0 }
 0x1a0   : > { %v5997_v56 = vpop.f32.mrf.mxu1 }
 0x1a1   : > { %v9065_v7 = vadd.f32 %v2176_v25, %v1784_v8  ;;  %v1795_v27 = vadd.f32 %v5997_v56, %v9865_v39  ;;  %v6070_v29 = vpop.f32.mrf.mxu0 }
 0x1a2   : > { %v1786_v62 = vpop.f32.mrf.mxu1 }
 0x1a3   : > { %v9068_v14 = vadd.f32 %v6031_v19, %v1795_v27  ;;  %v1787_v44 = vadd.f32 %v1786_v62, %v9866_v31  ;;  %v3117_v58 = vpop.f32.mrf.mxu0 }
 0x1a4   : > { %v6036_v47 = vpop.f32.mrf.mxu1 }
 0x1a5   : > { %v9071_v33 = vadd.f32 %v2179_v54, %v1787_v44  ;;  %v2568_v18 = vadd.f32 %v6036_v47, %v8731_v51  ;;  %v6071_v5 = vpop.f32.mrf.mxu0 }
 0x1a6   : > { %v2439_v63 = vpop.f32.mrf.mxu1 }
 0x1a7   : > { %v9074_v53 = vadd.f32 %v6070_v29, %v2568_v18  ;;  %v2566_v45 = vadd.f32 %v2439_v63, %v8738_v43  ;;  %v3120_v13 = vpop.f32.mrf.mxu0 }
 0x1a8   : > { %v6037_v50 = vpop.f32.mrf.mxu1 }
 0x1a9   : > { %v9077_v2 = vadd.f32 %v3117_v58, %v2566_v45  ;;  %v2569_v38 = vadd.f32 %v6037_v50, %v8761_v36  ;;  %v6074_v34 = vpop.f32.mrf.mxu0 }
 0x1aa   : > { %v2442_v60 = vpop.f32.mrf.mxu1 }
 0x1ab   : > { %v9080_v11 = vadd.f32 %v6071_v5, %v2569_v38  ;;  %v2567_v3 = vadd.f32 %v2442_v60, %v8779_v28  ;;  %v3133_v55 = vpop.f32.mrf.mxu0 }
 0x1ac   : > { %v6040_v51 = vpop.f32.mrf.mxu1 }
 0x1ad   : > { %v9083_v25 = vadd.f32 %v3120_v13, %v2567_v3  ;;  %v2572_v15 = vadd.f32 %v6040_v51, %v8804_v30  ;;  %v6075_v12 = vpop.f32.mrf.mxu0 }
 0x1ae   : > { %v2455_v43 = vpop.f32.mrf.mxu1 }
 0x1af   : > { %v9086_v42 = vadd.f32 %v6074_v34, %v2572_v15  ;;  %v2570_v19 = vadd.f32 %v2455_v43, %v8818_v9  ;;  %v3136_v21 = vpop.f32.mrf.mxu0 }
 0x1b0   : > { %v6041_v36 = vpop.f32.mrf.mxu1 }
 0x1b1   : > { %v9089_v59 = vadd.f32 %v3133_v55, %v2570_v19  ;;  %v2573_v8 = vadd.f32 %v6041_v36, %v8839_v49  ;;  %v6078_v54 = vpop.f32.mrf.mxu0 }
 0x1b2   : > { %v2458_v28 = vpop.f32.mrf.mxu1 }
 0x1b3   : > { %v9092_v56 = vadd.f32 %v6075_v12, %v2573_v8  ;;  %v2571_v39 = vadd.f32 %v2458_v28, %v8849_v37  ;;  %v3149_v27 = vpop.f32.mrf.mxu0 }
 0x1b4   : > { %v6044_v30 = vpop.f32.mrf.mxu1 }
 0x1b5   : > { %v9095_v29 = vadd.f32 %v3136_v21, %v2571_v39  ;;  %v2576_v62 = vadd.f32 %v6044_v30, %v8858_v32  ;;  %v6079_v31 = vpop.f32.mrf.mxu0 }
 0x1b6   : > { %v2471_v9 = vpop.f32.mrf.mxu1 }
 0x1b7   : > { %v9098_v44 = vadd.f32 %v6078_v54, %v2576_v62  ;;  %v2574_v58 = vadd.f32 %v2471_v9, %v8874_v35  ;;  %v3152_v47 = vpop.f32.mrf.mxu0 }
 0x1b8   : > { %v6045_v49 = vpop.f32.mrf.mxu1 }
 0x1b9   : > { %v9101_v18 = vadd.f32 %v3149_v27, %v2574_v58  ;;  %v2577_v5 = vadd.f32 %v6045_v49, %v8901_v52  ;;  %v6082_v63 = vpop.f32.mrf.mxu0 }
 0x1ba   : > { %v2474_v37 = vpop.f32.mrf.mxu1 }
 0x1bb   : > { %v9104_v45 = vadd.f32 %v6079_v31, %v2577_v5  ;;  %v2575_v13 = vadd.f32 %v2474_v37, %v8913_v16  ;;  %v3165_v50 = vpop.f32.mrf.mxu0 }
 0x1bc   : > { %v6048_v32 = vpop.f32.mrf.mxu1 }
 0x1bd   : > { %v9107_v38 = vadd.f32 %v3152_v47, %v2575_v13  ;;  %v2580_v34 = vadd.f32 %v6048_v32, %v8923_v17  ;;  %v6083_v60 = vpop.f32.mrf.mxu0 }
 0x1be   : > { %v2487_v35 = vpop.f32.mrf.mxu1 }
 0x1bf   : > { %v9110_v3 = vadd.f32 %v6082_v63, %v2580_v34  ;;  %v2578_v55 = vadd.f32 %v2487_v35, %v8935_v48  ;;  %v3168_v51 = vpop.f32.mrf.mxu0 }
 0x1c0   : > { %v6049_v52 = vpop.f32.mrf.mxu1 }
 0x1c1   : > { %v9113_v15 = vadd.f32 %v3165_v50, %v2578_v55  ;;  %v2581_v12 = vadd.f32 %v6049_v52, %v8955_v40  ;;  %v6086_v43 = vpop.f32.mrf.mxu0 }
 0x1c2   : > { %v2490_v16 = vpop.f32.mrf.mxu1 }
 0x1c3   : > { %v9116_v19 = vadd.f32 %v6083_v60, %v2581_v12  ;;  %v2579_v21 = vadd.f32 %v2490_v16, %v8967_v4  ;;  %v3181_v36 = vpop.f32.mrf.mxu0 }
 0x1c4   : > { %v6052_v17 = vpop.f32.mrf.mxu1 }
 0x1c5   : > { %v9119_v8 = vadd.f32 %v3168_v51, %v2579_v21  ;;  %v2584_v54 = vadd.f32 %v6052_v17, %v8973_v41  ;;  %v6087_v28 = vpop.f32.mrf.mxu0 }
 0x1c6   : > { %v2503_v48 = vpop.f32.mrf.mxu1 }
 0x1c7   : > { %v9122_v39 = vadd.f32 %v6086_v43, %v2584_v54  ;;  %v2582_v27 = vadd.f32 %v2503_v48, %v8984_v6  ;;  %v3184_v30 = vpop.f32.mrf.mxu0 }
 0x1c8   : > { %v6053_v40 = vpop.f32.mrf.mxu1 }
 0x1c9   : > { %v9125_v62 = vadd.f32 %v3181_v36, %v2582_v27  ;;  %v2585_v31 = vadd.f32 %v6053_v40, %v9000_v22  ;;  %v6090_v9 = vpop.f32.mrf.mxu0 }
 0x1ca   : > { %v2506_v4 = vpop.f32.mrf.mxu1 }
 0x1cb   : > { %v9128_v58 = vadd.f32 %v6087_v28, %v2585_v31  ;;  %v2583_v47 = vadd.f32 %v2506_v4, %v9016_v20  ;;  %v3197_v49 = vpop.f32.mrf.mxu0 }
 0x1cc   : > { %v6056_v41 = vpop.f32.mrf.mxu1 }
 0x1cd   : > { %9867 = vst [vmem:[#allocation14_spill] sm:$0xff] %v9128_v58  ;;  %v9131_v5 = vadd.f32 %v3184_v30, %v2583_v47  ;;  %v2588_v63 = vadd.f32 %v6056_v41, %v9023_v23  ;;  %v6091_v37 = vpop.f32.mrf.mxu0 }
 0x1ce   : > { %v2519_v6 = vpop.f32.mrf.mxu1 }
 0x1cf   : > { %9868 = vst [vmem:[#allocation13_spill] sm:$0xff] %v9131_v5  ;;  %v9134_v13 = vadd.f32 %v6090_v9, %v2588_v63  ;;  %v2586_v50 = vadd.f32 %v2519_v6, %v9026_v1  ;;  %v3200_v32 = vpop.f32.mrf.mxu0 }
 0x1d0   : > { %v6057_v22 = vpop.f32.mrf.mxu1 }
 0x1d1   : > { %9869 = vst [vmem:[#allocation17_spill] sm:$0xff] %v9134_v13  ;;  %v9137_v34 = vadd.f32 %v3197_v49, %v2586_v50  ;;  %v2589_v60 = vadd.f32 %v6057_v22, %v9035_v57  ;;  %v6094_v35 = vpop.f32.mrf.mxu0 }
 0x1d2   : > { %v2522_v20 = vpop.f32.mrf.mxu1 }
 0x1d3   : > { %9870 = vst [vmem:[#allocation7_spill] sm:$0xff] %v9137_v34  ;;  %v9140_v55 = vadd.f32 %v6091_v37, %v2589_v60  ;;  %v2587_v51 = vadd.f32 %v2522_v20, %v9042_v24  ;;  %v3213_v52 = vpop.f32.mrf.mxu0 }
 0x1d4   : > { %v6060_v23 = vpop.f32.mrf.mxu1 }
 0x1d5   : > { %9871 = vst [vmem:[#allocation16_spill] sm:$0xff] %v9140_v55  ;;  %v9143_v12 = vadd.f32 %v3200_v32, %v2587_v51  ;;  %v2592_v43 = vadd.f32 %v6060_v23, %v9048_v10  ;;  %v6095_v16 = vpop.f32.mrf.mxu0 }
 0x1d6   : > { %v2535_v1 = vpop.f32.mrf.mxu1 }
 0x1d7   : > { %9872 = vst [vmem:[#allocation21_spill] sm:$0xff] %v9143_v12  ;;  %v9146_v21 = vadd.f32 %v6094_v35, %v2592_v43  ;;  %v2590_v36 = vadd.f32 %v2535_v1, %v9051_v26  ;;  %v3216_v17 = vpop.f32.mrf.mxu0 }
 0x1d8   : > { %v6061_v57 = vpop.f32.mrf.mxu1 }
 0x1d9   : > { %9873 = vst [vmem:[#allocation31_spill] sm:$0xff] %v9146_v21  ;;  %v9149_v54 = vadd.f32 %v3213_v52, %v2590_v36  ;;  %v2593_v28 = vadd.f32 %v6061_v57, %v9055_v46  ;;  %v6098_v48 = vpop.f32.mrf.mxu0 }
 0x1da   : > { %v2538_v24 = vpop.f32.mrf.mxu1 }
 0x1db   : > { %9874 = vst [vmem:[#allocation20_spill] sm:$0xff] %v9149_v54  ;;  %v9152_v27 = vadd.f32 %v6095_v16, %v2593_v28  ;;  %v2591_v30 = vadd.f32 %v2538_v24, %v9059_v0  ;;  %v3229_v40 = vpop.f32.mrf.mxu0 }
 0x1dc   : > { %v6064_v10 = vpop.f32.mrf.mxu1 }
 0x1dd   : > { %9875 = vst [vmem:[#allocation18_spill] sm:$0xff] %v9152_v27  ;;  %v9155_v31 = vadd.f32 %v3216_v17, %v2591_v30  ;;  %v2596_v9 = vadd.f32 %v6064_v10, %v9062_v61  ;;  %v6099_v4 = vpop.f32.mrf.mxu0 }
 0x1de   : > { %v2551_v26 = vpop.f32.mrf.mxu1 }
 0x1df   : > { %9876 = vst [vmem:[#allocation19_spill] sm:$0xff] %v9155_v31  ;;  %v9158_v47 = vadd.f32 %v6098_v48, %v2596_v9  ;;  %v2594_v49 = vadd.f32 %v2551_v26, %v9065_v7  ;;  %v3232_v41 = vpop.f32.mrf.mxu0 }
 0x1e0   : > { %v6065_v46 = vpop.f32.mrf.mxu1 }
 0x1e1   : > { %9877 = vst [vmem:[#allocation9_spill] sm:$0xff] %v9158_v47  ;;  %v9161_v63 = vadd.f32 %v3229_v40, %v2594_v49  ;;  %v2597_v37 = vadd.f32 %v6065_v46, %v9068_v14  ;;  %v9164_v6 = vpop.f32.mrf.mxu0 }
 0x1e2   : > { %v2554_v0 = vpop.f32.mrf.mxu1 }
 0x1e3   : > { %9878 = vst [vmem:[#allocation34_spill] sm:$0xff] %v9161_v63  ;;  %v9166_v50 = vadd.f32 %v6099_v4, %v2597_v37  ;;  %v2595_v32 = vadd.f32 %v2554_v0, %v9071_v33  ;;  %v9169_v61 = vpop.f32.mrf.mxu0 }
 0x1e4   : > { %v6104_v22 = vpop.f32.mrf.mxu1 }
 0x1e5   : > { %9879 = vst [vmem:[#allocation35_spill] sm:$0xff] %v9166_v50  ;;  %v9171_v60 = vadd.f32 %v3232_v41, %v2595_v32  ;;  %v9173_v35 = vpop.f32.mrf.mxu0 }
 0x1e6   : > { %v3539_v7 = vpop.f32.mrf.mxu1 }
 0x1e7   : > { %9880 = vst [vmem:[#allocation36_spill] sm:$0xff] %v9171_v60  ;;  %v9175_v20 = vpop.f32.mrf.mxu0 }
 0x1e8   : > { %v6105_v51 = vpop.f32.mrf.mxu1 }
 0x1e9   : > { %v9177_v52 = vpop.f32.mrf.mxu0 }
 0x1ea   : > { %v9179_v14 = vpop.f32.mrf.mxu1 }
 0x1eb   : > { %v9181_v23 = vpop.f32.mrf.mxu0 }
 0x1ec   : > { %v9183_v43 = vpop.f32.mrf.mxu1 }
 0x1ed   : > { %v9185_v33 = vpop.f32.mrf.mxu0 }
 0x1ee   : > { %v9187_v16 = vpop.f32.mrf.mxu1 }
 0x1ef   : > { %v9189_v1 = vpop.f32.mrf.mxu0 }
 0x1f0   : > { %v9191_v36 = vpop.f32.mrf.mxu1 }
 0x1f1   : > { %v9193_v17 = vpop.f32.mrf.mxu0 }
 0x1f2   : > { %v9195_v57 = vpop.f32.mrf.mxu1 }
 0x1f3   : > { %v9197_v28 = vpop.f32.mrf.mxu0 }
 0x1f4   : > { %v9199_v48 = vpop.f32.mrf.mxu1 }
 0x1f5   : > { %v9201_v24 = vpop.f32.mrf.mxu0 }
 0x1f6   : > { %v9203_v30 = vpop.f32.mrf.mxu1 }
 0x1f7   : > { %v9205_v40 = vpop.f32.mrf.mxu0 }
 0x1f8   : > { %v9207_v10 = vpop.f32.mrf.mxu1 }
 0x1f9   : > { %v9209_v9 = vpop.f32.mrf.mxu0 }
 0x1fa   : > { %v9211_v4 = vpop.f32.mrf.mxu1 }
 0x1fb   : > { %v9213_v26 = vpop.f32.mrf.mxu0 }
 0x1fc   : > { %v9215_v49 = vpop.f32.mrf.mxu1 }
 0x1fd   : > { %v9217_v41 = vpop.f32.mrf.mxu0 }
 0x1fe   : > { %v9219_v46 = vpop.f32.mrf.mxu1 }
 0x1ff   : > { %v9221_v37 = vpop.f32.mrf.mxu0 }
 0x200   : > { %v9223_v0 = vpop.f32.mrf.mxu1 }
 0x201   : > { %v9225_v32 = vpop.f32.mrf.mxu0 }
 0x202   : > { %v9227_v60 = vpop.f32.mrf.mxu1 }
 0x203   : > { %v9229_v50 = vpop.f32.mrf.mxu0 }
 0x204   : > { %9881 = vst [vmem:[#allocation39_spill] sm:$0xff] %v9229_v50  ;;  %v9231_v63 = vpop.f32.mrf.mxu1 }
 0x205   : > { %v9233_v47 = vpop.f32.mrf.mxu0 }
 0x206   : > { %9882 = vst [vmem:[#allocation32_spill] sm:$0xff] %v9233_v47  ;;  %v9235_v31 = vpop.f32.mrf.mxu1 }
 0x207   : > { %v9237_v27 = vpop.f32.mrf.mxu0 }
 0x208   : > { %9883 = vst [vmem:[#allocation40_spill] sm:$0xff] %v9237_v27  ;;  %v9239_v54 = vpop.f32.mrf.mxu1 }
 0x209   : > { %9884 = vst [vmem:[#allocation25_spill] sm:$0xff] %v9239_v54  ;;  %v9241_v21 = vpop.f32.mrf.mxu0 }
 0x20a   : > { %9885 = vst [vmem:[#allocation37_spill] sm:$0xff] %v9241_v21  ;;  %v9243_v12 = vpop.f32.mrf.mxu1 }
 0x20b   : > { %9886 = vst [vmem:[#allocation23_spill] sm:$0xff] %v9243_v12  ;;  %v9245_v55 = vpop.f32.mrf.mxu0 }
 0x20c   : > { %9887 = vst [vmem:[#allocation43_spill] sm:$0xff] %v9245_v55  ;;  %v9247_v34 = vpop.f32.mrf.mxu1 }
 0x20d   : > { %9888 = vst [vmem:[#allocation33_spill] sm:$0xff] %v9247_v34  ;;  %v9249_v13 = vpop.f32.mrf.mxu0 }
 0x20e   : > { %9889 = vst [vmem:[#allocation48_spill] sm:$0xff] %v9249_v13  ;;  %v9251_v5 = vpop.f32.mrf.mxu1 }
 0x20f   : > { %9890 = vst [vmem:[#allocation30_spill] sm:$0xff] %v9251_v5  ;;  %v9253_v50 = vpop.f32.mrf.mxu0 }
 0x210   : > { %9891 = vst [vmem:[#allocation52_spill] sm:$0xff] %v9253_v50  ;;  %v9255_v47 = vpop.f32.mrf.mxu1 }
 0x211   : > { %9892 = vst [vmem:[#allocation60_spill] sm:$0xff] %v9255_v47  ;;  %v9257_v58 = vpop.f32.mrf.mxu0 }
 0x212   : > { %9893 = vst [vmem:[#allocation44_spill] sm:$0xff] %v9257_v58  ;;  %v9259_v27 = vpop.f32.mrf.mxu1 }
 0x213   : > { %9894 = vst [vmem:[#allocation45_spill] sm:$0xff] %v9259_v27  ;;  %v9261_v54 = vpop.f32.mrf.mxu0 }
 0x214   : > { %9895 = vst [vmem:[#allocation46_spill] sm:$0xff] %v9261_v54  ;;  %v9263_v21 = vpop.f32.mrf.mxu1 }
 0x215   : > { %9896 = vst [vmem:[#allocation50_spill] sm:$0xff] %v9263_v21  ;;  %v9265_v12 = vpop.f32.mrf.mxu0 }
 0x216   : > { %9897 = vst [vmem:[#allocation41_spill] sm:$0xff] %v9265_v12  ;;  %v9267_v55 = vpop.f32.mrf.mxu1  ;;  %v3668_v12 = vadd.f32 %v6104_v22, %v9074_v53  ;;  %v3667_v53 = vadd.f32 %v9179_v14, %v9083_v25 }
 0x217   : > { %9898 = vst [vmem:[#allocation24_spill] sm:$0xff] %v9267_v55  ;;  %v9269_v34 = vpop.f32.mrf.mxu0 }
 0x218   : > { %9899 = vst [vmem:[#allocation53_spill] sm:$0xff] %v9269_v34  ;;  %v9271_v13 = vpop.f32.mrf.mxu1 }
 0x219   : > { %9900 = vst [vmem:[#allocation54_spill] sm:$0xff] %v9271_v13  ;;  %v9273_v50 = vpop.f32.mrf.mxu0  ;;  %v3666_v13 = vadd.f32 %v3539_v7, %v9077_v2  ;;  %v3672_v7 = vadd.f32 %v9183_v43, %v9086_v42 }
 0x21a   : > { %9901 = vst [vmem:[#allocation56_spill] sm:$0xff] %v9273_v50  ;;  %v9275_v47 = vpop.f32.mrf.mxu1 }
 0x21b   : > { %9902 = vst [vmem:[#allocation57_spill] sm:$0xff] %v9275_v47  ;;  %v9277_v58 = vpop.f32.mrf.mxu0  ;;  %v4043_v47 = vadd.f32 %v9164_v6, %v3668_v12  ;;  %v4047_v42 = vadd.f32 %v9177_v52, %v3672_v7 }
 0x21c   : > { %9903 = vst [vmem:[#allocation11_spill] sm:$0xff] %v9277_v58  ;;  %v9279_v27 = vpop.f32.mrf.mxu1  ;;  %v3669_v58 = vadd.f32 %v6105_v51, %v9080_v11  ;;  %v4042_v51 = vadd.f32 %v9175_v20, %v3667_v53 }
 0x21d   : > { %9904 = vst [vmem:[#allocation49_spill] sm:$0xff] %v9279_v27  ;;  %v9281_v54 = vpop.f32.mrf.mxu0 }
 0x21e   : > { %9905 = vst [vmem:[#allocation38_spill] sm:$0xff] %v9281_v54  ;;  %v9283_v21 = vpop.f32.mrf.mxu1  ;;  %v4044_v2 = vadd.f32 %v9173_v35, %v3669_v58 }
 0x21f   : > { %9906 = vst [vmem:[#allocation27_spill] sm:$0xff] %v9283_v21  ;;  %v9286_v55 = vpop.f32.mrf.mxu0  ;;  %v4041_v21 = vadd.f32 %v9169_v61, %v3666_v13  ;;  %v3670_v13 = vadd.f32 %v9187_v16, %v9089_v59 }
 0x220   : > { %9907 = vst [vmem:[#allocation47_spill] sm:$0xff] %v9286_v55  ;;  %v9288_v34 = vpop.f32.mrf.mxu1 }
 0x221   : > { %9908 = vst [vmem:[#allocation42_spill] sm:$0xff] %v9288_v34  ;;  %v6206_v5 = vpop.f32.mrf.mxu0  ;;  %v4045_v35 = vadd.f32 %v9181_v23, %v3670_v13 }
 0x222   : > { %v9291_v50 = vpop.f32.mrf.mxu1 }
 0x223   : > { %9909 = vst [vmem:[#allocation58_spill] sm:$0xff] %v9291_v50  ;;  %v5014_v27 = vpop.f32.mrf.mxu0 }
 0x224   : > { %v6172_v54 = vpop.f32.mrf.mxu1 }
 0x225   : > { %v4721_v22 = vadd.f32 %v6172_v54, %v4043_v47  ;;  %v6207_v55 = vpop.f32.mrf.mxu0 }
 0x226   : > { %v4592_v34 = vpop.f32.mrf.mxu1 }
 0x227   : > { %v5143_v50 = vadd.f32 %v6206_v5, %v4721_v22  ;;  %v4719_v12 = vadd.f32 %v4592_v34, %v4041_v21  ;;  %v5017_v6 = vpop.f32.mrf.mxu0  ;;  %v3673_v5 = vadd.f32 %v9191_v36, %v9092_v56  ;;  %v3676_v56 = vadd.f32 %v9199_v48, %v9098_v44 }
 0x228   : > { %v6173_v11 = vpop.f32.mrf.mxu1  ;;  %v3677_v44 = vadd.f32 %v9207_v10, %v9104_v45  ;;  %v3680_v45 = vadd.f32 %v9215_v49, %v9110_v3  ;;  %v3681_v3 = vadd.f32 %v9223_v0, %v9116_v19  ;;  %v3684_v19 = vadd.f32 %v9231_v63, %v9122_v39  ;;  %v9911_v39 = vld [vmem:[#allocation25_spill] sm:$0xff] }
 0x229   : > { %5175 = vst [vmem:[%s9305_s7 + $0x10] sm:$0xff] %v5143_v50  ;;  %v5141_v25 = vadd.f32 %v5014_v27, %v4719_v12  ;;  %v4722_v58 = vadd.f32 %v6173_v11, %v4044_v2  ;;  %v6210_v54 = vpop.f32.mrf.mxu0  ;;  %v3671_v27 = vadd.f32 %v9195_v57, %v9095_v29  ;;  %v4048_v43 = vadd.f32 %v9185_v33, %v3673_v5 }
 0x22a   : > { %v4595_v47 = vpop.f32.mrf.mxu1  ;;  %v3674_v29 = vadd.f32 %v9203_v30, %v9101_v18  ;;  %v4051_v7 = vadd.f32 %v9193_v17, %v3676_v56  ;;  %v3675_v18 = vadd.f32 %v9211_v4, %v9107_v38  ;;  %v3678_v38 = vadd.f32 %v9219_v46, %v9113_v15 }
 0x22b   : > { %5173 = vst [vmem:[%s9305_s7] sm:$0xff] %v5141_v25  ;;  %v5144_v34 = vadd.f32 %v6207_v55, %v4722_v58  ;;  %v4720_v21 = vadd.f32 %v4595_v47, %v4042_v51  ;;  %v5030_v59 = vpop.f32.mrf.mxu0  ;;  %v4046_v53 = vadd.f32 %v9189_v1, %v3671_v27  ;;  %v4052_v25 = vadd.f32 %v9201_v24, %v3677_v44  ;;  %v9915_v44 = vld [vmem:[#allocation32_spill] sm:$0xff] }
 0x22c   : > { %v6176_v61 = vpop.f32.mrf.mxu1  ;;  %v4049_v11 = vadd.f32 %v9197_v28, %v3674_v29  ;;  %v4050_v47 = vadd.f32 %v9205_v40, %v3675_v18  ;;  %v3679_v15 = vadd.f32 %v9227_v60, %v9119_v8  ;;  %v3682_v8 = vadd.f32 %v9235_v31, %v9125_v62  ;;  %v9912_v29 = vld [vmem:[#allocation39_spill] sm:$0xff] }
 0x22d   : > { %5176 = vst [vmem:[%s9305_s7 + $0x18] sm:$0xff] %v5144_v34  ;;  %v5142_v50 = vadd.f32 %v5017_v6, %v4720_v21  ;;  %v4725_v20 = vadd.f32 %v6176_v61, %v4047_v42  ;;  %v6211_v14 = vpop.f32.mrf.mxu0  ;;  %v4055_v34 = vadd.f32 %v9209_v9, %v3680_v45  ;;  %v4053_v61 = vadd.f32 %v9213_v26, %v3678_v38  ;;  %v9914_v62 = vld [vmem:[#allocation23_spill] sm:$0xff]  ;;  %v9920_v45 = vld [vmem:[#allocation30_spill] sm:$0xff]  ;;  %v9921_v38 = vld [vmem:[#allocation37_spill] sm:$0xff] }
 0x22e   : > { %v4608_v52 = vpop.f32.mrf.mxu1 }
 0x22f   : > { %5174 = vst [vmem:[%s9305_s7 + $0x8] sm:$0xff] %v5142_v50  ;;  %v5147_v55 = vadd.f32 %v6210_v54, %v4725_v20  ;;  %v4723_v16 = vadd.f32 %v4608_v52, %v4045_v35  ;;  %v5033_v36 = vpop.f32.mrf.mxu0  ;;  %v4056_v50 = vadd.f32 %v9217_v41, %v3681_v3  ;;  %v4054_v52 = vadd.f32 %v9221_v37, %v3679_v15  ;;  %v9926_v15 = vld [vmem:[#allocation45_spill] sm:$0xff] }
 0x230   : > { %v6177_v23 = vpop.f32.mrf.mxu1 }
 0x231   : > { %5179 = vst [vmem:[%s9305_s7 + $0x30] sm:$0xff] %v5147_v55  ;;  %v5145_v57 = vadd.f32 %v5030_v59, %v4723_v16  ;;  %v4726_v22 = vadd.f32 %v6177_v23, %v4048_v43  ;;  %v4059_v55 = vadd.f32 %v9225_v32, %v3684_v19  ;;  %v9910_v16 = vld [vmem:[#allocation14_spill] sm:$0xff]  ;;  %v9927_v19 = vld [vmem:[#allocation48_spill] sm:$0xff] }
 0x232   : > { %v6214_v2 = vpop.f32.mrf.mxu0  ;;  %v4611_v33 = vpop.f32.mrf.mxu1  ;;  %v3685_v63 = vadd.f32 %v9911_v39, %v9910_v16  ;;  %v9932_v16 = vld [vmem:[#allocation24_spill] sm:$0xff] }
 0x233   : > { %5177 = vst [vmem:[%s9305_s7 + $0x20] sm:$0xff] %v5145_v57  ;;  %v5148_v48 = vadd.f32 %v6211_v14, %v4726_v22  ;;  %v4724_v12 = vadd.f32 %v4611_v33, %v4046_v53  ;;  %v4057_v57 = vadd.f32 %v9912_v29, %v3682_v8  ;;  %v9913_v22 = vld [vmem:[#allocation13_spill] sm:$0xff] }
 0x234   : > { %v5046_v6 = vpop.f32.mrf.mxu0  ;;  %v6180_v1 = vpop.f32.mrf.mxu1  ;;  %v3683_v31 = vadd.f32 %v9914_v62, %v9913_v22  ;;  %v9935_v22 = vld [vmem:[#allocation54_spill] sm:$0xff] }
 0x235   : > { %5180 = vst [vmem:[%s9305_s7 + $0x38] sm:$0xff] %v5148_v48  ;;  %v5146_v30 = vadd.f32 %v5033_v36, %v4724_v12  ;;  %v4729_v51 = vadd.f32 %v6180_v1, %v4051_v7  ;;  %v4060_v48 = vadd.f32 %v9915_v44, %v3685_v63  ;;  %v9916_v12 = vld [vmem:[#allocation17_spill] sm:$0xff] }
 0x236   : > { %v6215_v13 = vpop.f32.mrf.mxu0  ;;  %v4624_v17 = vpop.f32.mrf.mxu1 }
 0x237   : > { %5178 = vst [vmem:[%s9305_s7 + $0x28] sm:$0xff] %v5146_v30  ;;  %v5151_v10 = vadd.f32 %v6214_v2, %v4729_v51  ;;  %v4727_v58 = vadd.f32 %v4624_v17, %v4049_v11 }
 0x238   : > { %v5049_v54 = vpop.f32.mrf.mxu0  ;;  %v6181_v28 = vpop.f32.mrf.mxu1 }
 0x239   : > { %5183 = vst [vmem:[%s9305_s7 + $0x50] sm:$0xff] %v5151_v10  ;;  %v5149_v4 = vadd.f32 %v5046_v6, %v4727_v58  ;;  %v4730_v42 = vadd.f32 %v6181_v28, %v4052_v25  ;;  %v9917_v6 = vld [vmem:[#allocation33_spill] sm:$0xff]  ;;  %v9919_v25 = vld [vmem:[#allocation7_spill] sm:$0xff] }
 0x23a   : > { %v6218_v5 = vpop.f32.mrf.mxu0  ;;  %v4627_v24 = vpop.f32.mrf.mxu1  ;;  %v3688_v1 = vadd.f32 %v9917_v6, %v9916_v12  ;;  %v3686_v10 = vadd.f32 %v9920_v45, %v9919_v25  ;;  %v9938_v12 = vld [vmem:[#allocation57_spill] sm:$0xff] }
 0x23b   : > { %5181 = vst [vmem:[%s9305_s7 + $0x40] sm:$0xff] %v5149_v4  ;;  %v5152_v49 = vadd.f32 %v6215_v13, %v4730_v42  ;;  %v4728_v21 = vadd.f32 %v4627_v24, %v4050_v47  ;;  %v9918_v13 = vld [vmem:[#allocation40_spill] sm:$0xff]  ;;  %v9941_v25 = vld [vmem:[#allocation49_spill] sm:$0xff] }
 0x23c   : > { %v5062_v59 = vpop.f32.mrf.mxu0  ;;  %v6184_v40 = vpop.f32.mrf.mxu1  ;;  %v4058_v17 = vadd.f32 %v9918_v13, %v3683_v31  ;;  %v4063_v4 = vadd.f32 %v9921_v38, %v3688_v1  ;;  %v9922_v42 = vld [vmem:[#allocation16_spill] sm:$0xff] }
 0x23d   : > { %5184 = vst [vmem:[%s9305_s7 + $0x58] sm:$0xff] %v5152_v49  ;;  %v5150_v46 = vadd.f32 %v5049_v54, %v4728_v21  ;;  %v4733_v35 = vadd.f32 %v6184_v40, %v4055_v34 }
 0x23e   : > { %v6219_v27 = vpop.f32.mrf.mxu0  ;;  %v4640_v9 = vpop.f32.mrf.mxu1 }
 0x23f   : > { %5182 = vst [vmem:[%s9305_s7 + $0x48] sm:$0xff] %v5150_v46  ;;  %v5155_v0 = vadd.f32 %v6218_v5, %v4733_v35  ;;  %v4731_v20 = vadd.f32 %v4640_v9, %v4053_v61  ;;  %v9923_v5 = vld [vmem:[#allocation60_spill] sm:$0xff]  ;;  %v9925_v61 = vld [vmem:[#allocation21_spill] sm:$0xff] }
 0x240   : > { %v5065_v14 = vpop.f32.mrf.mxu0  ;;  %v6185_v26 = vpop.f32.mrf.mxu1  ;;  %v3689_v24 = vadd.f32 %v9923_v5, %v9922_v42  ;;  %v3687_v46 = vadd.f32 %v9926_v15, %v9925_v61  ;;  %v9944_v42 = vld [vmem:[#allocation27_spill] sm:$0xff]  ;;  %v9947_v61 = vld [vmem:[#allocation42_spill] sm:$0xff] }
 0x241   : > { %5187 = vst [vmem:[%s9305_s7 + $0x70] sm:$0xff] %v5155_v0  ;;  %v5153_v60 = vadd.f32 %v5062_v59, %v4731_v20  ;;  %v4734_v43 = vadd.f32 %v6185_v26, %v4056_v50  ;;  %v9924_v59 = vld [vmem:[#allocation43_spill] sm:$0xff] }
 0x242   : > { %v6222_v56 = vpop.f32.mrf.mxu0  ;;  %v4643_v41 = vpop.f32.mrf.mxu1  ;;  %v4061_v40 = vadd.f32 %v9924_v59, %v3686_v10  ;;  %v4064_v0 = vadd.f32 %v9927_v19, %v3689_v24  ;;  %v9928_v20 = vld [vmem:[#allocation31_spill] sm:$0xff] }
 0x243   : > { %5185 = vst [vmem:[%s9305_s7 + $0x60] sm:$0xff] %v5153_v60  ;;  %v5156_v36 = vadd.f32 %v6219_v27, %v4734_v43  ;;  %v4732_v23 = vadd.f32 %v4643_v41, %v4054_v52 }
 0x244   : > { %v5078_v53 = vpop.f32.mrf.mxu0  ;;  %v6188_v37 = vpop.f32.mrf.mxu1 }
 0x245   : > { %5188 = vst [vmem:[%s9305_s7 + $0x78] sm:$0xff] %v5156_v36  ;;  %v5154_v2 = vadd.f32 %v5065_v14, %v4732_v23  ;;  %v4737_v33 = vadd.f32 %v6188_v37, %v4059_v55  ;;  %v9929_v14 = vld [vmem:[#allocation50_spill] sm:$0xff]  ;;  %v9931_v55 = vld [vmem:[#allocation20_spill] sm:$0xff] }
 0x246   : > { %v6223_v7 = vpop.f32.mrf.mxu0  ;;  %v4656_v32 = vpop.f32.mrf.mxu1  ;;  %v3692_v26 = vadd.f32 %v9929_v14, %v9928_v20  ;;  %v3690_v39 = vadd.f32 %v9932_v16, %v9931_v55  ;;  %v9933_v37 = vld [vmem:[#allocation44_spill] sm:$0xff]  ;;  %v9950_v20 = vld [vmem:[#allocation58_spill] sm:$0xff] }
 0x247   : > { %5186 = vst [vmem:[%s9305_s7 + $0x68] sm:$0xff] %v5154_v2  ;;  %v5159_v11 = vadd.f32 %v6222_v56, %v4737_v33  ;;  %v4735_v18 = vadd.f32 %v4656_v32, %v4057_v57  ;;  %v9930_v56 = vld [vmem:[#allocation52_spill] sm:$0xff]  ;;  %v9934_v57 = vld [vmem:[#allocation18_spill] sm:$0xff] }
 0x248   : > { %v5081_v30 = vpop.f32.mrf.mxu0  ;;  %v6189_v51 = vpop.f32.mrf.mxu1  ;;  %v4062_v41 = vadd.f32 %v9930_v56, %v3687_v46  ;;  %v4067_v29 = vadd.f32 %v9933_v37, %v3692_v26  ;;  %v3693_v62 = vadd.f32 %v9935_v22, %v9934_v57  ;;  %v9936_v32 = vld [vmem:[#allocation46_spill] sm:$0xff] }
 0x249   : > { %5191 = vst [vmem:[%s9305_s7 + $0x90] sm:$0xff] %v5159_v11  ;;  %v5157_v58 = vadd.f32 %v5078_v53, %v4735_v18  ;;  %v4738_v54 = vadd.f32 %v6189_v51, %v4060_v48  ;;  %v4065_v44 = vadd.f32 %v9936_v32, %v3690_v39  ;;  %v9937_v48 = vld [vmem:[#allocation19_spill] sm:$0xff]  ;;  %v9939_v51 = vld [vmem:[#allocation41_spill] sm:$0xff] }
 0x24a   : > { %v6226_v28 = vpop.f32.mrf.mxu0  ;;  %v4659_v47 = vpop.f32.mrf.mxu1  ;;  %v3691_v6 = vadd.f32 %v9938_v12, %v9937_v48  ;;  %v4068_v13 = vadd.f32 %v9939_v51, %v3693_v62  ;;  %v9952_v39 = vld [vmem:[#allocation47_spill] sm:$0xff] }
 0x24b   : > { %5189 = vst [vmem:[%s9305_s7 + $0x80] sm:$0xff] %v5157_v58  ;;  %v5160_v34 = vadd.f32 %v6223_v7, %v4738_v54  ;;  %v4736_v3 = vadd.f32 %v4659_v47, %v4058_v17  ;;  %v9940_v17 = vld [vmem:[#allocation9_spill] sm:$0xff] }
 0x24c   : > { %v5094_v49 = vpop.f32.mrf.mxu0  ;;  %v6192_v21 = vpop.f32.mrf.mxu1  ;;  %v3696_v45 = vadd.f32 %v9941_v25, %v9940_v17  ;;  %v9942_v47 = vld [vmem:[#allocation53_spill] sm:$0xff] }
 0x24d   : > { %5192 = vst [vmem:[%s9305_s7 + $0x98] sm:$0xff] %v5160_v34  ;;  %v5158_v35 = vadd.f32 %v5081_v30, %v4736_v3  ;;  %v4741_v27 = vadd.f32 %v6192_v21, %v4063_v4  ;;  %v4066_v38 = vadd.f32 %v9942_v47, %v3691_v6  ;;  %v9943_v4 = vld [vmem:[#allocation34_spill] sm:$0xff]  ;;  %v9945_v21 = vld [vmem:[#allocation56_spill] sm:$0xff] }
 0x24e   : > { %v6227_v9 = vpop.f32.mrf.mxu0  ;;  %v4672_v50 = vpop.f32.mrf.mxu1  ;;  %v3694_v5 = vadd.f32 %v9944_v42, %v9943_v4  ;;  %v4071_v59 = vadd.f32 %v9945_v21, %v3696_v45 }
 0x24f   : > { %5190 = vst [vmem:[%s9305_s7 + $0x88] sm:$0xff] %v5158_v35  ;;  %v5163_v52 = vadd.f32 %v6226_v28, %v4741_v27  ;;  %v4739_v8 = vadd.f32 %v4672_v50, %v4061_v40  ;;  %v9946_v40 = vld [vmem:[#allocation35_spill] sm:$0xff] }
 0x250   : > { %v5097_v60 = vpop.f32.mrf.mxu0  ;;  %v6193_v43 = vpop.f32.mrf.mxu1  ;;  %v3697_v15 = vadd.f32 %v9947_v61, %v9946_v40  ;;  %v9948_v50 = vld [vmem:[#allocation11_spill] sm:$0xff] }
 0x251   : > { %5195 = vst [vmem:[%s9305_s7 + $0xb0] sm:$0xff] %v5163_v52  ;;  %v5161_v63 = vadd.f32 %v5094_v49, %v4739_v8  ;;  %v4742_v36 = vadd.f32 %v6193_v43, %v4064_v0  ;;  %v4069_v19 = vadd.f32 %v9948_v50, %v3694_v5  ;;  %v9949_v0 = vld [vmem:[#allocation36_spill] sm:$0xff] }
 0x252   : > { %v6230_v23 = vpop.f32.mrf.mxu0  ;;  %v4675_v53 = vpop.f32.mrf.mxu1  ;;  %v3695_v14 = vadd.f32 %v9950_v20, %v9949_v0 }
 0x253   : > { %5193 = vst [vmem:[%s9305_s7 + $0xa0] sm:$0xff] %v5161_v63  ;;  %v5164_v31 = vadd.f32 %v6227_v9, %v4742_v36  ;;  %v4740_v2 = vadd.f32 %v4675_v53, %v4062_v41 }
 0x254   : > { %v5110_v33 = vpop.f32.mrf.mxu0  ;;  %v6196_v7 = vpop.f32.mrf.mxu1  ;;  %v4070_v63 = vadd.f32 %v9952_v39, %v3695_v14 }
 0x255   : > { %5196 = vst [vmem:[%s9305_s7 + $0xb8] sm:$0xff] %v5164_v31  ;;  %v5162_v1 = vadd.f32 %v5097_v60, %v4740_v2  ;;  %v4745_v11 = vadd.f32 %v6196_v7, %v4067_v29  ;;  %v9951_v60 = vld [vmem:[#allocation38_spill] sm:$0xff] }
 0x256   : > { %v6231_v18 = vpop.f32.mrf.mxu0  ;;  %v4688_v30 = vpop.f32.mrf.mxu1  ;;  %v4072_v43 = vadd.f32 %v9951_v60, %v3697_v15 }
 0x257   : > { %5194 = vst [vmem:[%s9305_s7 + $0xa8] sm:$0xff] %v5162_v1  ;;  %v5167_v10 = vadd.f32 %v6230_v23, %v4745_v11  ;;  %v4743_v58 = vadd.f32 %v4688_v30, %v4065_v44 }
 0x258   : > { %v5113_v54 = vpop.f32.mrf.mxu0  ;;  %v6197_v28 = vpop.f32.mrf.mxu1 }
 0x259   : > { %5199 = vst [vmem:[%s9305_s7 + $0xd0] sm:$0xff] %v5167_v10  ;;  %v5165_v24 = vadd.f32 %v5110_v33, %v4743_v58  ;;  %v4746_v34 = vadd.f32 %v6197_v28, %v4068_v13 }
 0x25a   : > { %v6234_v3 = vpop.f32.mrf.mxu0  ;;  %v4691_v49 = vpop.f32.mrf.mxu1 }
 0x25b   : > { %5197 = vst [vmem:[%s9305_s7 + $0xc0] sm:$0xff] %v5165_v24  ;;  %v5168_v46 = vadd.f32 %v6231_v18, %v4746_v34  ;;  %v4744_v35 = vadd.f32 %v4691_v49, %v4066_v38 }
 0x25c   : > { %v6200_v27 = vpop.f32.mrf.mxu1  ;;  %v5126_v9 = vpop.f32.mrf.mxu0 }
 0x25d   : > { %5200 = vst [vmem:[%s9305_s7 + $0xd8] sm:$0xff] %v5168_v46  ;;  %v5166_v26 = vadd.f32 %v5113_v54, %v4744_v35  ;;  %v4749_v52 = vadd.f32 %v6200_v27, %v4071_v59 }
 0x25e   : > { %v4704_v8 = vpop.f32.mrf.mxu1  ;;  %v6235_v16 = vpop.f32.mrf.mxu0 }
 0x25f   : > { %5198 = vst [vmem:[%s9305_s7 + $0xc8] sm:$0xff] %v5166_v26  ;;  %v5171_v56 = vadd.f32 %v6234_v3, %v4749_v52  ;;  %v4747_v41 = vadd.f32 %v4704_v8, %v4069_v19 }
 0x260   : > { %v6201_v55 = vpop.f32.mrf.mxu1  ;;  %v5129_v57 = vpop.f32.mrf.mxu0 }
 0x261   : > { %5203 = vst [vmem:[%s9305_s7 + $0xf0] sm:$0xff] %v5171_v56  ;;  %v5169_v36 = vadd.f32 %v5126_v9, %v4747_v41  ;;  %v4750_v23 = vadd.f32 %v6201_v55, %v4072_v43 }
 0x262   : > { %v4707_v53 = vpop.f32.mrf.mxu1 }
 0x263   : > { %5201 = vst [vmem:[%s9305_s7 + $0xe0] sm:$0xff] %v5169_v36  ;;  %v5172_v37 = vadd.f32 %v6235_v16, %v4750_v23  ;;  %v4748_v29 = vadd.f32 %v4707_v53, %v4070_v63 }
 0x265   : > { %5204 = vst [vmem:[%s9305_s7 + $0xf8] sm:$0xff] %v5172_v37  ;;  %v5170_v22 = vadd.f32 %v5129_v57, %v4748_v29 }
 0x267   : > { %5202 = vst [vmem:[%s9305_s7 + $0xe8] sm:$0xff] %v5170_v22 }
 0x268   : > { %6369 = shalt.err (!%p6366_p7)
}
 0x269   : > { %s6370_s27 = scalar_lea.hbm %s9422_s20, 4096  ;;  %s6374_s30 = scalar_lea.hbm %s9476_s2, 8192 }
 0x26a   : > { %p6371_p8 = scmp.ne.s32.totalorder %s9422_s20, %s6370_s27  ;;  %p6375_p13 = scmp.lt.s32.totalorder %s9422_s20, %s9476_s2 }
 0x26b   : > { %p6376_p0 = scmp.lt.s32.totalorder %s6374_s30, %s6370_s27 }
 0x26c   : > { %p6372_p11 = pnand %p6371_p8, %p6491_p5 }
 0x26d   : > { %p6377_p1 = por %p6376_p0, %p6375_p13 }
 0x26e   : > { %p6373_p12 = pneg %p6372_p11 }
 0x270   : > { %p6378_p2 = pnand %p6377_p1, %p6373_p12 }
 0x272   : > { %6381 = shalt.err (!%p6378_p2)
}
 0x273   : > { %s6435_s6 = smov 128   ;;  %s6436_s7 = smov 8  }
 0x274   : > { %6251 = dma.vmem_to_hbm [thread:$0]  (%p6491_p5), %s9424_s15, 4096, %s9422_s20, %s5206_s12, %s6435_s6, %s6435_s6, %s6436_s7  }
 0x275 PF: > { %s5237_s8 = sand.u32 1, %s6412_s9   ;;  %p6254_p3 = pnand %p5327_p10, %p6502_p9 }
 0x276   : > { %s5238_s16 = scalar_lea.sflag [#allocation4], %s5237_s8 }
 0x277   : > { %p6255_p4 = pneg %p6254_p3 }
 0x279   : > { %6407 = dma.done.wait (%p6255_p4), %s5238_s16, 4096  }
 0x27a   : > { %6409 = vsyncadd (%p6255_p4), %s5238_s16, 4294963200  ;;  %s15_s14 = sadd.s32 1, %s6432_s14   ;;  %s9953_s9 = smov %s6416_s10 }
 0x27b   : > { %p12_p6 = scmp.ge.s32.totalorder %s15_s14, 4   ;;  %s9954_s10 = smov %s6420_s11 }
 0x27c   : > { %s9955_s11 = smov %s6500_s21  ;;  %s9956_s12 = smov %s6428_s13 }
 0x27d   : > { %s9957_s13 = smov %s9959_s17  ;;  %14 = sbr.rel (!%p12_p6) target bundleno = 4 (0x4), region = 122 }
 0x282   :  { %5243 = vsyncpa [#allocation4], 1 }
 0x283   :  { %5245 = vsyncpa [#allocation4 + $0x1], 1 }

</bundles_post_ra>
